<compile_context>
chip_gen: v7x
topology: tpu7x:2x2x1
jax: 0.10.0
libtpu: 0.0.40
codegen_flags: <defaults>
</compile_context>

<pallas_src>
import functools

import jax
import jax.numpy as jnp
from jax.experimental import pallas as pl
from jax.experimental.pallas import tpu as pltpu

# --- hyperparameters implied by the reference module (scale = 1) ---
EMBED_DIM = 32
BLOCK_SIZE = 8
NUM_BLOCKS = 4
NUM_HEADS = 4
HEAD_SIZE = EMBED_DIM // NUM_HEADS
VOCAB_SIZE = 65          # synthetic stand-in for len(set(text)) from logic.txt
VOCAB_PAD = 128          # lane-dense padded vocab width (rows of the emb
                         # table and columns of the output projection)
LN_EPS = 1e-5


def _layernorm(x, g, b):
    mu = jnp.mean(x, axis=-1, keepdims=True)
    var = jnp.mean((x - mu) ** 2, axis=-1, keepdims=True)
    return (x - mu) * jax.lax.rsqrt(var + LN_EPS) * g + b


def gpt_kernel(ids_ref, vemb_ref, pemb_ref,
               wkqv_ref, wproj_ref, bproj_ref,
               ln1g_ref, ln1b_ref, ln2g_ref, ln2b_ref,
               w1_ref, b1_ref, w2_ref, b2_ref,
               lnfg_ref, lnfb_ref, wout_ref, bout_ref,
               out_ref, *, num_heads):
    B, T, Vp = out_ref.shape          # Vp = padded vocab width (lane-dense)
    E = pemb_ref.shape[1]
    H = num_heads
    hs = E // H
    G = B * H                         # head-batched leading dim
    L = wkqv_ref.shape[0]
    Vrows = vemb_ref.shape[0]         # padded embedding rows (128)

    # ---- embeddings folded in-kernel: one-hot matmul gather + pos add ----
    ids = ids_ref[...]                                            # (B*T, 1) i32
    vocab_iota = jax.lax.broadcasted_iota(jnp.int32, (B * T, Vrows), 1)
    onehot = (vocab_iota == ids).astype(jnp.float32)              # (B*T, 128)
    tok = jnp.dot(onehot, vemb_ref[...],
                  preferred_element_type=jnp.float32)             # (B*T, E)
    x = (tok.reshape(B, T, E) + pemb_ref[0:T, :][None, :, :]).reshape(B * T, E)

    # Single (T, T) additive causal bias; broadcasts over the head batch.
    # Reference: masked_fill(tril == 0, -inf)  ==  keep j <= i.
    row = jax.lax.broadcasted_iota(jnp.int32, (T, T), 0)
    col = jax.lax.broadcasted_iota(jnp.int32, (T, T), 1)
    causal_bias = jnp.where(col <= row, 0.0, -1e30).astype(jnp.float32)

    for l in range(L):
        # ---------- multi-head self-attention over layernorm_1(x) ----------
        xn = _layernorm(x, ln1g_ref[l][None, :], ln1b_ref[l][None, :])
        xn_b = xn.astype(jnp.bfloat16)
        # Single fused K/Q/V projection (bf16 operands, f32 accumulation).
        # The reference scale (embed_dim ** -0.5) is folded into the Q
        # columns of wkqv on the host.
        kqv = jnp.dot(xn_b, wkqv_ref[l],
                      preferred_element_type=jnp.float32)         # (B*T, 3E)

        # Head-batched layout via ONE reshape + ONE lane-aware transpose:
        # (B*T, 3E) -> (B, T, 3H, hs) -> (B, 3H, T, hs); groups 0..H-1 are
        # the K heads, H..2H-1 the Q heads, 2H..3H-1 the V heads.
        kqv4 = pltpu.einshape("btgd->bgtd", kqv.reshape(B, T, 3 * H, hs))
        kg = kqv4[:, 0 * H:1 * H].reshape(G, T, hs)
        qg = kqv4[:, 1 * H:2 * H].reshape(G, T, hs)
        vg = kqv4[:, 2 * H:3 * H].reshape(G, T, hs)

        # Reference computes k @ q^T (NOT q @ k^T); softmax is over the q
        # index (last axis).  One batched dot_general for all heads.
        s = jnp.einsum('gid,gjd->gij', kg, qg,
                       preferred_element_type=jnp.float32) + causal_bias
        # Softmax is shift-invariant; the max-subtraction is dropped: masked
        # entries underflow exp() to exactly 0 and live scores are O(1).
        p = jnp.exp(s)
        p = p * pl.reciprocal(jnp.sum(p, axis=-1, keepdims=True), approx=True)
        og = jnp.einsum('gij,gjd->gid', p, vg,
                        preferred_element_type=jnp.float32)       # (G, T, hs)

        # Heads back to the feature dim IN-REGISTER (no VMEM scratch), then a
        # single (B*T, E) @ (E, E) projection (dropout == identity).
        o2 = pltpu.einshape("bhtd->bthd",
                            og.reshape(B, H, T, hs)).reshape(B * T, E)
        x = x + jnp.dot(o2.astype(jnp.bfloat16), wproj_ref[l],
                        preferred_element_type=jnp.float32) + bproj_ref[l][None, :]

        # ---------------- feed-forward over layernorm_2(x) -----------------
        xn2 = _layernorm(x, ln2g_ref[l][None, :], ln2b_ref[l][None, :])
        hid = jnp.maximum(
            jnp.dot(xn2.astype(jnp.bfloat16), w1_ref[l],
                    preferred_element_type=jnp.float32) + b1_ref[l][None, :],
            0.0)
        x = x + jnp.dot(hid.astype(jnp.bfloat16), w2_ref[l],
                        preferred_element_type=jnp.float32) + b2_ref[l][None, :]

    # ------------- final layernorm + lane-dense output projection ----------
    xn = _layernorm(x, lnfg_ref[...], lnfb_ref[...])
    logits = jnp.dot(xn.astype(jnp.bfloat16), wout_ref[...],
                     preferred_element_type=jnp.float32) + bout_ref[...]
    out_ref[...] = logits.reshape(B, T, Vp)


def init_params(key):
    """Random params matching the PyTorch module, packed for the kernel."""
    def nrm(k, shape, std=0.02):
        return std * jax.random.normal(k, shape, jnp.float32)

    ks = jax.random.split(key, 16)
    L, E, V, F = NUM_BLOCKS, EMBED_DIM, VOCAB_SIZE, 4 * EMBED_DIM
    scale = float(E) ** -0.5     # reference scales scores by channels**-0.5

    wk = nrm(ks[2], (L, E, E))
    wq = nrm(ks[3], (L, E, E))
    wv = nrm(ks[4], (L, E, E))
    # Fused QKV weight; attention scale folded into the Q columns.
    wkqv = jnp.concatenate([wk, wq * scale, wv], axis=-1)        # (L, E, 3E)

    wout = nrm(ks[11], (E, V))
    bout = nrm(ks[12], (1, V))
    # Zero-pad the vocab dim to a lane-dense width (sliced back in wrapper).
    wout_pad = jnp.zeros((E, VOCAB_PAD), jnp.float32).at[:, :V].set(wout)
    bout_pad = jnp.zeros((1, VOCAB_PAD), jnp.float32).at[:, :V].set(bout)

    # Embedding table padded to 128 rows so the in-kernel one-hot gather is a
    # lane-dense (B*T, 128) @ (128, E) matmul.
    vemb = nrm(ks[0], (V, E), 1.0)
    vemb_pad = jnp.zeros((VOCAB_PAD, E), jnp.float32).at[:V].set(vemb)

    params = dict(
        vemb=vemb_pad,                                   # f32 (128, E)
        pemb=nrm(ks[1], (BLOCK_SIZE, E), 1.0),           # f32 (8, E)
        # bf16 matmul operands (f32 accumulation inside the kernel)
        wkqv=wkqv.astype(jnp.bfloat16),
        wproj=nrm(ks[5], (L, E, E)).astype(jnp.bfloat16),
        w1=nrm(ks[7], (L, E, F)).astype(jnp.bfloat16),
        w2=nrm(ks[9], (L, F, E)).astype(jnp.bfloat16),
        wout=wout_pad.astype(jnp.bfloat16),
        # biases / layernorm params stay f32
        bproj=nrm(ks[6], (L, E)),
        b1=nrm(ks[8], (L, F)),
        b2=nrm(ks[10], (L, E)),
        bout=bout_pad,
        ln1g=jnp.ones((L, E), jnp.float32),
        ln1b=jnp.zeros((L, E), jnp.float32),
        ln2g=jnp.ones((L, E), jnp.float32),
        ln2b=jnp.zeros((L, E), jnp.float32),
        lnfg=jnp.ones((1, E), jnp.float32),
        lnfb=jnp.zeros((1, E), jnp.float32),
    )
    return params


@jax.jit
def model_forward(input_ids, params):
    """Mirrors Model.forward(input, targets=None) -> (logits, None)."""
    B, T = input_ids.shape
    ids = input_ids.reshape(B * T, 1).astype(jnp.int32)

    kernel = functools.partial(gpt_kernel, num_heads=NUM_HEADS)
    arg_names = ['vemb', 'pemb',
                 'wkqv', 'wproj', 'bproj',
                 'ln1g', 'ln1b', 'ln2g', 'ln2b',
                 'w1', 'b1', 'w2', 'b2',
                 'lnfg', 'lnfb', 'wout', 'bout']
    args = [ids] + [params[n] for n in arg_names]

    logits_pad = pl.pallas_call(
        kernel,
        out_shape=jax.ShapeDtypeStruct((B, T, VOCAB_PAD), jnp.float32),
        in_specs=[pl.BlockSpec(memory_space=pltpu.MemorySpace.VMEM)] * len(args),
        out_specs=pl.BlockSpec(memory_space=pltpu.MemorySpace.VMEM),
    )(*args)

    logits = logits_pad[:, :, :VOCAB_SIZE]
    return logits, None   # targets=None path: loss is None


if __name__ == "__main__":
    key = jax.random.PRNGKey(0)
    pkey, ikey = jax.random.split(key)
    params = init_params(pkey)

    # batch=2, sequence=block_size=8 token ids
    input_ids = jax.random.randint(ikey, (2, BLOCK_SIZE), 0, VOCAB_SIZE,
                                   dtype=jnp.int32)

    logits, loss = model_forward(input_ids, params)
    jax.block_until_ready(logits)

    assert logits.shape == (2, BLOCK_SIZE, VOCAB_SIZE)
    assert loss is None
    assert bool(jnp.all(jnp.isfinite(logits)))
    print("KERNEL_OK")
</pallas_src>

<mosaic_0001>
module attributes {stable_mosaic.version = 11 : i64} {
  func.func @gpt_kernel(%arg0: memref<16x1xi32, #tpu.memory_space<vmem>>, %arg1: memref<128x32xf32, #tpu.memory_space<vmem>>, %arg2: memref<8x32xf32, #tpu.memory_space<vmem>>, %arg3: memref<4x32x96xbf16, #tpu.memory_space<vmem>>, %arg4: memref<4x32x32xbf16, #tpu.memory_space<vmem>>, %arg5: memref<4x32xf32, #tpu.memory_space<vmem>>, %arg6: memref<4x32xf32, #tpu.memory_space<vmem>>, %arg7: memref<4x32xf32, #tpu.memory_space<vmem>>, %arg8: memref<4x32xf32, #tpu.memory_space<vmem>>, %arg9: memref<4x32xf32, #tpu.memory_space<vmem>>, %arg10: memref<4x32x128xbf16, #tpu.memory_space<vmem>>, %arg11: memref<4x128xf32, #tpu.memory_space<vmem>>, %arg12: memref<4x128x32xbf16, #tpu.memory_space<vmem>>, %arg13: memref<4x32xf32, #tpu.memory_space<vmem>>, %arg14: memref<1x32xf32, #tpu.memory_space<vmem>>, %arg15: memref<1x32xf32, #tpu.memory_space<vmem>>, %arg16: memref<32x128xbf16, #tpu.memory_space<vmem>>, %arg17: memref<1x128xf32, #tpu.memory_space<vmem>>, %arg18: memref<2x8x128xf32, #tpu.memory_space<vmem>>) attributes {dimension_semantics = [], scalar_prefetch = 0 : i64, scratch_operands = 0 : i64, tpu.core_type = #tpu.core_type<tc>} {
    %c0 = arith.constant 0 : index
    %c0_0 = arith.constant 0 : index
    %0 = vector.load %arg0[%c0, %c0_0] : memref<16x1xi32, #tpu.memory_space<vmem>>, vector<16x1xi32>
    %1 = tpu.iota {dimensions = array<i32: 1>} : vector<16x128xi32>
    %2 = vector.broadcast %0 : vector<16x1xi32> to vector<16x128xi32>
    %3 = arith.cmpi eq, %1, %2 : vector<16x128xi32>
    %4 = arith.extui %3 : vector<16x128xi1> to vector<16x128xi32>
    %5 = arith.sitofp %4 : vector<16x128xi32> to vector<16x128xf32>
    %c0_1 = arith.constant 0 : index
    %c0_2 = arith.constant 0 : index
    %6 = vector.load %arg1[%c0_1, %c0_2] : memref<128x32xf32, #tpu.memory_space<vmem>>, vector<128x32xf32>
    %cst = arith.constant dense<0.000000e+00> : vector<16x32xf32>
    %7 = tpu.matmul %5, %6, %cst {dimension_numbers = #tpu.dot_dimension_numbers<[1], [0], [0], [1], [0, 0, 1, 1], [], []>} : vector<16x128xf32>, vector<128x32xf32>, vector<16x32xf32> -> vector<16x32xf32>
    %8 = vector.shape_cast %7 : vector<16x32xf32> to vector<2x8x32xf32>
    %c0_3 = arith.constant 0 : index
    %c0_4 = arith.constant 0 : index
    %9 = vector.load %arg2[%c0_3, %c0_4] : memref<8x32xf32, #tpu.memory_space<vmem>>, vector<8x32xf32>
    %10 = vector.shape_cast %9 : vector<8x32xf32> to vector<1x8x32xf32>
    %11 = vector.broadcast %10 : vector<1x8x32xf32> to vector<2x8x32xf32>
    %12 = arith.addf %8, %11 : vector<2x8x32xf32>
    %13 = vector.shape_cast %12 : vector<2x8x32xf32> to vector<16x32xf32>
    %14 = tpu.iota {dimensions = array<i32: 0>} : vector<8x8xi32>
    %15 = tpu.iota {dimensions = array<i32: 1>} : vector<8x8xi32>
    %16 = arith.cmpi sle, %15, %14 : vector<8x8xi32>
    %cst_5 = arith.constant 0.000000e+00 : f32
    %cst_6 = arith.constant -1.000000e+30 : f32
    %17 = vector.broadcast %cst_5 : f32 to vector<8x8xf32>
    %18 = vector.broadcast %cst_6 : f32 to vector<8x8xf32>
    %19 = arith.select %16, %17, %18 : vector<8x8xi1>, vector<8x8xf32>
    %c0_7 = arith.constant 0 : index
    %c0_8 = arith.constant 0 : index
    %20 = vector.load %arg6[%c0_7, %c0_8] : memref<4x32xf32, #tpu.memory_space<vmem>>, vector<1x32xf32>
    %21 = vector.shape_cast %20 : vector<1x32xf32> to vector<32xf32>
    %22 = vector.shape_cast %21 : vector<32xf32> to vector<1x32xf32>
    %c0_9 = arith.constant 0 : index
    %c0_10 = arith.constant 0 : index
    %23 = vector.load %arg7[%c0_9, %c0_10] : memref<4x32xf32, #tpu.memory_space<vmem>>, vector<1x32xf32>
    %24 = vector.shape_cast %23 : vector<1x32xf32> to vector<32xf32>
    %25 = vector.shape_cast %24 : vector<32xf32> to vector<1x32xf32>
    %cst_11 = arith.constant dense<0.000000e+00> : vector<16xf32>
    %26 = vector.multi_reduction <add>, %13, %cst_11 [1] : vector<16x32xf32> to vector<16xf32>
    %27 = vector.shape_cast %26 : vector<16xf32> to vector<16x1xf32>
    %cst_12 = arith.constant 3.200000e+01 : f32
    %28 = vector.broadcast %cst_12 : f32 to vector<16x1xf32>
    %29 = arith.divf %27, %28 : vector<16x1xf32>
    %30 = vector.broadcast %29 : vector<16x1xf32> to vector<16x32xf32>
    %31 = arith.subf %13, %30 : vector<16x32xf32>
    %32 = arith.mulf %31, %31 : vector<16x32xf32>
    %cst_13 = arith.constant dense<0.000000e+00> : vector<16xf32>
    %33 = vector.multi_reduction <add>, %32, %cst_13 [1] : vector<16x32xf32> to vector<16xf32>
    %34 = vector.shape_cast %33 : vector<16xf32> to vector<16x1xf32>
    %cst_14 = arith.constant 3.200000e+01 : f32
    %35 = vector.broadcast %cst_14 : f32 to vector<16x1xf32>
    %36 = arith.divf %34, %35 : vector<16x1xf32>
    %37 = vector.broadcast %29 : vector<16x1xf32> to vector<16x32xf32>
    %38 = arith.subf %13, %37 : vector<16x32xf32>
    %cst_15 = arith.constant 9.99999974E-6 : f32
    %39 = vector.broadcast %cst_15 : f32 to vector<16x1xf32>
    %40 = arith.addf %36, %39 : vector<16x1xf32>
    %41 = math.rsqrt %40 : vector<16x1xf32>
    %42 = vector.broadcast %41 : vector<16x1xf32> to vector<16x32xf32>
    %43 = arith.mulf %38, %42 : vector<16x32xf32>
    %44 = vector.broadcast %22 : vector<1x32xf32> to vector<16x32xf32>
    %45 = arith.mulf %43, %44 : vector<16x32xf32>
    %46 = vector.broadcast %25 : vector<1x32xf32> to vector<16x32xf32>
    %47 = arith.addf %45, %46 : vector<16x32xf32>
    %48 = arith.truncf %47 : vector<16x32xf32> to vector<16x32xbf16>
    %c0_16 = arith.constant 0 : index
    %c0_17 = arith.constant 0 : index
    %c0_18 = arith.constant 0 : index
    %49 = vector.load %arg3[%c0_16, %c0_17, %c0_18] : memref<4x32x96xbf16, #tpu.memory_space<vmem>>, vector<1x32x96xbf16>
    %50 = vector.shape_cast %49 : vector<1x32x96xbf16> to vector<32x96xbf16>
    %cst_19 = arith.constant dense<0.000000e+00> : vector<16x96xf32>
    %51 = tpu.matmul %48, %50, %cst_19 {dimension_numbers = #tpu.dot_dimension_numbers<[1], [0], [0], [1], [0, 0, 1, 1], [], []>} : vector<16x32xbf16>, vector<32x96xbf16>, vector<16x96xf32> -> vector<16x96xf32>
    %52 = vector.shape_cast %51 : vector<16x96xf32> to vector<2x8x12x8xf32>
    %53 = tpu.transpose %52, [0, 2, 1, 3] : vector<2x8x12x8xf32> -> vector<2x12x8x8xf32>
    %54 = vector.extract_strided_slice %53 {offsets = [0, 0, 0, 0], sizes = [2, 4, 8, 8], strides = [1, 1, 1, 1]} : vector<2x12x8x8xf32> to vector<2x4x8x8xf32>
    %55 = vector.shape_cast %54 : vector<2x4x8x8xf32> to vector<8x8x8xf32>
    %56 = vector.extract_strided_slice %53 {offsets = [0, 4, 0, 0], sizes = [2, 4, 8, 8], strides = [1, 1, 1, 1]} : vector<2x12x8x8xf32> to vector<2x4x8x8xf32>
    %57 = vector.shape_cast %56 : vector<2x4x8x8xf32> to vector<8x8x8xf32>
    %58 = vector.extract_strided_slice %53 {offsets = [0, 8, 0, 0], sizes = [2, 4, 8, 8], strides = [1, 1, 1, 1]} : vector<2x12x8x8xf32> to vector<2x4x8x8xf32>
    %59 = vector.shape_cast %58 : vector<2x4x8x8xf32> to vector<8x8x8xf32>
    "tpu.trace_start"() <{level = 10 : i32, message = "gid,gjd->gij"}> : () -> ()
    %cst_20 = arith.constant dense<0.000000e+00> : vector<8x8x8xf32>
    %60 = tpu.matmul %55, %57, %cst_20 {dimension_numbers = #tpu.dot_dimension_numbers<[2], [2], [1], [1], [0, 0, 0, 1, 1, 1], [0], [0]>} : vector<8x8x8xf32>, vector<8x8x8xf32>, vector<8x8x8xf32> -> vector<8x8x8xf32>
    "tpu.trace_stop"() : () -> ()
    %61 = vector.shape_cast %19 : vector<8x8xf32> to vector<1x8x8xf32>
    %62 = vector.broadcast %61 : vector<1x8x8xf32> to vector<8x8x8xf32>
    %63 = arith.addf %60, %62 : vector<8x8x8xf32>
    %64 = math.exp %63 : vector<8x8x8xf32>
    %cst_21 = arith.constant dense<0.000000e+00> : vector<8x8xf32>
    %65 = vector.multi_reduction <add>, %64, %cst_21 [2] : vector<8x8x8xf32> to vector<8x8xf32>
    %66 = vector.shape_cast %65 : vector<8x8xf32> to vector<8x8x1xf32>
    %67 = tpu.reciprocal %66 {approx = true} : vector<8x8x1xf32> -> vector<8x8x1xf32>
    %68 = vector.broadcast %67 : vector<8x8x1xf32> to vector<8x8x8xf32>
    %69 = arith.mulf %64, %68 : vector<8x8x8xf32>
    "tpu.trace_start"() <{level = 10 : i32, message = "gij,gjd->gid"}> : () -> ()
    %cst_22 = arith.constant dense<0.000000e+00> : vector<8x8x8xf32>
    %70 = tpu.matmul %69, %59, %cst_22 {dimension_numbers = #tpu.dot_dimension_numbers<[2], [1], [1], [2], [0, 0, 0, 1, 1, 2], [0], [0]>} : vector<8x8x8xf32>, vector<8x8x8xf32>, vector<8x8x8xf32> -> vector<8x8x8xf32>
    "tpu.trace_stop"() : () -> ()
    %71 = vector.shape_cast %70 : vector<8x8x8xf32> to vector<2x4x8x8xf32>
    %72 = tpu.transpose %71, [0, 2, 1, 3] : vector<2x4x8x8xf32> -> vector<2x8x4x8xf32>
    %73 = vector.shape_cast %72 : vector<2x8x4x8xf32> to vector<16x32xf32>
    %74 = arith.truncf %73 : vector<16x32xf32> to vector<16x32xbf16>
    %c0_23 = arith.constant 0 : index
    %c0_24 = arith.constant 0 : index
    %c0_25 = arith.constant 0 : index
    %75 = vector.load %arg4[%c0_23, %c0_24, %c0_25] : memref<4x32x32xbf16, #tpu.memory_space<vmem>>, vector<1x32x32xbf16>
    %76 = vector.shape_cast %75 : vector<1x32x32xbf16> to vector<32x32xbf16>
    %cst_26 = arith.constant dense<0.000000e+00> : vector<16x32xf32>
    %77 = tpu.matmul %74, %76, %cst_26 {dimension_numbers = #tpu.dot_dimension_numbers<[1], [0], [0], [1], [0, 0, 1, 1], [], []>} : vector<16x32xbf16>, vector<32x32xbf16>, vector<16x32xf32> -> vector<16x32xf32>
    %78 = arith.addf %13, %77 : vector<16x32xf32>
    %c0_27 = arith.constant 0 : index
    %c0_28 = arith.constant 0 : index
    %79 = vector.load %arg5[%c0_27, %c0_28] : memref<4x32xf32, #tpu.memory_space<vmem>>, vector<1x32xf32>
    %80 = vector.shape_cast %79 : vector<1x32xf32> to vector<32xf32>
    %81 = vector.shape_cast %80 : vector<32xf32> to vector<1x32xf32>
    %82 = vector.broadcast %81 : vector<1x32xf32> to vector<16x32xf32>
    %83 = arith.addf %78, %82 : vector<16x32xf32>
    %c0_29 = arith.constant 0 : index
    %c0_30 = arith.constant 0 : index
    %84 = vector.load %arg8[%c0_29, %c0_30] : memref<4x32xf32, #tpu.memory_space<vmem>>, vector<1x32xf32>
    %85 = vector.shape_cast %84 : vector<1x32xf32> to vector<32xf32>
    %86 = vector.shape_cast %85 : vector<32xf32> to vector<1x32xf32>
    %c0_31 = arith.constant 0 : index
    %c0_32 = arith.constant 0 : index
    %87 = vector.load %arg9[%c0_31, %c0_32] : memref<4x32xf32, #tpu.memory_space<vmem>>, vector<1x32xf32>
    %88 = vector.shape_cast %87 : vector<1x32xf32> to vector<32xf32>
    %89 = vector.shape_cast %88 : vector<32xf32> to vector<1x32xf32>
    %cst_33 = arith.constant dense<0.000000e+00> : vector<16xf32>
    %90 = vector.multi_reduction <add>, %83, %cst_33 [1] : vector<16x32xf32> to vector<16xf32>
    %91 = vector.shape_cast %90 : vector<16xf32> to vector<16x1xf32>
    %cst_34 = arith.constant 3.200000e+01 : f32
    %92 = vector.broadcast %cst_34 : f32 to vector<16x1xf32>
    %93 = arith.divf %91, %92 : vector<16x1xf32>
    %94 = vector.broadcast %93 : vector<16x1xf32> to vector<16x32xf32>
    %95 = arith.subf %83, %94 : vector<16x32xf32>
    %96 = arith.mulf %95, %95 : vector<16x32xf32>
    %cst_35 = arith.constant dense<0.000000e+00> : vector<16xf32>
    %97 = vector.multi_reduction <add>, %96, %cst_35 [1] : vector<16x32xf32> to vector<16xf32>
    %98 = vector.shape_cast %97 : vector<16xf32> to vector<16x1xf32>
    %cst_36 = arith.constant 3.200000e+01 : f32
    %99 = vector.broadcast %cst_36 : f32 to vector<16x1xf32>
    %100 = arith.divf %98, %99 : vector<16x1xf32>
    %101 = vector.broadcast %93 : vector<16x1xf32> to vector<16x32xf32>
    %102 = arith.subf %83, %101 : vector<16x32xf32>
    %cst_37 = arith.constant 9.99999974E-6 : f32
    %103 = vector.broadcast %cst_37 : f32 to vector<16x1xf32>
    %104 = arith.addf %100, %103 : vector<16x1xf32>
    %105 = math.rsqrt %104 : vector<16x1xf32>
    %106 = vector.broadcast %105 : vector<16x1xf32> to vector<16x32xf32>
    %107 = arith.mulf %102, %106 : vector<16x32xf32>
    %108 = vector.broadcast %86 : vector<1x32xf32> to vector<16x32xf32>
    %109 = arith.mulf %107, %108 : vector<16x32xf32>
    %110 = vector.broadcast %89 : vector<1x32xf32> to vector<16x32xf32>
    %111 = arith.addf %109, %110 : vector<16x32xf32>
    %112 = arith.truncf %111 : vector<16x32xf32> to vector<16x32xbf16>
    %c0_38 = arith.constant 0 : index
    %c0_39 = arith.constant 0 : index
    %c0_40 = arith.constant 0 : index
    %113 = vector.load %arg10[%c0_38, %c0_39, %c0_40] : memref<4x32x128xbf16, #tpu.memory_space<vmem>>, vector<1x32x128xbf16>
    %114 = vector.shape_cast %113 : vector<1x32x128xbf16> to vector<32x128xbf16>
    %cst_41 = arith.constant dense<0.000000e+00> : vector<16x128xf32>
    %115 = tpu.matmul %112, %114, %cst_41 {dimension_numbers = #tpu.dot_dimension_numbers<[1], [0], [0], [1], [0, 0, 1, 1], [], []>} : vector<16x32xbf16>, vector<32x128xbf16>, vector<16x128xf32> -> vector<16x128xf32>
    %c0_42 = arith.constant 0 : index
    %c0_43 = arith.constant 0 : index
    %116 = vector.load %arg11[%c0_42, %c0_43] : memref<4x128xf32, #tpu.memory_space<vmem>>, vector<1x128xf32>
    %117 = vector.shape_cast %116 : vector<1x128xf32> to vector<128xf32>
    %118 = vector.shape_cast %117 : vector<128xf32> to vector<1x128xf32>
    %119 = vector.broadcast %118 : vector<1x128xf32> to vector<16x128xf32>
    %120 = arith.addf %115, %119 : vector<16x128xf32>
    %cst_44 = arith.constant 0.000000e+00 : f32
    %121 = vector.broadcast %cst_44 : f32 to vector<16x128xf32>
    %122 = arith.maximumf %120, %121 : vector<16x128xf32>
    %123 = arith.truncf %122 : vector<16x128xf32> to vector<16x128xbf16>
    %c0_45 = arith.constant 0 : index
    %c0_46 = arith.constant 0 : index
    %c0_47 = arith.constant 0 : index
    %124 = vector.load %arg12[%c0_45, %c0_46, %c0_47] : memref<4x128x32xbf16, #tpu.memory_space<vmem>>, vector<1x128x32xbf16>
    %125 = vector.shape_cast %124 : vector<1x128x32xbf16> to vector<128x32xbf16>
    %cst_48 = arith.constant dense<0.000000e+00> : vector<16x32xf32>
    %126 = tpu.matmul %123, %125, %cst_48 {dimension_numbers = #tpu.dot_dimension_numbers<[1], [0], [0], [1], [0, 0, 1, 1], [], []>} : vector<16x128xbf16>, vector<128x32xbf16>, vector<16x32xf32> -> vector<16x32xf32>
    %127 = arith.addf %83, %126 : vector<16x32xf32>
    %c0_49 = arith.constant 0 : index
    %c0_50 = arith.constant 0 : index
    %128 = vector.load %arg13[%c0_49, %c0_50] : memref<4x32xf32, #tpu.memory_space<vmem>>, vector<1x32xf32>
    %129 = vector.shape_cast %128 : vector<1x32xf32> to vector<32xf32>
    %130 = vector.shape_cast %129 : vector<32xf32> to vector<1x32xf32>
    %131 = vector.broadcast %130 : vector<1x32xf32> to vector<16x32xf32>
    %132 = arith.addf %127, %131 : vector<16x32xf32>
    %c1 = arith.constant 1 : index
    %c0_51 = arith.constant 0 : index
    %133 = vector.load %arg6[%c1, %c0_51] : memref<4x32xf32, #tpu.memory_space<vmem>>, vector<1x32xf32>
    %134 = vector.shape_cast %133 : vector<1x32xf32> to vector<32xf32>
    %135 = vector.shape_cast %134 : vector<32xf32> to vector<1x32xf32>
    %c1_52 = arith.constant 1 : index
    %c0_53 = arith.constant 0 : index
    %136 = vector.load %arg7[%c1_52, %c0_53] : memref<4x32xf32, #tpu.memory_space<vmem>>, vector<1x32xf32>
    %137 = vector.shape_cast %136 : vector<1x32xf32> to vector<32xf32>
    %138 = vector.shape_cast %137 : vector<32xf32> to vector<1x32xf32>
    %cst_54 = arith.constant dense<0.000000e+00> : vector<16xf32>
    %139 = vector.multi_reduction <add>, %132, %cst_54 [1] : vector<16x32xf32> to vector<16xf32>
    %140 = vector.shape_cast %139 : vector<16xf32> to vector<16x1xf32>
    %cst_55 = arith.constant 3.200000e+01 : f32
    %141 = vector.broadcast %cst_55 : f32 to vector<16x1xf32>
    %142 = arith.divf %140, %141 : vector<16x1xf32>
    %143 = vector.broadcast %142 : vector<16x1xf32> to vector<16x32xf32>
    %144 = arith.subf %132, %143 : vector<16x32xf32>
    %145 = arith.mulf %144, %144 : vector<16x32xf32>
    %cst_56 = arith.constant dense<0.000000e+00> : vector<16xf32>
    %146 = vector.multi_reduction <add>, %145, %cst_56 [1] : vector<16x32xf32> to vector<16xf32>
    %147 = vector.shape_cast %146 : vector<16xf32> to vector<16x1xf32>
    %cst_57 = arith.constant 3.200000e+01 : f32
    %148 = vector.broadcast %cst_57 : f32 to vector<16x1xf32>
    %149 = arith.divf %147, %148 : vector<16x1xf32>
    %150 = vector.broadcast %142 : vector<16x1xf32> to vector<16x32xf32>
    %151 = arith.subf %132, %150 : vector<16x32xf32>
    %cst_58 = arith.constant 9.99999974E-6 : f32
    %152 = vector.broadcast %cst_58 : f32 to vector<16x1xf32>
    %153 = arith.addf %149, %152 : vector<16x1xf32>
    %154 = math.rsqrt %153 : vector<16x1xf32>
    %155 = vector.broadcast %154 : vector<16x1xf32> to vector<16x32xf32>
    %156 = arith.mulf %151, %155 : vector<16x32xf32>
    %157 = vector.broadcast %135 : vector<1x32xf32> to vector<16x32xf32>
    %158 = arith.mulf %156, %157 : vector<16x32xf32>
    %159 = vector.broadcast %138 : vector<1x32xf32> to vector<16x32xf32>
    %160 = arith.addf %158, %159 : vector<16x32xf32>
    %161 = arith.truncf %160 : vector<16x32xf32> to vector<16x32xbf16>
    %c1_59 = arith.constant 1 : index
    %c0_60 = arith.constant 0 : index
    %c0_61 = arith.constant 0 : index
    %162 = vector.load %arg3[%c1_59, %c0_60, %c0_61] : memref<4x32x96xbf16, #tpu.memory_space<vmem>>, vector<1x32x96xbf16>
    %163 = vector.shape_cast %162 : vector<1x32x96xbf16> to vector<32x96xbf16>
    %cst_62 = arith.constant dense<0.000000e+00> : vector<16x96xf32>
    %164 = tpu.matmul %161, %163, %cst_62 {dimension_numbers = #tpu.dot_dimension_numbers<[1], [0], [0], [1], [0, 0, 1, 1], [], []>} : vector<16x32xbf16>, vector<32x96xbf16>, vector<16x96xf32> -> vector<16x96xf32>
    %165 = vector.shape_cast %164 : vector<16x96xf32> to vector<2x8x12x8xf32>
    %166 = tpu.transpose %165, [0, 2, 1, 3] : vector<2x8x12x8xf32> -> vector<2x12x8x8xf32>
    %167 = vector.extract_strided_slice %166 {offsets = [0, 0, 0, 0], sizes = [2, 4, 8, 8], strides = [1, 1, 1, 1]} : vector<2x12x8x8xf32> to vector<2x4x8x8xf32>
    %168 = vector.shape_cast %167 : vector<2x4x8x8xf32> to vector<8x8x8xf32>
    %169 = vector.extract_strided_slice %166 {offsets = [0, 4, 0, 0], sizes = [2, 4, 8, 8], strides = [1, 1, 1, 1]} : vector<2x12x8x8xf32> to vector<2x4x8x8xf32>
    %170 = vector.shape_cast %169 : vector<2x4x8x8xf32> to vector<8x8x8xf32>
    %171 = vector.extract_strided_slice %166 {offsets = [0, 8, 0, 0], sizes = [2, 4, 8, 8], strides = [1, 1, 1, 1]} : vector<2x12x8x8xf32> to vector<2x4x8x8xf32>
    %172 = vector.shape_cast %171 : vector<2x4x8x8xf32> to vector<8x8x8xf32>
    "tpu.trace_start"() <{level = 10 : i32, message = "gid,gjd->gij"}> : () -> ()
    %cst_63 = arith.constant dense<0.000000e+00> : vector<8x8x8xf32>
    %173 = tpu.matmul %168, %170, %cst_63 {dimension_numbers = #tpu.dot_dimension_numbers<[2], [2], [1], [1], [0, 0, 0, 1, 1, 1], [0], [0]>} : vector<8x8x8xf32>, vector<8x8x8xf32>, vector<8x8x8xf32> -> vector<8x8x8xf32>
    "tpu.trace_stop"() : () -> ()
    %174 = vector.shape_cast %19 : vector<8x8xf32> to vector<1x8x8xf32>
    %175 = vector.broadcast %174 : vector<1x8x8xf32> to vector<8x8x8xf32>
    %176 = arith.addf %173, %175 : vector<8x8x8xf32>
    %177 = math.exp %176 : vector<8x8x8xf32>
    %cst_64 = arith.constant dense<0.000000e+00> : vector<8x8xf32>
    %178 = vector.multi_reduction <add>, %177, %cst_64 [2] : vector<8x8x8xf32> to vector<8x8xf32>
    %179 = vector.shape_cast %178 : vector<8x8xf32> to vector<8x8x1xf32>
    %180 = tpu.reciprocal %179 {approx = true} : vector<8x8x1xf32> -> vector<8x8x1xf32>
    %181 = vector.broadcast %180 : vector<8x8x1xf32> to vector<8x8x8xf32>
    %182 = arith.mulf %177, %181 : vector<8x8x8xf32>
    "tpu.trace_start"() <{level = 10 : i32, message = "gij,gjd->gid"}> : () -> ()
    %cst_65 = arith.constant dense<0.000000e+00> : vector<8x8x8xf32>
    %183 = tpu.matmul %182, %172, %cst_65 {dimension_numbers = #tpu.dot_dimension_numbers<[2], [1], [1], [2], [0, 0, 0, 1, 1, 2], [0], [0]>} : vector<8x8x8xf32>, vector<8x8x8xf32>, vector<8x8x8xf32> -> vector<8x8x8xf32>
    "tpu.trace_stop"() : () -> ()
    %184 = vector.shape_cast %183 : vector<8x8x8xf32> to vector<2x4x8x8xf32>
    %185 = tpu.transpose %184, [0, 2, 1, 3] : vector<2x4x8x8xf32> -> vector<2x8x4x8xf32>
    %186 = vector.shape_cast %185 : vector<2x8x4x8xf32> to vector<16x32xf32>
    %187 = arith.truncf %186 : vector<16x32xf32> to vector<16x32xbf16>
    %c1_66 = arith.constant 1 : index
    %c0_67 = arith.constant 0 : index
    %c0_68 = arith.constant 0 : index
    %188 = vector.load %arg4[%c1_66, %c0_67, %c0_68] : memref<4x32x32xbf16, #tpu.memory_space<vmem>>, vector<1x32x32xbf16>
    %189 = vector.shape_cast %188 : vector<1x32x32xbf16> to vector<32x32xbf16>
    %cst_69 = arith.constant dense<0.000000e+00> : vector<16x32xf32>
    %190 = tpu.matmul %187, %189, %cst_69 {dimension_numbers = #tpu.dot_dimension_numbers<[1], [0], [0], [1], [0, 0, 1, 1], [], []>} : vector<16x32xbf16>, vector<32x32xbf16>, vector<16x32xf32> -> vector<16x32xf32>
    %191 = arith.addf %132, %190 : vector<16x32xf32>
    %c1_70 = arith.constant 1 : index
    %c0_71 = arith.constant 0 : index
    %192 = vector.load %arg5[%c1_70, %c0_71] : memref<4x32xf32, #tpu.memory_space<vmem>>, vector<1x32xf32>
    %193 = vector.shape_cast %192 : vector<1x32xf32> to vector<32xf32>
    %194 = vector.shape_cast %193 : vector<32xf32> to vector<1x32xf32>
    %195 = vector.broadcast %194 : vector<1x32xf32> to vector<16x32xf32>
    %196 = arith.addf %191, %195 : vector<16x32xf32>
    %c1_72 = arith.constant 1 : index
    %c0_73 = arith.constant 0 : index
    %197 = vector.load %arg8[%c1_72, %c0_73] : memref<4x32xf32, #tpu.memory_space<vmem>>, vector<1x32xf32>
    %198 = vector.shape_cast %197 : vector<1x32xf32> to vector<32xf32>
    %199 = vector.shape_cast %198 : vector<32xf32> to vector<1x32xf32>
    %c1_74 = arith.constant 1 : index
    %c0_75 = arith.constant 0 : index
    %200 = vector.load %arg9[%c1_74, %c0_75] : memref<4x32xf32, #tpu.memory_space<vmem>>, vector<1x32xf32>
    %201 = vector.shape_cast %200 : vector<1x32xf32> to vector<32xf32>
    %202 = vector.shape_cast %201 : vector<32xf32> to vector<1x32xf32>
    %cst_76 = arith.constant dense<0.000000e+00> : vector<16xf32>
    %203 = vector.multi_reduction <add>, %196, %cst_76 [1] : vector<16x32xf32> to vector<16xf32>
    %204 = vector.shape_cast %203 : vector<16xf32> to vector<16x1xf32>
    %cst_77 = arith.constant 3.200000e+01 : f32
    %205 = vector.broadcast %cst_77 : f32 to vector<16x1xf32>
    %206 = arith.divf %204, %205 : vector<16x1xf32>
    %207 = vector.broadcast %206 : vector<16x1xf32> to vector<16x32xf32>
    %208 = arith.subf %196, %207 : vector<16x32xf32>
    %209 = arith.mulf %208, %208 : vector<16x32xf32>
    %cst_78 = arith.constant dense<0.000000e+00> : vector<16xf32>
    %210 = vector.multi_reduction <add>, %209, %cst_78 [1] : vector<16x32xf32> to vector<16xf32>
    %211 = vector.shape_cast %210 : vector<16xf32> to vector<16x1xf32>
    %cst_79 = arith.constant 3.200000e+01 : f32
    %212 = vector.broadcast %cst_79 : f32 to vector<16x1xf32>
    %213 = arith.divf %211, %212 : vector<16x1xf32>
    %214 = vector.broadcast %206 : vector<16x1xf32> to vector<16x32xf32>
    %215 = arith.subf %196, %214 : vector<16x32xf32>
    %cst_80 = arith.constant 9.99999974E-6 : f32
    %216 = vector.broadcast %cst_80 : f32 to vector<16x1xf32>
    %217 = arith.addf %213, %216 : vector<16x1xf32>
    %218 = math.rsqrt %217 : vector<16x1xf32>
    %219 = vector.broadcast %218 : vector<16x1xf32> to vector<16x32xf32>
    %220 = arith.mulf %215, %219 : vector<16x32xf32>
    %221 = vector.broadcast %199 : vector<1x32xf32> to vector<16x32xf32>
    %222 = arith.mulf %220, %221 : vector<16x32xf32>
    %223 = vector.broadcast %202 : vector<1x32xf32> to vector<16x32xf32>
    %224 = arith.addf %222, %223 : vector<16x32xf32>
    %225 = arith.truncf %224 : vector<16x32xf32> to vector<16x32xbf16>
    %c1_81 = arith.constant 1 : index
    %c0_82 = arith.constant 0 : index
    %c0_83 = arith.constant 0 : index
    %226 = vector.load %arg10[%c1_81, %c0_82, %c0_83] : memref<4x32x128xbf16, #tpu.memory_space<vmem>>, vector<1x32x128xbf16>
    %227 = vector.shape_cast %226 : vector<1x32x128xbf16> to vector<32x128xbf16>
    %cst_84 = arith.constant dense<0.000000e+00> : vector<16x128xf32>
    %228 = tpu.matmul %225, %227, %cst_84 {dimension_numbers = #tpu.dot_dimension_numbers<[1], [0], [0], [1], [0, 0, 1, 1], [], []>} : vector<16x32xbf16>, vector<32x128xbf16>, vector<16x128xf32> -> vector<16x128xf32>
    %c1_85 = arith.constant 1 : index
    %c0_86 = arith.constant 0 : index
    %229 = vector.load %arg11[%c1_85, %c0_86] : memref<4x128xf32, #tpu.memory_space<vmem>>, vector<1x128xf32>
    %230 = vector.shape_cast %229 : vector<1x128xf32> to vector<128xf32>
    %231 = vector.shape_cast %230 : vector<128xf32> to vector<1x128xf32>
    %232 = vector.broadcast %231 : vector<1x128xf32> to vector<16x128xf32>
    %233 = arith.addf %228, %232 : vector<16x128xf32>
    %cst_87 = arith.constant 0.000000e+00 : f32
    %234 = vector.broadcast %cst_87 : f32 to vector<16x128xf32>
    %235 = arith.maximumf %233, %234 : vector<16x128xf32>
    %236 = arith.truncf %235 : vector<16x128xf32> to vector<16x128xbf16>
    %c1_88 = arith.constant 1 : index
    %c0_89 = arith.constant 0 : index
    %c0_90 = arith.constant 0 : index
    %237 = vector.load %arg12[%c1_88, %c0_89, %c0_90] : memref<4x128x32xbf16, #tpu.memory_space<vmem>>, vector<1x128x32xbf16>
    %238 = vector.shape_cast %237 : vector<1x128x32xbf16> to vector<128x32xbf16>
    %cst_91 = arith.constant dense<0.000000e+00> : vector<16x32xf32>
    %239 = tpu.matmul %236, %238, %cst_91 {dimension_numbers = #tpu.dot_dimension_numbers<[1], [0], [0], [1], [0, 0, 1, 1], [], []>} : vector<16x128xbf16>, vector<128x32xbf16>, vector<16x32xf32> -> vector<16x32xf32>
    %240 = arith.addf %196, %239 : vector<16x32xf32>
    %c1_92 = arith.constant 1 : index
    %c0_93 = arith.constant 0 : index
    %241 = vector.load %arg13[%c1_92, %c0_93] : memref<4x32xf32, #tpu.memory_space<vmem>>, vector<1x32xf32>
    %242 = vector.shape_cast %241 : vector<1x32xf32> to vector<32xf32>
    %243 = vector.shape_cast %242 : vector<32xf32> to vector<1x32xf32>
    %244 = vector.broadcast %243 : vector<1x32xf32> to vector<16x32xf32>
    %245 = arith.addf %240, %244 : vector<16x32xf32>
    %c2 = arith.constant 2 : index
    %c0_94 = arith.constant 0 : index
    %246 = vector.load %arg6[%c2, %c0_94] : memref<4x32xf32, #tpu.memory_space<vmem>>, vector<1x32xf32>
    %247 = vector.shape_cast %246 : vector<1x32xf32> to vector<32xf32>
    %248 = vector.shape_cast %247 : vector<32xf32> to vector<1x32xf32>
    %c2_95 = arith.constant 2 : index
    %c0_96 = arith.constant 0 : index
    %249 = vector.load %arg7[%c2_95, %c0_96] : memref<4x32xf32, #tpu.memory_space<vmem>>, vector<1x32xf32>
    %250 = vector.shape_cast %249 : vector<1x32xf32> to vector<32xf32>
    %251 = vector.shape_cast %250 : vector<32xf32> to vector<1x32xf32>
    %cst_97 = arith.constant dense<0.000000e+00> : vector<16xf32>
    %252 = vector.multi_reduction <add>, %245, %cst_97 [1] : vector<16x32xf32> to vector<16xf32>
    %253 = vector.shape_cast %252 : vector<16xf32> to vector<16x1xf32>
    %cst_98 = arith.constant 3.200000e+01 : f32
    %254 = vector.broadcast %cst_98 : f32 to vector<16x1xf32>
    %255 = arith.divf %253, %254 : vector<16x1xf32>
    %256 = vector.broadcast %255 : vector<16x1xf32> to vector<16x32xf32>
    %257 = arith.subf %245, %256 : vector<16x32xf32>
    %258 = arith.mulf %257, %257 : vector<16x32xf32>
    %cst_99 = arith.constant dense<0.000000e+00> : vector<16xf32>
    %259 = vector.multi_reduction <add>, %258, %cst_99 [1] : vector<16x32xf32> to vector<16xf32>
    %260 = vector.shape_cast %259 : vector<16xf32> to vector<16x1xf32>
    %cst_100 = arith.constant 3.200000e+01 : f32
    %261 = vector.broadcast %cst_100 : f32 to vector<16x1xf32>
    %262 = arith.divf %260, %261 : vector<16x1xf32>
    %263 = vector.broadcast %255 : vector<16x1xf32> to vector<16x32xf32>
    %264 = arith.subf %245, %263 : vector<16x32xf32>
    %cst_101 = arith.constant 9.99999974E-6 : f32
    %265 = vector.broadcast %cst_101 : f32 to vector<16x1xf32>
    %266 = arith.addf %262, %265 : vector<16x1xf32>
    %267 = math.rsqrt %266 : vector<16x1xf32>
    %268 = vector.broadcast %267 : vector<16x1xf32> to vector<16x32xf32>
    %269 = arith.mulf %264, %268 : vector<16x32xf32>
    %270 = vector.broadcast %248 : vector<1x32xf32> to vector<16x32xf32>
    %271 = arith.mulf %269, %270 : vector<16x32xf32>
    %272 = vector.broadcast %251 : vector<1x32xf32> to vector<16x32xf32>
    %273 = arith.addf %271, %272 : vector<16x32xf32>
    %274 = arith.truncf %273 : vector<16x32xf32> to vector<16x32xbf16>
    %c2_102 = arith.constant 2 : index
    %c0_103 = arith.constant 0 : index
    %c0_104 = arith.constant 0 : index
    %275 = vector.load %arg3[%c2_102, %c0_103, %c0_104] : memref<4x32x96xbf16, #tpu.memory_space<vmem>>, vector<1x32x96xbf16>
    %276 = vector.shape_cast %275 : vector<1x32x96xbf16> to vector<32x96xbf16>
    %cst_105 = arith.constant dense<0.000000e+00> : vector<16x96xf32>
    %277 = tpu.matmul %274, %276, %cst_105 {dimension_numbers = #tpu.dot_dimension_numbers<[1], [0], [0], [1], [0, 0, 1, 1], [], []>} : vector<16x32xbf16>, vector<32x96xbf16>, vector<16x96xf32> -> vector<16x96xf32>
    %278 = vector.shape_cast %277 : vector<16x96xf32> to vector<2x8x12x8xf32>
    %279 = tpu.transpose %278, [0, 2, 1, 3] : vector<2x8x12x8xf32> -> vector<2x12x8x8xf32>
    %280 = vector.extract_strided_slice %279 {offsets = [0, 0, 0, 0], sizes = [2, 4, 8, 8], strides = [1, 1, 1, 1]} : vector<2x12x8x8xf32> to vector<2x4x8x8xf32>
    %281 = vector.shape_cast %280 : vector<2x4x8x8xf32> to vector<8x8x8xf32>
    %282 = vector.extract_strided_slice %279 {offsets = [0, 4, 0, 0], sizes = [2, 4, 8, 8], strides = [1, 1, 1, 1]} : vector<2x12x8x8xf32> to vector<2x4x8x8xf32>
    %283 = vector.shape_cast %282 : vector<2x4x8x8xf32> to vector<8x8x8xf32>
    %284 = vector.extract_strided_slice %279 {offsets = [0, 8, 0, 0], sizes = [2, 4, 8, 8], strides = [1, 1, 1, 1]} : vector<2x12x8x8xf32> to vector<2x4x8x8xf32>
    %285 = vector.shape_cast %284 : vector<2x4x8x8xf32> to vector<8x8x8xf32>
    "tpu.trace_start"() <{level = 10 : i32, message = "gid,gjd->gij"}> : () -> ()
    %cst_106 = arith.constant dense<0.000000e+00> : vector<8x8x8xf32>
    %286 = tpu.matmul %281, %283, %cst_106 {dimension_numbers = #tpu.dot_dimension_numbers<[2], [2], [1], [1], [0, 0, 0, 1, 1, 1], [0], [0]>} : vector<8x8x8xf32>, vector<8x8x8xf32>, vector<8x8x8xf32> -> vector<8x8x8xf32>
    "tpu.trace_stop"() : () -> ()
    %287 = vector.shape_cast %19 : vector<8x8xf32> to vector<1x8x8xf32>
    %288 = vector.broadcast %287 : vector<1x8x8xf32> to vector<8x8x8xf32>
    %289 = arith.addf %286, %288 : vector<8x8x8xf32>
    %290 = math.exp %289 : vector<8x8x8xf32>
    %cst_107 = arith.constant dense<0.000000e+00> : vector<8x8xf32>
    %291 = vector.multi_reduction <add>, %290, %cst_107 [2] : vector<8x8x8xf32> to vector<8x8xf32>
    %292 = vector.shape_cast %291 : vector<8x8xf32> to vector<8x8x1xf32>
    %293 = tpu.reciprocal %292 {approx = true} : vector<8x8x1xf32> -> vector<8x8x1xf32>
    %294 = vector.broadcast %293 : vector<8x8x1xf32> to vector<8x8x8xf32>
    %295 = arith.mulf %290, %294 : vector<8x8x8xf32>
    "tpu.trace_start"() <{level = 10 : i32, message = "gij,gjd->gid"}> : () -> ()
    %cst_108 = arith.constant dense<0.000000e+00> : vector<8x8x8xf32>
    %296 = tpu.matmul %295, %285, %cst_108 {dimension_numbers = #tpu.dot_dimension_numbers<[2], [1], [1], [2], [0, 0, 0, 1, 1, 2], [0], [0]>} : vector<8x8x8xf32>, vector<8x8x8xf32>, vector<8x8x8xf32> -> vector<8x8x8xf32>
    "tpu.trace_stop"() : () -> ()
    %297 = vector.shape_cast %296 : vector<8x8x8xf32> to vector<2x4x8x8xf32>
    %298 = tpu.transpose %297, [0, 2, 1, 3] : vector<2x4x8x8xf32> -> vector<2x8x4x8xf32>
    %299 = vector.shape_cast %298 : vector<2x8x4x8xf32> to vector<16x32xf32>
    %300 = arith.truncf %299 : vector<16x32xf32> to vector<16x32xbf16>
    %c2_109 = arith.constant 2 : index
    %c0_110 = arith.constant 0 : index
    %c0_111 = arith.constant 0 : index
    %301 = vector.load %arg4[%c2_109, %c0_110, %c0_111] : memref<4x32x32xbf16, #tpu.memory_space<vmem>>, vector<1x32x32xbf16>
    %302 = vector.shape_cast %301 : vector<1x32x32xbf16> to vector<32x32xbf16>
    %cst_112 = arith.constant dense<0.000000e+00> : vector<16x32xf32>
    %303 = tpu.matmul %300, %302, %cst_112 {dimension_numbers = #tpu.dot_dimension_numbers<[1], [0], [0], [1], [0, 0, 1, 1], [], []>} : vector<16x32xbf16>, vector<32x32xbf16>, vector<16x32xf32> -> vector<16x32xf32>
    %304 = arith.addf %245, %303 : vector<16x32xf32>
    %c2_113 = arith.constant 2 : index
    %c0_114 = arith.constant 0 : index
    %305 = vector.load %arg5[%c2_113, %c0_114] : memref<4x32xf32, #tpu.memory_space<vmem>>, vector<1x32xf32>
    %306 = vector.shape_cast %305 : vector<1x32xf32> to vector<32xf32>
    %307 = vector.shape_cast %306 : vector<32xf32> to vector<1x32xf32>
    %308 = vector.broadcast %307 : vector<1x32xf32> to vector<16x32xf32>
    %309 = arith.addf %304, %308 : vector<16x32xf32>
    %c2_115 = arith.constant 2 : index
    %c0_116 = arith.constant 0 : index
    %310 = vector.load %arg8[%c2_115, %c0_116] : memref<4x32xf32, #tpu.memory_space<vmem>>, vector<1x32xf32>
    %311 = vector.shape_cast %310 : vector<1x32xf32> to vector<32xf32>
    %312 = vector.shape_cast %311 : vector<32xf32> to vector<1x32xf32>
    %c2_117 = arith.constant 2 : index
    %c0_118 = arith.constant 0 : index
    %313 = vector.load %arg9[%c2_117, %c0_118] : memref<4x32xf32, #tpu.memory_space<vmem>>, vector<1x32xf32>
    %314 = vector.shape_cast %313 : vector<1x32xf32> to vector<32xf32>
    %315 = vector.shape_cast %314 : vector<32xf32> to vector<1x32xf32>
    %cst_119 = arith.constant dense<0.000000e+00> : vector<16xf32>
    %316 = vector.multi_reduction <add>, %309, %cst_119 [1] : vector<16x32xf32> to vector<16xf32>
    %317 = vector.shape_cast %316 : vector<16xf32> to vector<16x1xf32>
    %cst_120 = arith.constant 3.200000e+01 : f32
    %318 = vector.broadcast %cst_120 : f32 to vector<16x1xf32>
    %319 = arith.divf %317, %318 : vector<16x1xf32>
    %320 = vector.broadcast %319 : vector<16x1xf32> to vector<16x32xf32>
    %321 = arith.subf %309, %320 : vector<16x32xf32>
    %322 = arith.mulf %321, %321 : vector<16x32xf32>
    %cst_121 = arith.constant dense<0.000000e+00> : vector<16xf32>
    %323 = vector.multi_reduction <add>, %322, %cst_121 [1] : vector<16x32xf32> to vector<16xf32>
    %324 = vector.shape_cast %323 : vector<16xf32> to vector<16x1xf32>
    %cst_122 = arith.constant 3.200000e+01 : f32
    %325 = vector.broadcast %cst_122 : f32 to vector<16x1xf32>
    %326 = arith.divf %324, %325 : vector<16x1xf32>
    %327 = vector.broadcast %319 : vector<16x1xf32> to vector<16x32xf32>
    %328 = arith.subf %309, %327 : vector<16x32xf32>
    %cst_123 = arith.constant 9.99999974E-6 : f32
    %329 = vector.broadcast %cst_123 : f32 to vector<16x1xf32>
    %330 = arith.addf %326, %329 : vector<16x1xf32>
    %331 = math.rsqrt %330 : vector<16x1xf32>
    %332 = vector.broadcast %331 : vector<16x1xf32> to vector<16x32xf32>
    %333 = arith.mulf %328, %332 : vector<16x32xf32>
    %334 = vector.broadcast %312 : vector<1x32xf32> to vector<16x32xf32>
    %335 = arith.mulf %333, %334 : vector<16x32xf32>
    %336 = vector.broadcast %315 : vector<1x32xf32> to vector<16x32xf32>
    %337 = arith.addf %335, %336 : vector<16x32xf32>
    %338 = arith.truncf %337 : vector<16x32xf32> to vector<16x32xbf16>
    %c2_124 = arith.constant 2 : index
    %c0_125 = arith.constant 0 : index
    %c0_126 = arith.constant 0 : index
    %339 = vector.load %arg10[%c2_124, %c0_125, %c0_126] : memref<4x32x128xbf16, #tpu.memory_space<vmem>>, vector<1x32x128xbf16>
    %340 = vector.shape_cast %339 : vector<1x32x128xbf16> to vector<32x128xbf16>
    %cst_127 = arith.constant dense<0.000000e+00> : vector<16x128xf32>
    %341 = tpu.matmul %338, %340, %cst_127 {dimension_numbers = #tpu.dot_dimension_numbers<[1], [0], [0], [1], [0, 0, 1, 1], [], []>} : vector<16x32xbf16>, vector<32x128xbf16>, vector<16x128xf32> -> vector<16x128xf32>
    %c2_128 = arith.constant 2 : index
    %c0_129 = arith.constant 0 : index
    %342 = vector.load %arg11[%c2_128, %c0_129] : memref<4x128xf32, #tpu.memory_space<vmem>>, vector<1x128xf32>
    %343 = vector.shape_cast %342 : vector<1x128xf32> to vector<128xf32>
    %344 = vector.shape_cast %343 : vector<128xf32> to vector<1x128xf32>
    %345 = vector.broadcast %344 : vector<1x128xf32> to vector<16x128xf32>
    %346 = arith.addf %341, %345 : vector<16x128xf32>
    %cst_130 = arith.constant 0.000000e+00 : f32
    %347 = vector.broadcast %cst_130 : f32 to vector<16x128xf32>
    %348 = arith.maximumf %346, %347 : vector<16x128xf32>
    %349 = arith.truncf %348 : vector<16x128xf32> to vector<16x128xbf16>
    %c2_131 = arith.constant 2 : index
    %c0_132 = arith.constant 0 : index
    %c0_133 = arith.constant 0 : index
    %350 = vector.load %arg12[%c2_131, %c0_132, %c0_133] : memref<4x128x32xbf16, #tpu.memory_space<vmem>>, vector<1x128x32xbf16>
    %351 = vector.shape_cast %350 : vector<1x128x32xbf16> to vector<128x32xbf16>
    %cst_134 = arith.constant dense<0.000000e+00> : vector<16x32xf32>
    %352 = tpu.matmul %349, %351, %cst_134 {dimension_numbers = #tpu.dot_dimension_numbers<[1], [0], [0], [1], [0, 0, 1, 1], [], []>} : vector<16x128xbf16>, vector<128x32xbf16>, vector<16x32xf32> -> vector<16x32xf32>
    %353 = arith.addf %309, %352 : vector<16x32xf32>
    %c2_135 = arith.constant 2 : index
    %c0_136 = arith.constant 0 : index
    %354 = vector.load %arg13[%c2_135, %c0_136] : memref<4x32xf32, #tpu.memory_space<vmem>>, vector<1x32xf32>
    %355 = vector.shape_cast %354 : vector<1x32xf32> to vector<32xf32>
    %356 = vector.shape_cast %355 : vector<32xf32> to vector<1x32xf32>
    %357 = vector.broadcast %356 : vector<1x32xf32> to vector<16x32xf32>
    %358 = arith.addf %353, %357 : vector<16x32xf32>
    %c3 = arith.constant 3 : index
    %c0_137 = arith.constant 0 : index
    %359 = vector.load %arg6[%c3, %c0_137] : memref<4x32xf32, #tpu.memory_space<vmem>>, vector<1x32xf32>
    %360 = vector.shape_cast %359 : vector<1x32xf32> to vector<32xf32>
    %361 = vector.shape_cast %360 : vector<32xf32> to vector<1x32xf32>
    %c3_138 = arith.constant 3 : index
    %c0_139 = arith.constant 0 : index
    %362 = vector.load %arg7[%c3_138, %c0_139] : memref<4x32xf32, #tpu.memory_space<vmem>>, vector<1x32xf32>
    %363 = vector.shape_cast %362 : vector<1x32xf32> to vector<32xf32>
    %364 = vector.shape_cast %363 : vector<32xf32> to vector<1x32xf32>
    %cst_140 = arith.constant dense<0.000000e+00> : vector<16xf32>
    %365 = vector.multi_reduction <add>, %358, %cst_140 [1] : vector<16x32xf32> to vector<16xf32>
    %366 = vector.shape_cast %365 : vector<16xf32> to vector<16x1xf32>
    %cst_141 = arith.constant 3.200000e+01 : f32
    %367 = vector.broadcast %cst_141 : f32 to vector<16x1xf32>
    %368 = arith.divf %366, %367 : vector<16x1xf32>
    %369 = vector.broadcast %368 : vector<16x1xf32> to vector<16x32xf32>
    %370 = arith.subf %358, %369 : vector<16x32xf32>
    %371 = arith.mulf %370, %370 : vector<16x32xf32>
    %cst_142 = arith.constant dense<0.000000e+00> : vector<16xf32>
    %372 = vector.multi_reduction <add>, %371, %cst_142 [1] : vector<16x32xf32> to vector<16xf32>
    %373 = vector.shape_cast %372 : vector<16xf32> to vector<16x1xf32>
    %cst_143 = arith.constant 3.200000e+01 : f32
    %374 = vector.broadcast %cst_143 : f32 to vector<16x1xf32>
    %375 = arith.divf %373, %374 : vector<16x1xf32>
    %376 = vector.broadcast %368 : vector<16x1xf32> to vector<16x32xf32>
    %377 = arith.subf %358, %376 : vector<16x32xf32>
    %cst_144 = arith.constant 9.99999974E-6 : f32
    %378 = vector.broadcast %cst_144 : f32 to vector<16x1xf32>
    %379 = arith.addf %375, %378 : vector<16x1xf32>
    %380 = math.rsqrt %379 : vector<16x1xf32>
    %381 = vector.broadcast %380 : vector<16x1xf32> to vector<16x32xf32>
    %382 = arith.mulf %377, %381 : vector<16x32xf32>
    %383 = vector.broadcast %361 : vector<1x32xf32> to vector<16x32xf32>
    %384 = arith.mulf %382, %383 : vector<16x32xf32>
    %385 = vector.broadcast %364 : vector<1x32xf32> to vector<16x32xf32>
    %386 = arith.addf %384, %385 : vector<16x32xf32>
    %387 = arith.truncf %386 : vector<16x32xf32> to vector<16x32xbf16>
    %c3_145 = arith.constant 3 : index
    %c0_146 = arith.constant 0 : index
    %c0_147 = arith.constant 0 : index
    %388 = vector.load %arg3[%c3_145, %c0_146, %c0_147] : memref<4x32x96xbf16, #tpu.memory_space<vmem>>, vector<1x32x96xbf16>
    %389 = vector.shape_cast %388 : vector<1x32x96xbf16> to vector<32x96xbf16>
    %cst_148 = arith.constant dense<0.000000e+00> : vector<16x96xf32>
    %390 = tpu.matmul %387, %389, %cst_148 {dimension_numbers = #tpu.dot_dimension_numbers<[1], [0], [0], [1], [0, 0, 1, 1], [], []>} : vector<16x32xbf16>, vector<32x96xbf16>, vector<16x96xf32> -> vector<16x96xf32>
    %391 = vector.shape_cast %390 : vector<16x96xf32> to vector<2x8x12x8xf32>
    %392 = tpu.transpose %391, [0, 2, 1, 3] : vector<2x8x12x8xf32> -> vector<2x12x8x8xf32>
    %393 = vector.extract_strided_slice %392 {offsets = [0, 0, 0, 0], sizes = [2, 4, 8, 8], strides = [1, 1, 1, 1]} : vector<2x12x8x8xf32> to vector<2x4x8x8xf32>
    %394 = vector.shape_cast %393 : vector<2x4x8x8xf32> to vector<8x8x8xf32>
    %395 = vector.extract_strided_slice %392 {offsets = [0, 4, 0, 0], sizes = [2, 4, 8, 8], strides = [1, 1, 1, 1]} : vector<2x12x8x8xf32> to vector<2x4x8x8xf32>
    %396 = vector.shape_cast %395 : vector<2x4x8x8xf32> to vector<8x8x8xf32>
    %397 = vector.extract_strided_slice %392 {offsets = [0, 8, 0, 0], sizes = [2, 4, 8, 8], strides = [1, 1, 1, 1]} : vector<2x12x8x8xf32> to vector<2x4x8x8xf32>
    %398 = vector.shape_cast %397 : vector<2x4x8x8xf32> to vector<8x8x8xf32>
    "tpu.trace_start"() <{level = 10 : i32, message = "gid,gjd->gij"}> : () -> ()
    %cst_149 = arith.constant dense<0.000000e+00> : vector<8x8x8xf32>
    %399 = tpu.matmul %394, %396, %cst_149 {dimension_numbers = #tpu.dot_dimension_numbers<[2], [2], [1], [1], [0, 0, 0, 1, 1, 1], [0], [0]>} : vector<8x8x8xf32>, vector<8x8x8xf32>, vector<8x8x8xf32> -> vector<8x8x8xf32>
    "tpu.trace_stop"() : () -> ()
    %400 = vector.shape_cast %19 : vector<8x8xf32> to vector<1x8x8xf32>
    %401 = vector.broadcast %400 : vector<1x8x8xf32> to vector<8x8x8xf32>
    %402 = arith.addf %399, %401 : vector<8x8x8xf32>
    %403 = math.exp %402 : vector<8x8x8xf32>
    %cst_150 = arith.constant dense<0.000000e+00> : vector<8x8xf32>
    %404 = vector.multi_reduction <add>, %403, %cst_150 [2] : vector<8x8x8xf32> to vector<8x8xf32>
    %405 = vector.shape_cast %404 : vector<8x8xf32> to vector<8x8x1xf32>
    %406 = tpu.reciprocal %405 {approx = true} : vector<8x8x1xf32> -> vector<8x8x1xf32>
    %407 = vector.broadcast %406 : vector<8x8x1xf32> to vector<8x8x8xf32>
    %408 = arith.mulf %403, %407 : vector<8x8x8xf32>
    "tpu.trace_start"() <{level = 10 : i32, message = "gij,gjd->gid"}> : () -> ()
    %cst_151 = arith.constant dense<0.000000e+00> : vector<8x8x8xf32>
    %409 = tpu.matmul %408, %398, %cst_151 {dimension_numbers = #tpu.dot_dimension_numbers<[2], [1], [1], [2], [0, 0, 0, 1, 1, 2], [0], [0]>} : vector<8x8x8xf32>, vector<8x8x8xf32>, vector<8x8x8xf32> -> vector<8x8x8xf32>
    "tpu.trace_stop"() : () -> ()
    %410 = vector.shape_cast %409 : vector<8x8x8xf32> to vector<2x4x8x8xf32>
    %411 = tpu.transpose %410, [0, 2, 1, 3] : vector<2x4x8x8xf32> -> vector<2x8x4x8xf32>
    %412 = vector.shape_cast %411 : vector<2x8x4x8xf32> to vector<16x32xf32>
    %413 = arith.truncf %412 : vector<16x32xf32> to vector<16x32xbf16>
    %c3_152 = arith.constant 3 : index
    %c0_153 = arith.constant 0 : index
    %c0_154 = arith.constant 0 : index
    %414 = vector.load %arg4[%c3_152, %c0_153, %c0_154] : memref<4x32x32xbf16, #tpu.memory_space<vmem>>, vector<1x32x32xbf16>
    %415 = vector.shape_cast %414 : vector<1x32x32xbf16> to vector<32x32xbf16>
    %cst_155 = arith.constant dense<0.000000e+00> : vector<16x32xf32>
    %416 = tpu.matmul %413, %415, %cst_155 {dimension_numbers = #tpu.dot_dimension_numbers<[1], [0], [0], [1], [0, 0, 1, 1], [], []>} : vector<16x32xbf16>, vector<32x32xbf16>, vector<16x32xf32> -> vector<16x32xf32>
    %417 = arith.addf %358, %416 : vector<16x32xf32>
    %c3_156 = arith.constant 3 : index
    %c0_157 = arith.constant 0 : index
    %418 = vector.load %arg5[%c3_156, %c0_157] : memref<4x32xf32, #tpu.memory_space<vmem>>, vector<1x32xf32>
    %419 = vector.shape_cast %418 : vector<1x32xf32> to vector<32xf32>
    %420 = vector.shape_cast %419 : vector<32xf32> to vector<1x32xf32>
    %421 = vector.broadcast %420 : vector<1x32xf32> to vector<16x32xf32>
    %422 = arith.addf %417, %421 : vector<16x32xf32>
    %c3_158 = arith.constant 3 : index
    %c0_159 = arith.constant 0 : index
    %423 = vector.load %arg8[%c3_158, %c0_159] : memref<4x32xf32, #tpu.memory_space<vmem>>, vector<1x32xf32>
    %424 = vector.shape_cast %423 : vector<1x32xf32> to vector<32xf32>
    %425 = vector.shape_cast %424 : vector<32xf32> to vector<1x32xf32>
    %c3_160 = arith.constant 3 : index
    %c0_161 = arith.constant 0 : index
    %426 = vector.load %arg9[%c3_160, %c0_161] : memref<4x32xf32, #tpu.memory_space<vmem>>, vector<1x32xf32>
    %427 = vector.shape_cast %426 : vector<1x32xf32> to vector<32xf32>
    %428 = vector.shape_cast %427 : vector<32xf32> to vector<1x32xf32>
    %cst_162 = arith.constant dense<0.000000e+00> : vector<16xf32>
    %429 = vector.multi_reduction <add>, %422, %cst_162 [1] : vector<16x32xf32> to vector<16xf32>
    %430 = vector.shape_cast %429 : vector<16xf32> to vector<16x1xf32>
    %cst_163 = arith.constant 3.200000e+01 : f32
    %431 = vector.broadcast %cst_163 : f32 to vector<16x1xf32>
    %432 = arith.divf %430, %431 : vector<16x1xf32>
    %433 = vector.broadcast %432 : vector<16x1xf32> to vector<16x32xf32>
    %434 = arith.subf %422, %433 : vector<16x32xf32>
    %435 = arith.mulf %434, %434 : vector<16x32xf32>
    %cst_164 = arith.constant dense<0.000000e+00> : vector<16xf32>
    %436 = vector.multi_reduction <add>, %435, %cst_164 [1] : vector<16x32xf32> to vector<16xf32>
    %437 = vector.shape_cast %436 : vector<16xf32> to vector<16x1xf32>
    %cst_165 = arith.constant 3.200000e+01 : f32
    %438 = vector.broadcast %cst_165 : f32 to vector<16x1xf32>
    %439 = arith.divf %437, %438 : vector<16x1xf32>
    %440 = vector.broadcast %432 : vector<16x1xf32> to vector<16x32xf32>
    %441 = arith.subf %422, %440 : vector<16x32xf32>
    %cst_166 = arith.constant 9.99999974E-6 : f32
    %442 = vector.broadcast %cst_166 : f32 to vector<16x1xf32>
    %443 = arith.addf %439, %442 : vector<16x1xf32>
    %444 = math.rsqrt %443 : vector<16x1xf32>
    %445 = vector.broadcast %444 : vector<16x1xf32> to vector<16x32xf32>
    %446 = arith.mulf %441, %445 : vector<16x32xf32>
    %447 = vector.broadcast %425 : vector<1x32xf32> to vector<16x32xf32>
    %448 = arith.mulf %446, %447 : vector<16x32xf32>
    %449 = vector.broadcast %428 : vector<1x32xf32> to vector<16x32xf32>
    %450 = arith.addf %448, %449 : vector<16x32xf32>
    %451 = arith.truncf %450 : vector<16x32xf32> to vector<16x32xbf16>
    %c3_167 = arith.constant 3 : index
    %c0_168 = arith.constant 0 : index
    %c0_169 = arith.constant 0 : index
    %452 = vector.load %arg10[%c3_167, %c0_168, %c0_169] : memref<4x32x128xbf16, #tpu.memory_space<vmem>>, vector<1x32x128xbf16>
    %453 = vector.shape_cast %452 : vector<1x32x128xbf16> to vector<32x128xbf16>
    %cst_170 = arith.constant dense<0.000000e+00> : vector<16x128xf32>
    %454 = tpu.matmul %451, %453, %cst_170 {dimension_numbers = #tpu.dot_dimension_numbers<[1], [0], [0], [1], [0, 0, 1, 1], [], []>} : vector<16x32xbf16>, vector<32x128xbf16>, vector<16x128xf32> -> vector<16x128xf32>
    %c3_171 = arith.constant 3 : index
    %c0_172 = arith.constant 0 : index
    %455 = vector.load %arg11[%c3_171, %c0_172] : memref<4x128xf32, #tpu.memory_space<vmem>>, vector<1x128xf32>
    %456 = vector.shape_cast %455 : vector<1x128xf32> to vector<128xf32>
    %457 = vector.shape_cast %456 : vector<128xf32> to vector<1x128xf32>
    %458 = vector.broadcast %457 : vector<1x128xf32> to vector<16x128xf32>
    %459 = arith.addf %454, %458 : vector<16x128xf32>
    %cst_173 = arith.constant 0.000000e+00 : f32
    %460 = vector.broadcast %cst_173 : f32 to vector<16x128xf32>
    %461 = arith.maximumf %459, %460 : vector<16x128xf32>
    %462 = arith.truncf %461 : vector<16x128xf32> to vector<16x128xbf16>
    %c3_174 = arith.constant 3 : index
    %c0_175 = arith.constant 0 : index
    %c0_176 = arith.constant 0 : index
    %463 = vector.load %arg12[%c3_174, %c0_175, %c0_176] : memref<4x128x32xbf16, #tpu.memory_space<vmem>>, vector<1x128x32xbf16>
    %464 = vector.shape_cast %463 : vector<1x128x32xbf16> to vector<128x32xbf16>
    %cst_177 = arith.constant dense<0.000000e+00> : vector<16x32xf32>
    %465 = tpu.matmul %462, %464, %cst_177 {dimension_numbers = #tpu.dot_dimension_numbers<[1], [0], [0], [1], [0, 0, 1, 1], [], []>} : vector<16x128xbf16>, vector<128x32xbf16>, vector<16x32xf32> -> vector<16x32xf32>
    %466 = arith.addf %422, %465 : vector<16x32xf32>
    %c3_178 = arith.constant 3 : index
    %c0_179 = arith.constant 0 : index
    %467 = vector.load %arg13[%c3_178, %c0_179] : memref<4x32xf32, #tpu.memory_space<vmem>>, vector<1x32xf32>
    %468 = vector.shape_cast %467 : vector<1x32xf32> to vector<32xf32>
    %469 = vector.shape_cast %468 : vector<32xf32> to vector<1x32xf32>
    %470 = vector.broadcast %469 : vector<1x32xf32> to vector<16x32xf32>
    %471 = arith.addf %466, %470 : vector<16x32xf32>
    %c0_180 = arith.constant 0 : index
    %c0_181 = arith.constant 0 : index
    %472 = vector.load %arg14[%c0_180, %c0_181] : memref<1x32xf32, #tpu.memory_space<vmem>>, vector<1x32xf32>
    %c0_182 = arith.constant 0 : index
    %c0_183 = arith.constant 0 : index
    %473 = vector.load %arg15[%c0_182, %c0_183] : memref<1x32xf32, #tpu.memory_space<vmem>>, vector<1x32xf32>
    %cst_184 = arith.constant dense<0.000000e+00> : vector<16xf32>
    %474 = vector.multi_reduction <add>, %471, %cst_184 [1] : vector<16x32xf32> to vector<16xf32>
    %475 = vector.shape_cast %474 : vector<16xf32> to vector<16x1xf32>
    %cst_185 = arith.constant 3.200000e+01 : f32
    %476 = vector.broadcast %cst_185 : f32 to vector<16x1xf32>
    %477 = arith.divf %475, %476 : vector<16x1xf32>
    %478 = vector.broadcast %477 : vector<16x1xf32> to vector<16x32xf32>
    %479 = arith.subf %471, %478 : vector<16x32xf32>
    %480 = arith.mulf %479, %479 : vector<16x32xf32>
    %cst_186 = arith.constant dense<0.000000e+00> : vector<16xf32>
    %481 = vector.multi_reduction <add>, %480, %cst_186 [1] : vector<16x32xf32> to vector<16xf32>
    %482 = vector.shape_cast %481 : vector<16xf32> to vector<16x1xf32>
    %cst_187 = arith.constant 3.200000e+01 : f32
    %483 = vector.broadcast %cst_187 : f32 to vector<16x1xf32>
    %484 = arith.divf %482, %483 : vector<16x1xf32>
    %485 = vector.broadcast %477 : vector<16x1xf32> to vector<16x32xf32>
    %486 = arith.subf %471, %485 : vector<16x32xf32>
    %cst_188 = arith.constant 9.99999974E-6 : f32
    %487 = vector.broadcast %cst_188 : f32 to vector<16x1xf32>
    %488 = arith.addf %484, %487 : vector<16x1xf32>
    %489 = math.rsqrt %488 : vector<16x1xf32>
    %490 = vector.broadcast %489 : vector<16x1xf32> to vector<16x32xf32>
    %491 = arith.mulf %486, %490 : vector<16x32xf32>
    %492 = vector.broadcast %472 : vector<1x32xf32> to vector<16x32xf32>
    %493 = arith.mulf %491, %492 : vector<16x32xf32>
    %494 = vector.broadcast %473 : vector<1x32xf32> to vector<16x32xf32>
    %495 = arith.addf %493, %494 : vector<16x32xf32>
    %496 = arith.truncf %495 : vector<16x32xf32> to vector<16x32xbf16>
    %c0_189 = arith.constant 0 : index
    %c0_190 = arith.constant 0 : index
    %497 = vector.load %arg16[%c0_189, %c0_190] : memref<32x128xbf16, #tpu.memory_space<vmem>>, vector<32x128xbf16>
    %cst_191 = arith.constant dense<0.000000e+00> : vector<16x128xf32>
    %498 = tpu.matmul %496, %497, %cst_191 {dimension_numbers = #tpu.dot_dimension_numbers<[1], [0], [0], [1], [0, 0, 1, 1], [], []>} : vector<16x32xbf16>, vector<32x128xbf16>, vector<16x128xf32> -> vector<16x128xf32>
    %c0_192 = arith.constant 0 : index
    %c0_193 = arith.constant 0 : index
    %499 = vector.load %arg17[%c0_192, %c0_193] : memref<1x128xf32, #tpu.memory_space<vmem>>, vector<1x128xf32>
    %500 = vector.broadcast %499 : vector<1x128xf32> to vector<16x128xf32>
    %501 = arith.addf %498, %500 : vector<16x128xf32>
    %502 = vector.shape_cast %501 : vector<16x128xf32> to vector<2x8x128xf32>
    %c0_194 = arith.constant 0 : index
    %c0_195 = arith.constant 0 : index
    %c0_196 = arith.constant 0 : index
    %503 = vector.load %arg18[%c0_194, %c0_195, %c0_196] : memref<2x8x128xf32, #tpu.memory_space<vmem>>, vector<2x8x128xf32>
    tpu.vector_store %arg18[%c0_194, %c0_195, %c0_196], %502 {strides = array<i32>} : memref<2x8x128xf32, #tpu.memory_space<vmem>>, vector<2x8x128xf32>,
    return
  }
}

</mosaic_0001>

<bundles_post_ra>
// kernel: model_forward.1
= control target key start
LH: loop header
LB: loop body
LE: loop exit
PB: predicated region body
PF: predicated region fallthrough
CT: control target
= control target key end

     0   :  { %s15238_s0 = inlined_call_operand.vmem [shape: s32[16,1], index: 0, kind: input, shape index: {}]   ;;  %s15239_s1 = inlined_call_operand.vmem [shape: f32[128,32], index: 1, kind: input, shape index: {}]   ;;  %s15240_s2 = inlined_call_operand.vmem [shape: f32[8,32], index: 2, kind: input, shape index: {}]   ;;  %s15241_s3 = inlined_call_operand.vmem [shape: bf16[4,32,96], index: 3, kind: input, shape index: {}]   ;;  %s15242_s4 = inlined_call_operand.vmem [shape: bf16[4,32,32], index: 4, kind: input, shape index: {}]   ;;  %s15243_s5 = inlined_call_operand.vmem [shape: f32[4,32], index: 5, kind: input, shape index: {}]   ;;  %s15244_s6 = inlined_call_operand.vmem [shape: f32[4,32], index: 6, kind: input, shape index: {}]   ;;  %s15245_s7 = inlined_call_operand.vmem [shape: f32[4,32], index: 7, kind: input, shape index: {}]   ;;  %s15246_s8 = inlined_call_operand.vmem [shape: f32[4,32], index: 8, kind: input, shape index: {}]   ;;  %s15247_s9 = inlined_call_operand.vmem [shape: f32[4,32], index: 9, kind: input, shape index: {}]   ;;  %s15248_s10 = inlined_call_operand.vmem [shape: bf16[4,32,128], index: 10, kind: input, shape index: {}]   ;;  %s15249_s11 = inlined_call_operand.vmem [shape: f32[4,128], index: 11, kind: input, shape index: {}]   ;;  %s15250_s12 = inlined_call_operand.vmem [shape: bf16[4,128,32], index: 12, kind: input, shape index: {}]   ;;  %s15251_s13 = inlined_call_operand.vmem [shape: f32[4,32], index: 13, kind: input, shape index: {}]   ;;  %s15252_s14 = inlined_call_operand.vmem [shape: f32[1,32], index: 14, kind: input, shape index: {}]   ;;  %s15253_s15 = inlined_call_operand.vmem [shape: f32[1,32], index: 15, kind: input, shape index: {}]   ;;  %s15254_s16 = inlined_call_operand.vmem [shape: bf16[32,128], index: 16, kind: input, shape index: {}]   ;;  %s15255_s17 = inlined_call_operand.vmem [shape: f32[1,128], index: 17, kind: input, shape index: {}]   ;;  %s15256_s18 = inlined_call_operand.hbm [shape: f32[2,8,128], index: 18, kind: output, shape index: {}]  }
   0x1   :  { %15291 = sst [smem:[#allocation5_spill]] %s15238_s0 }
   0x2   :  { %15292 = sst [smem:[#allocation6_spill]] %s15239_s1 }
   0x3   :  { %15293 = sst [smem:[#allocation7_spill]] %s15240_s2 }
   0x4   :  { %15294 = sst [smem:[#allocation8_spill]] %s15243_s5 }
   0x5   :  { %15295 = sst [smem:[#allocation9_spill]] %s15251_s13 }
   0x6   :  { %15296 = sst [smem:[#allocation10_spill]] %s15252_s14 }
   0x7   :  { %15297 = sst [smem:[#allocation11_spill]] %s15253_s15 }
   0x8   :  { %15298 = sst [smem:[#allocation12_spill]] %s15254_s16 }
   0x9   :  { %15299 = sst [smem:[#allocation13_spill]] %s15255_s17 }
   0xa   :  { %15300 = sst [smem:[#allocation14_spill]] %s15256_s18 }
   0xb   :  { %s15301_s29 = sld [smem:[#allocation5_spill]]  ;;  %s15302_s13 = sld [smem:[#allocation6_spill]]  ;;  %v13138_v2 = vmov 0  }
   0xc   :  { %12831 = vset.pattern.permute.xlu0 %v13138_v2 }
  0x11   :  { %v61_v0 = vld [vmem:[%s15301_s29] sm:$0xff]  ;;  %v78_v3 = vld [vmem:[%s15302_s13 + $0x8] sm:$0xff]  ;;  %v79_v4 = vld [vmem:[%s15302_s13 + $0x10] sm:$0xff] }
  0x12   :  { %v77_v1 = vld [vmem:[%s15302_s13] sm:$0xff]  ;;  %v80_v5 = vld [vmem:[%s15302_s13 + $0x18] sm:$0xff]  ;;  %66 = vperm.xlu0 %12831, %v61_v0   ;;  %v62_v8 = vld [vmem:[%s15301_s29 + $0x8] sm:$0xff] }
  0x13   :  { %v12776_v6 = vpack.c.bf16 %v78_v3, %v77_v1  ;;  %v12780_v7 = vpack.c.bf16 %v80_v5, %v79_v4  ;;  %v81_v9 = vld [vmem:[%s15302_s13 + $0x20] sm:$0xff]  ;;  %v82_v10 = vld [vmem:[%s15302_s13 + $0x28] sm:$0xff]  ;;  %v83_v11 = vld [vmem:[%s15302_s13 + $0x30] sm:$0xff] }
  0x14   :  { %v12784_v12 = vpack.c.bf16 %v82_v10, %v81_v9  ;;  %v84_v13 = vld [vmem:[%s15302_s13 + $0x38] sm:$0xff]  ;;  %v85_v14 = vld [vmem:[%s15302_s13 + $0x40] sm:$0xff]  ;;  %v86_v15 = vld [vmem:[%s15302_s13 + $0x48] sm:$0xff] }
  0x15   :  { %12777 = vmatprep.subr.bf16.mxu0 %v12776_v6  ;;  %v12788_v16 = vpack.c.bf16 %v84_v13, %v83_v11  ;;  %v87_v17 = vld [vmem:[%s15302_s13 + $0x50] sm:$0xff]  ;;  %v88_v18 = vld [vmem:[%s15302_s13 + $0x58] sm:$0xff]  ;;  %v12792_v19 = vpack.c.bf16 %v86_v15, %v85_v14  ;;  %v89_v20 = vld [vmem:[%s15302_s13 + $0x60] sm:$0xff] }
  0x16   :  { %12779 = vmatpush3.bf16.msra.mxu0 %v12776_v6  ;;  %69 = vperm.xlu0 %12831, %v62_v8   ;;  %v90_v21 = vld [vmem:[%s15302_s13 + $0x68] sm:$0xff]  ;;  %v12796_v22 = vpack.c.bf16 %v88_v18, %v87_v17  ;;  %v91_v23 = vld [vmem:[%s15302_s13 + $0x70] sm:$0xff]  ;;  %v92_v24 = vld [vmem:[%s15302_s13 + $0x78] sm:$0xff] }
  0x17   :  { %12781 = vmatprep.subr.bf16.mxu0 %v12780_v7  ;;  %v12800_v25 = vpack.c.bf16 %v90_v21, %v89_v20  ;;  %v12804_v26 = vpack.c.bf16 %v92_v24, %v91_v23 }
  0x1a   :  { %12783 = vmatpush3.bf16.msra.mxu0 %v12780_v7 }
  0x1b   :  { %12785 = vmatprep.subr.bf16.mxu0 %v12784_v12 }
  0x1e   :  { %12787 = vmatpush3.bf16.msra.mxu0 %v12784_v12 }
  0x1f   :  { %12789 = vmatprep.subr.bf16.mxu0 %v12788_v16 }
  0x22   :  { %12791 = vmatpush3.bf16.msra.mxu0 %v12788_v16 }
  0x23   :  { %12793 = vmatprep.subr.bf16.mxu0 %v12792_v19 }
  0x26   :  { %12795 = vmatpush3.bf16.msra.mxu0 %v12792_v19 }
  0x27   :  { %12797 = vmatprep.subr.bf16.mxu0 %v12796_v22 }
  0x2a   :  { %12799 = vmatpush3.bf16.msra.mxu0 %v12796_v22 }
  0x2b   :  { %12801 = vmatprep.subr.bf16.mxu0 %v12800_v25 }
  0x2e   :  { %12803 = vmatpush3.bf16.msra.mxu0 %v12800_v25 }
  0x2f   :  { %12805 = vmatprep.subr.bf16.mxu0 %v12804_v26 }
  0x32   :  { %12807 = vmatpush3.bf16.msra.mxu0 %v12804_v26 }
  0x33   :  { %23 = vsyncpa [#allocation3], 0  ;;  %v63_v27 = vlaneseq  ;;  %v13139_v30 = vmov 1.0   ;;  %s15303_s21 = sld [smem:[#allocation7_spill]]  ;;  %vm177_vm2 = vcmask 261120   ;;  %v12892_v49 = vld [vmem:[%s15241_s3] sm:$0xff]  }
  0x34   :  { %v13140_v50 = vmov 0.0   ;;  %v12893_v51 = vld [vmem:[%s15241_s3 + $0x8] sm:$0xff]   ;;  %vm13141_vm3 = vmmov 0   ;;  %v11638_v60 = vld [vmem:[%s15244_s6] ss:$0 sm:$0xff]  ;;  %s15282_s30 = smov 120  }
  0x35   :  { %v13311_v28 = vand.u32 127, %v63_v27  ;;  %12272 = vmatprep.subr.bf16.mxu0 %v13140_v50  ;;  %12280 = vmatprep.subr.mxu1 %v13140_v50  ;;  %v11639_v0 = vld [vmem:[%s15245_s7] ss:$0 sm:$0xff]  ;;  %s15284_s0 = smov 96   ;;  %s15286_s19 = smov 88   ;;  %v13396_v15 = vshrl.u32 %v63_v27, 7 }
  0x36   :  { %12282 = vmatprep.mubr.msk.f32.mxu1 %vm13141_vm3, %v13140_v50  ;;  %s15276_s1 = smov 72   ;;  %s15280_s29 = smov 80   ;;  %v13153_v10 = vmov 1983009808   ;;  %v13154_v13 = vmov 1934713408  }
  0x37   :  { %s15274_s13 = smov 112   ;;  %s15272_s20 = smov 56   ;;  %v349_v11 = vunpack.c.l.s4 %v13153_v10  ;;  %v413_v14 = vunpack.c.l.s4 %v13154_v13  ;;  %vm1162_vm4 = vcmask 64512   ;;  %vm173_vm5 = vcmp.le.s32.totalorder %v13311_v28, %v13396_v15 }
  0x38   :  { %s15270_s22 = smov 64   ;;  %s15268_s2 = smov 48   ;;  %vm2709_vm6 = vcmask 130048   ;;  %vm2712_vm7 = vcmask 195584  }
  0x39   :  { %v168_v32 = vld [vmem:[%s15303_s21] sm:$0xff]  ;;  %s15278_s21 = smov 104   ;;  %s15266_s23 = smov 40   ;;  %v350_v16 = vunpack.c.0.s8 %v349_v11  ;;  %v414_v18 = vunpack.c.0.s8 %v413_v14 }
  0x3a   :  { %s15264_s28 = smov 16   ;;  %s15262_s24 = smov 8  }
  0x3b   :  { %v13399_v19 = vsub.s32 %v350_v16, %v13396_v15  ;;  %v13402_v25 = vsub.s32 %v414_v18, %v13396_v15  ;;  %s15260_s25 = smov 24   ;;  %s15306_s27 = smov 48  }
  0x3c   :  { %s15307_s26 = smov 40   ;;  %s15318_s14 = smov 88  }
  0x3d   :  { %s15322_s15 = sld [smem:[#allocation11_spill]]  ;;  %s15323_s16 = sld [smem:[#allocation13_spill]] }
  0x91   :  { %v67_v29 = vpop.permute.xlu0 %66 }
  0x92   :  { %vm71_vm0 = vcmp.eq.s32.totalorder %v13311_v28, %v67_v29 }
  0x93   :  { %12269 = vmatprep.mubr.msk.f32.mxu0 %vm71_vm0, %v13139_v30 }
  0x95   :  { %v70_v31 = vpop.permute.xlu0 %69 }
  0x96   :  { %vm72_vm1 = vcmp.eq.s32.totalorder %v13311_v28, %v70_v31 }
  0x97   :  { %12270 = vmatmul.mubr.msk.f32.vlgmr.msra.gmra.mrb[0].mxu0 %vm72_vm1, %v13139_v30 }
  0x98   :  { %12273 = vmatpush3.bf16.msra.mxu0 %v12892_v49  ;;  %12276 = vmatprep.mubr.msk.bf16.mxu0 %vm13141_vm3, %v13140_v50 }
  0x99   :  { %12274 = vmatprep.subr.bf16.mxu0 %v13140_v50 }
  0x9c   :  { %12275 = vmatpush3.bf16.msra.mxu0 %v12893_v51 }
  0x9d   :  { %12305 = vmatprep.subr.mxu0 %v13140_v50 }
 0x16a   :  { %v12271_v33 = vpop.f32.mrb[0].mxu0 }
 0x16b   :  { %v159_v34 = vpop.f32.mrb[1].mxu0  ;;  %v13320_v36 = vadd.f32 %v12271_v33, %v168_v32 }
 0x16c   :  { %v13318_v35 = vadd.f32 %v168_v32, %v159_v34 }
 0x16d   :  { %v181_v38 = vsel %vm177_vm2, %v13320_v36, 0.0 }
 0x16e   :  { %v178_v37 = vsel %vm177_vm2, %v13318_v35, 0.0 }
 0x16f   :  { %179 = vadd.xlane.f32.xlu1 %v178_v37 }
 0x173   :  { %182 = vadd.xlane.f32.xlu1 %v181_v38 }
 0x1fc   :  { %v180_v39 = vpop.xlane.xlu1 %179 }
 0x1fd   :  { %v185_v40 = vmul.f32 0.03125, %v180_v39 }
 0x1ff   :  { %v187_v41 = vsub.f32 %v13318_v35, %v185_v40 }
 0x200   :  { %v183_v42 = vpop.xlane.xlu1 %182 }
 0x201   :  { %v186_v43 = vmul.f32 0.03125, %v183_v42  ;;  %v189_v44 = vmul.f32 %v187_v41, %v187_v41 }
 0x203   :  { %v188_v45 = vsub.f32 %v13320_v36, %v186_v43  ;;  %v191_v46 = vsel %vm177_vm2, %v189_v44, 0.0 }
 0x204   :  { %192 = vadd.xlane.f32.xlu0 %v191_v46 }
 0x205   :  { %v190_v47 = vmul.f32 %v188_v45, %v188_v45 }
 0x207   :  { %v194_v48 = vsel %vm177_vm2, %v190_v47, 0.0 }
 0x208   :  { %195 = vadd.xlane.f32.xlu1 %v194_v48 }
 0x291   :  { %v193_v52 = vpop.xlane.xlu0 %192 }
 0x292   :  { %v197_v53 = vmul.f32 0.03125, %v193_v52 }
 0x294   :  { %v199_v54 = vadd.f32 1e-05, %v197_v53 }
 0x295   :  { %v196_v55 = vpop.xlane.xlu1 %195 }
 0x296   :  { %12950 = vrsqrt.f32 %v199_v54  ;;  %v198_v56 = vmul.f32 0.03125, %v196_v55 }
 0x298   :  { %v200_v57 = vadd.f32 1e-05, %v198_v56 }
 0x29a   :  { %12952 = vrsqrt.f32 %v200_v57 }
 0x2a0   :  { %v12951_v58 = vpop.eup %12950 }
 0x2a1   :  { %v203_v59 = vmul.f32 %v12951_v58, %v187_v41 }
 0x2a3   :  { %v209_v62 = vmul.f32 %v11638_v60, %v203_v59 }
 0x2a4   :  { %v12953_v61 = vpop.eup %12952 }
 0x2a5   :  { %v204_v63 = vmul.f32 %v12953_v61, %v188_v45  ;;  %v215_v2 = vadd.f32 %v11639_v0, %v209_v62 }
 0x2a7   :  { %v210_v1 = vmul.f32 %v11638_v60, %v204_v63 }
 0x2a9   :  { %v216_v3 = vadd.f32 %v11639_v0, %v210_v1 }
 0x2ab   :  { %v217_v4 = vpack.c.bf16 %v216_v3, %v215_v2 }
 0x2ad   :  { %12277 = vmatmul.mubr.msk.bf16.vlgmr.msra.gmra.mrb[4].mxu0 %vm177_vm2, %v217_v4 }
 0x2ae   :  { %12307 = vmatprep.mubr.msk.f32.mxu0 %vm13141_vm3, %v13140_v50 }
 0x380   :  { %v13353_v5 = vpop.f32.mrb[4].mxu0 }
 0x381   :  { %280 = vrot.lane.b32.xlu0 %v13353_v5, %s15282_s30  ;;  %298 = vrot.lane.b32.xlu1 %v13353_v5, %s15284_s0  ;;  %v12278_v6 = vpop.f32.mrb[5].mxu0 }
 0x382   :  { %v13359_v7 = vpop.f32.mrb[6].mxu0 }
 0x383   :  { %v12279_v8 = vpop.f32.mrb[7].mxu0 }
 0x385   :  { %304 = vrot.lane.b32.xlu1 %v13353_v5, %s15286_s19  ;;  %318 = vrot.lane.b32.xlu0 %v13359_v7, %s15276_s1 }
 0x389   :  { %310 = vrot.lane.b32.xlu1 %v13353_v5, %s15280_s29  ;;  %288 = vrot.lane.b32.xlu0 %v13359_v7, %s15274_s13 }
 0x38d   :  { %316 = vrot.lane.b32.xlu1 %v13353_v5, %s15276_s1  ;;  %328 = vrot.lane.b32.xlu0 %v13353_v5, %s15272_s20 }
 0x391   :  { %286 = vrot.lane.b32.xlu1 %v13353_v5, %s15274_s13 }
 0x395   :  { %292 = vrot.lane.b32.xlu1 %v13353_v5, %s15278_s21 }
 0x399   :  { %300 = vrot.lane.b32.xlu1 %v13359_v7, %s15284_s0 }
 0x39d   :  { %306 = vrot.lane.b32.xlu1 %v13359_v7, %s15286_s19 }
 0x3a1   :  { %312 = vrot.lane.b32.xlu1 %v13359_v7, %s15280_s29 }
 0x3a5   :  { %282 = vrot.lane.b32.xlu1 %v13359_v7, %s15282_s30 }
 0x3a9   :  { %294 = vrot.lane.b32.xlu1 %v13359_v7, %s15278_s21 }
 0x3ad   :  { %322 = vrot.lane.b32.xlu1 %v13353_v5, %s15270_s22 }
 0x3b1   :  { %334 = vrot.lane.b32.xlu1 %v13353_v5, %s15268_s2 }
 0x3b5   :  { %340 = vrot.lane.b32.xlu1 %v13353_v5, %s15266_s23 }
 0x3b9   :  { %324 = vrot.lane.b32.xlu1 %v13359_v7, %s15270_s22  ;;  %s15314_s22 = smov 104  }
 0x3f3   :  { %v299_v9 = vpop.permute.xlu1 %298  ;;  %v281_v45 = vpop.permute.xlu0 %280 }
 0x3f7   :  { %v305_v12 = vpop.permute.xlu1 %304 }
 0x3fb   :  { %v311_v17 = vpop.permute.xlu1 %310 }
 0x3fc   :  { %v378_v20 = vcombine.low %v299_v9, %v311_v17  ;;  %v379_v21 = vcombine.high %v299_v9, %v311_v17 }
 0x3fe   :  { %v386_v26 = vrot.slane %v378_v20, %v13399_v19  ;;  %v393_v29 = vrot.slane %v379_v21, %v13399_v19 }
 0x3ff   :  { %v317_v22 = vpop.permute.xlu1 %316 }
 0x400   :  { %v394_v23 = vcombine.low %v305_v12, %v317_v22  ;;  %v395_v24 = vcombine.high %v305_v12, %v317_v22  ;;  %v319_v12 = vpop.permute.xlu0 %318 }
 0x402   :  { %v402_v27 = vrot.slane %v394_v23, %v13399_v19  ;;  %v409_v30 = vrot.slane %v395_v24, %v13399_v19 }
 0x403   :  { %v287_v31 = vpop.permute.xlu1 %286 }
 0x404   :  { %v442_v32 = vcombine.low %v386_v26, %v402_v27  ;;  %v443_v33 = vcombine.high %v386_v26, %v402_v27  ;;  %v458_v34 = vcombine.low %v393_v29, %v409_v30  ;;  %v459_v37 = vcombine.high %v393_v29, %v409_v30 }
 0x405   :  { %v346_v42 = vcombine.low %v13353_v5, %v287_v31  ;;  %v347_v43 = vcombine.high %v13353_v5, %v287_v31 }
 0x406   :  { %v450_v38 = vrot.slane %v442_v32, %v13402_v25  ;;  %v457_v39 = vrot.slane %v443_v33, %v13402_v25  ;;  %v466_v40 = vrot.slane %v458_v34, %v13402_v25  ;;  %v473_v41 = vrot.slane %v459_v37, %v13402_v25 }
 0x407   :  { %v293_v44 = vpop.permute.xlu1 %292  ;;  %v354_v57 = vrot.slane %v346_v42, %v13399_v19  ;;  %v361_v58 = vrot.slane %v347_v43, %v13399_v19 }
 0x408   :  { %v11644_v46 = vcombine.low %v450_v38, %v457_v39  ;;  %v11646_v47 = vcombine.high %v450_v38, %v457_v39  ;;  %v11648_v48 = vcombine.low %v466_v40, %v473_v41  ;;  %v11650_v49 = vcombine.high %v466_v40, %v473_v41  ;;  %v289_v39 = vpop.permute.xlu0 %288 }
 0x409   :  { %v362_v51 = vcombine.low %v281_v45, %v293_v44  ;;  %v363_v52 = vcombine.high %v281_v45, %v293_v44 }
 0x40a   :  { %v769_v53 = vrot.slane %v11644_v46, %v13399_v19  ;;  %v785_v54 = vrot.slane %v11646_v47, %v13399_v19  ;;  %v801_v55 = vrot.slane %v11648_v48, %v13399_v19  ;;  %v817_v56 = vrot.slane %v11650_v49, %v13399_v19 }
 0x40b   :  { %v370_v59 = vrot.slane %v362_v51, %v13399_v19  ;;  %v377_v60 = vrot.slane %v363_v52, %v13399_v19  ;;  %v301_v61 = vpop.permute.xlu1 %300 }
 0x40c   :  { %v834_v62 = vcombine.low %v769_v53, %v785_v54  ;;  %v866_v63 = vcombine.low %v801_v55, %v817_v56  ;;  %v835_v13 = vcombine.high %v769_v53, %v785_v54  ;;  %v867_v14 = vcombine.high %v801_v55, %v817_v56 }
 0x40d   :  { %v410_v0 = vcombine.low %v354_v57, %v370_v59  ;;  %v411_v1 = vcombine.high %v354_v57, %v370_v59  ;;  %v426_v2 = vcombine.low %v361_v58, %v377_v60  ;;  %v427_v3 = vcombine.high %v361_v58, %v377_v60 }
 0x40e   :  { %v13423_v4 = vrot.slane %v834_v62, %v13402_v25  ;;  %v874_v5 = vrot.slane %v866_v63, %v13402_v25  ;;  %v13438_v37 = vrot.slane %v835_v13, %v13402_v25  ;;  %v13441_v38 = vrot.slane %v867_v14, %v13402_v25 }
 0x40f   :  { %v418_v6 = vrot.slane %v410_v0, %v13402_v25  ;;  %v425_v8 = vrot.slane %v411_v1, %v13402_v25  ;;  %v434_v9 = vrot.slane %v426_v2, %v13402_v25  ;;  %v441_v10 = vrot.slane %v427_v3, %v13402_v25  ;;  %v307_v11 = vpop.permute.xlu1 %306 }
 0x410   :  { %v886_v16 = vcombine.low %v13423_v4, %v874_v5  ;;  %v598_v22 = vcombine.low %v307_v11, %v319_v12  ;;  %v599_v23 = vcombine.high %v307_v11, %v319_v12  ;;  %v550_v54 = vcombine.low %v13359_v7, %v289_v39 }
 0x411   :  { %v11643_v17 = vcombine.low %v418_v6, %v425_v8  ;;  %v11645_v18 = vcombine.high %v418_v6, %v425_v8  ;;  %v11647_v20 = vcombine.low %v434_v9, %v441_v10  ;;  %v11649_v21 = vcombine.high %v434_v9, %v441_v10 }
 0x412   :  { %12281 = vmatpush3.xpose.msk.msra.mxu1 %vm1162_vm4, %v886_v16  ;;  %v606_v40 = vrot.slane %v598_v22, %v13399_v19  ;;  %v613_v41 = vrot.slane %v599_v23, %v13399_v19  ;;  %v887_v55 = vcombine.high %v13423_v4, %v874_v5  ;;  %v888_v63 = vcombine.low %v13438_v37, %v13441_v38 }
 0x413   :  { %v313_v24 = vpop.permute.xlu1 %312  ;;  %12285 = vmatprep.subr.mxu1 %v13140_v50  ;;  %v762_v26 = vrot.slane %v11643_v17, %v13399_v19  ;;  %v778_v29 = vrot.slane %v11645_v18, %v13399_v19  ;;  %v794_v27 = vrot.slane %v11647_v20, %v13399_v19  ;;  %v810_v30 = vrot.slane %v11649_v21, %v13399_v19 }
 0x414   :  { %v582_v31 = vcombine.low %v301_v61, %v313_v24  ;;  %v583_v32 = vcombine.high %v301_v61, %v313_v24  ;;  %v551_v61 = vcombine.high %v13359_v7, %v289_v39  ;;  %v558_v14 = vrot.slane %v550_v54, %v13399_v19  ;;  %v329_v54 = vpop.permute.xlu0 %328 }
 0x415   :  { %v818_v33 = vcombine.low %v762_v26, %v778_v29  ;;  %v850_v34 = vcombine.low %v794_v27, %v810_v30  ;;  %v819_v45 = vcombine.high %v762_v26, %v778_v29  ;;  %v851_v47 = vcombine.high %v794_v27, %v810_v30 }
 0x416   :  { %v590_v42 = vrot.slane %v582_v31, %v13399_v19  ;;  %v597_v43 = vrot.slane %v583_v32, %v13399_v19  ;;  %v565_v16 = vrot.slane %v551_v61, %v13399_v19  ;;  %v889_v24 = vcombine.high %v13438_v37, %v13441_v38 }
 0x417   :  { %v283_v44 = vpop.permute.xlu1 %282  ;;  %v826_v46 = vrot.slane %v818_v33, %v13402_v25  ;;  %v858_v48 = vrot.slane %v850_v34, %v13402_v25  ;;  %v13460_v0 = vrot.slane %v819_v45, %v13402_v25  ;;  %v865_v1 = vrot.slane %v851_v47, %v13402_v25 }
 0x418   :  { %v646_v49 = vcombine.low %v590_v42, %v606_v40  ;;  %v647_v51 = vcombine.high %v590_v42, %v606_v40  ;;  %v662_v52 = vcombine.low %v597_v43, %v613_v41  ;;  %v663_v53 = vcombine.high %v597_v43, %v613_v41 }
 0x419   :  { %v882_v56 = vcombine.low %v826_v46, %v858_v48  ;;  %v883_v6 = vcombine.high %v826_v46, %v858_v48  ;;  %v884_v23 = vcombine.low %v13460_v0, %v865_v1  ;;  %v885_v43 = vcombine.high %v13460_v0, %v865_v1 }
 0x41a   :  { %v654_v57 = vrot.slane %v646_v49, %v13402_v25  ;;  %v661_v58 = vrot.slane %v647_v51, %v13402_v25  ;;  %v670_v59 = vrot.slane %v662_v52, %v13402_v25  ;;  %v677_v60 = vrot.slane %v663_v53, %v13402_v25 }
 0x41b   :  { %12283 = vmatmul.mubr.msk.f32.vlgmr.msra.gmra.mrb[0].mxu1 %vm1162_vm4, %v882_v56  ;;  %v295_v62 = vpop.permute.xlu1 %294 }
 0x41c   :  { %v11654_v2 = vcombine.low %v654_v57, %v661_v58  ;;  %v11656_v3 = vcombine.high %v654_v57, %v661_v58  ;;  %v11658_v4 = vcombine.low %v670_v59, %v677_v60  ;;  %v11660_v5 = vcombine.high %v670_v59, %v677_v60  ;;  %12286 = vmatpush3.xpose.msk.msra.mxu1 %vm1162_vm4, %v887_v55 }
 0x41d   :  { %v566_v8 = vcombine.low %v283_v44, %v295_v62  ;;  %v567_v9 = vcombine.high %v283_v44, %v295_v62  ;;  %12287 = vmatprep.mubr.msk.f32.mxu1 %vm13141_vm3, %v13140_v50  ;;  %12290 = vmatprep.subr.mxu1 %v13140_v50 }
 0x41e   :  { %v973_v10 = vrot.slane %v11654_v2, %v13399_v19  ;;  %v989_v11 = vrot.slane %v11656_v3, %v13399_v19  ;;  %v1005_v12 = vrot.slane %v11658_v4, %v13399_v19  ;;  %v1021_v13 = vrot.slane %v11660_v5, %v13399_v19 }
 0x41f   :  { %v574_v17 = vrot.slane %v566_v8, %v13399_v19  ;;  %v581_v18 = vrot.slane %v567_v9, %v13399_v19  ;;  %12288 = vmatmul.mubr.msk.f32.vlgmr.msra.gmra.mrb[2].mxu1 %vm1162_vm4, %v883_v6  ;;  %v323_v20 = vpop.permute.xlu1 %322 }
 0x420   :  { %v1038_v21 = vcombine.low %v973_v10, %v989_v11  ;;  %v1070_v22 = vcombine.low %v1005_v12, %v1021_v13  ;;  %12291 = vmatpush3.xpose.msk.msra.mxu1 %vm1162_vm4, %v888_v63  ;;  %12292 = vmatprep.mubr.msk.f32.mxu1 %vm13141_vm3, %v13140_v50  ;;  %v1039_v31 = vcombine.high %v973_v10, %v989_v11 }
 0x421   :  { %v614_v26 = vcombine.low %v558_v14, %v574_v17  ;;  %v615_v29 = vcombine.high %v558_v14, %v574_v17  ;;  %v630_v27 = vcombine.low %v565_v16, %v581_v18  ;;  %v631_v30 = vcombine.high %v565_v16, %v581_v18  ;;  %12295 = vmatprep.subr.mxu1 %v13140_v50 }
 0x422   :  { %v1071_v32 = vcombine.high %v1005_v12, %v1021_v13  ;;  %v1046_v33 = vrot.slane %v1038_v21, %v13402_v25  ;;  %v1078_v34 = vrot.slane %v1070_v22, %v13402_v25  ;;  %v1053_v52 = vrot.slane %v1039_v31, %v13402_v25 }
 0x423   :  { %v622_v39 = vrot.slane %v614_v26, %v13402_v25  ;;  %v629_v40 = vrot.slane %v615_v29, %v13402_v25  ;;  %v638_v37 = vrot.slane %v630_v27, %v13402_v25  ;;  %v645_v38 = vrot.slane %v631_v30, %v13402_v25  ;;  %12293 = vmatmul.mubr.msk.f32.vlgmr.msra.gmra.mrb[4].mxu1 %vm1162_vm4, %v884_v23  ;;  %v335_v41 = vpop.permute.xlu1 %334 }
 0x424   :  { %12296 = vmatpush3.xpose.msk.msra.mxu1 %vm1162_vm4, %v889_v24  ;;  %v482_v42 = vcombine.low %v323_v20, %v335_v41  ;;  %12297 = vmatprep.mubr.msk.f32.mxu1 %vm13141_vm3, %v13140_v50  ;;  %v1090_v44 = vcombine.low %v1046_v33, %v1078_v34  ;;  %v483_v49 = vcombine.high %v323_v20, %v335_v41 }
 0x425   :  { %v11653_v45 = vcombine.low %v622_v39, %v629_v40  ;;  %v11655_v46 = vcombine.high %v622_v39, %v629_v40  ;;  %v11657_v47 = vcombine.low %v638_v37, %v645_v38  ;;  %v11659_v48 = vcombine.high %v638_v37, %v645_v38  ;;  %12300 = vmatprep.subr.mxu1 %v13140_v50 }
 0x426   :  { %v1091_v51 = vcombine.high %v1046_v33, %v1078_v34  ;;  %v1085_v53 = vrot.slane %v1071_v32, %v13402_v25  ;;  %v490_v60 = vrot.slane %v482_v42, %v13399_v19  ;;  %v497_v3 = vrot.slane %v483_v49, %v13399_v19 }
 0x427   :  { %v966_v55 = vrot.slane %v11653_v45, %v13399_v19  ;;  %v982_v56 = vrot.slane %v11655_v46, %v13399_v19  ;;  %v998_v57 = vrot.slane %v11657_v47, %v13399_v19  ;;  %v1014_v58 = vrot.slane %v11659_v48, %v13399_v19  ;;  %12298 = vmatmul.mubr.msk.f32.vlgmr.msra.gmra.mrb[6].mxu1 %vm1162_vm4, %v885_v43  ;;  %v341_v59 = vpop.permute.xlu1 %340 }
 0x428   :  { %12301 = vmatpush3.xpose.msk.msra.mxu1 %vm1162_vm4, %v1090_v44  ;;  %12306 = vmatpush3.xpose.msk.msra.mxu0 %vm1162_vm4, %v1091_v51  ;;  %v498_v61 = vcombine.low %v329_v54, %v341_v59  ;;  %v499_v62 = vcombine.high %v329_v54, %v341_v59  ;;  %v1092_v9 = vcombine.low %v1053_v52, %v1085_v53 }
 0x429   :  { %v1022_v63 = vcombine.low %v966_v55, %v982_v56  ;;  %v1023_v0 = vcombine.high %v966_v55, %v982_v56  ;;  %v1054_v1 = vcombine.low %v998_v57, %v1014_v58  ;;  %v1055_v2 = vcombine.high %v998_v57, %v1014_v58  ;;  %12302 = vmatprep.mubr.msk.f32.mxu1 %vm13141_vm3, %v13140_v50 }
 0x42a   :  { %v506_v4 = vrot.slane %v498_v61, %v13399_v19  ;;  %v513_v5 = vrot.slane %v499_v62, %v13399_v19  ;;  %12310 = vmatprep.subr.mxu1 %v13140_v50  ;;  %12315 = vmatprep.subr.mxu0 %v13140_v50  ;;  %v1093_v24 = vcombine.high %v1053_v52, %v1085_v53  ;;  %v13155_v52 = vmov -1e+30  }
 0x42b   :  { %v1030_v6 = vrot.slane %v1022_v63, %v13402_v25  ;;  %v1062_v8 = vrot.slane %v1054_v1, %v13402_v25  ;;  %v1037_v17 = vrot.slane %v1023_v0, %v13402_v25  ;;  %v1069_v18 = vrot.slane %v1055_v2, %v13402_v25 }
 0x42c   :  { %v514_v10 = vcombine.low %v490_v60, %v506_v4  ;;  %v515_v11 = vcombine.high %v490_v60, %v506_v4  ;;  %v530_v12 = vcombine.low %v497_v3, %v513_v5  ;;  %v531_v13 = vcombine.high %v497_v3, %v513_v5 }
 0x42d   :  { %v1086_v14 = vcombine.low %v1030_v6, %v1062_v8  ;;  %v1087_v16 = vcombine.high %v1030_v6, %v1062_v8  ;;  %v1088_v31 = vcombine.low %v1037_v17, %v1069_v18  ;;  %v1089_v32 = vcombine.high %v1037_v17, %v1069_v18 }
 0x42e   :  { %v522_v20 = vrot.slane %v514_v10, %v13402_v25  ;;  %v529_v21 = vrot.slane %v515_v11, %v13402_v25  ;;  %v538_v22 = vrot.slane %v530_v12, %v13402_v25  ;;  %v545_v23 = vrot.slane %v531_v13, %v13402_v25 }
 0x42f   :  { %12303 = vmatmul.mubr.msk.f32.vlgmr.msra.gmra.mrb[8].mxu1 %vm1162_vm4, %v1086_v14  ;;  %12308 = vmatmul.mubr.msk.f32.vlgmr.msra.gmra.mrb[2].mxu0 %vm1162_vm4, %v1087_v16  ;;  %v13556_v53 = vsel %vm173_vm5, 0.0, %v13155_v52 }
 0x430   :  { %v890_v26 = vcombine.low %v522_v20, %v529_v21  ;;  %v11651_v29 = vcombine.high %v522_v20, %v529_v21  ;;  %v906_v27 = vcombine.low %v538_v22, %v545_v23  ;;  %v11652_v30 = vcombine.high %v538_v22, %v545_v23  ;;  %12311 = vmatpush3.xpose.msk.msra.mxu1 %vm1162_vm4, %v1092_v9 }
 0x431   :  { %12316 = vmatpush3.xpose.msk.msra.mxu0 %vm1162_vm4, %v1093_v24  ;;  %12312 = vmatprep.mubr.msk.f32.mxu1 %vm13141_vm3, %v13140_v50 }
 0x432   :  { %12317 = vmatprep.mubr.msk.f32.mxu0 %vm13141_vm3, %v13140_v50  ;;  %12320 = vmatprep.subr.mxu1 %v13140_v50  ;;  %v897_v33 = vrot.slane %v890_v26, %v13399_v19  ;;  %v905_v34 = vrot.slane %v11651_v29, %v13399_v19  ;;  %v913_v39 = vrot.slane %v906_v27, %v13399_v19 }
 0x433   :  { %12313 = vmatmul.mubr.msk.f32.vlgmr.msra.gmra.mrb[10].mxu1 %vm1162_vm4, %v1088_v31  ;;  %12325 = vmatprep.subr.mxu0 %v13140_v50  ;;  %v921_v40 = vrot.slane %v11652_v30, %v13399_v19 }
 0x434   :  { %12318 = vmatmul.mubr.msk.f32.vlgmr.msra.gmra.mrb[8].mxu0 %vm1162_vm4, %v1089_v32  ;;  %v922_v37 = vcombine.low %v897_v33, %v905_v34  ;;  %12322 = vmatprep.mubr.msk.f32.mxu1 %vm13141_vm3, %v13140_v50  ;;  %v923_v38 = vcombine.high %v897_v33, %v905_v34 }
 0x435   :  { %v938_v41 = vcombine.low %v913_v39, %v921_v40  ;;  %v939_v42 = vcombine.high %v913_v39, %v921_v40  ;;  %12327 = vmatprep.mubr.msk.f32.mxu0 %vm13141_vm3, %v13140_v50 }
 0x436   :  { %v930_v43 = vrot.slane %v922_v37, %v13402_v25  ;;  %v13542_v44 = vrot.slane %v923_v38, %v13402_v25 }
 0x437   :  { %v946_v45 = vrot.slane %v938_v41, %v13402_v25  ;;  %v13546_v46 = vrot.slane %v939_v42, %v13402_v25 }
 0x439   :  { %v954_v47 = vcombine.low %v930_v43, %v946_v45  ;;  %v955_v48 = vcombine.high %v930_v43, %v946_v45  ;;  %v956_v49 = vcombine.low %v13542_v44, %v13546_v46  ;;  %v957_v51 = vcombine.high %v13542_v44, %v13546_v46 }
 0x43b   :  { %12321 = vmatpush3.msra.mxu1 %v954_v47  ;;  %12326 = vmatpush3.msra.mxu0 %v955_v48  ;;  %v325_v48 = vpop.permute.xlu1 %324 }
 0x43c   :  { %12330 = vmatprep.subr.mxu1 %v13140_v50  ;;  %12335 = vmatprep.subr.mxu0 %v13140_v50 }
 0x4ee   :  { %v1235_v54 = vpop.f32.mrb[0].mxu1 }
 0x4ef   :  { %v1236_v55 = vadd.f32 %v1235_v54, %v13556_v53  ;;  %v12284_v56 = vpop.f32.mrb[1].mxu1 }
 0x4f1   :  { %v1771_v57 = vmul.f32 1.442695, %v1236_v55 }
 0x4f2   :  { %v1311_v58 = vpop.f32.mrb[2].mxu1 }
 0x4f3   :  { %12954 = vpow2.f32 %v1771_v57  ;;  %v12289_v59 = vpop.f32.mrb[3].mxu1  ;;  %v1312_v28 = vadd.f32 %v1311_v58, %v13556_v53 }
 0x4f5   :  { %v1773_v8 = vmul.f32 1.442695, %v1312_v28 }
 0x4f6   :  { %v1387_v60 = vpop.f32.mrb[4].mxu1 }
 0x4f7   :  { %v12294_v61 = vpop.f32.mrb[5].mxu1  ;;  %v1388_v9 = vadd.f32 %v1387_v60, %v13556_v53 }
 0x4f9   :  { %v1775_v16 = vmul.f32 1.442695, %v1388_v9 }
 0x4fa   :  { %v1463_v62 = vpop.f32.mrb[6].mxu1 }
 0x4fb   :  { %v12299_v63 = vpop.f32.mrb[7].mxu1  ;;  %v1464_v17 = vadd.f32 %v1463_v62, %v13556_v53 }
 0x4fd   :  { %v12955_v0 = vpop.eup %12954  ;;  %v1777_v20 = vmul.f32 1.442695, %v1464_v17 }
 0x4fe   :  { %v1787_v1 = vsel %vm1162_vm4, %v12955_v0, 0.0 }
 0x4ff   :  { %1788 = vadd.xlane.f32.xlu0 %v1787_v1 }
 0x502   :  { %v1539_v15 = vpop.f32.mrb[8].mxu1  ;;  %v1615_v2 = vpop.f32.mrb[2].mxu0 }
 0x503   :  { %v1616_v3 = vadd.f32 %v1615_v2, %v13556_v53  ;;  %v12304_v4 = vpop.f32.mrb[9].mxu1  ;;  %v12309_v5 = vpop.f32.mrb[3].mxu0  ;;  %v1540_v21 = vadd.f32 %v1539_v15, %v13556_v53 }
 0x505   :  { %v1781_v6 = vmul.f32 1.442695, %v1616_v3  ;;  %v1779_v23 = vmul.f32 1.442695, %v1540_v21 }
 0x506   :  { %v1691_v10 = vpop.f32.mrb[10].mxu1 }
 0x507   :  { %v1767_v11 = vpop.f32.mrb[8].mxu0  ;;  %v12314_v12 = vpop.f32.mrb[11].mxu1  ;;  %12956 = vpow2.f32 %v1781_v6  ;;  %v1692_v24 = vadd.f32 %v1691_v10, %v13556_v53 }
 0x508   :  { %v1768_v13 = vadd.f32 %v1767_v11, %v13556_v53  ;;  %v12319_v14 = vpop.f32.mrb[9].mxu0  ;;  %12958 = vpow2.f32 %v1773_v8 }
 0x509   :  { %v1783_v30 = vmul.f32 1.442695, %v1692_v24 }
 0x50a   :  { %v1785_v18 = vmul.f32 1.442695, %v1768_v13 }
 0x50c   :  { %12960 = vpow2.f32 %v1785_v18 }
 0x50d   :  { %12962 = vpow2.f32 %v1775_v16 }
 0x50e   :  { %12964 = vpow2.f32 %v1777_v20 }
 0x50f   :  { %12966 = vpow2.f32 %v1779_v23 }
 0x510   :  { %12968 = vpow2.f32 %v1783_v30 }
 0x511   :  { %v13566_v22 = vpop.eup %12956 }
 0x512   :  { %v1802_v26 = vsel %vm1162_vm4, %v13566_v22, 0.0  ;;  %v12959_v29 = vpop.eup %12958 }
 0x513   :  { %1803 = vadd.xlane.f32.xlu1 %v1802_v26  ;;  %v1790_v31 = vsel %vm1162_vm4, %v12959_v29, 0.0 }
 0x516   :  { %v13571_v27 = vpop.eup %12960 }
 0x517   :  { %v1808_v32 = vsel %vm1162_vm4, %v13571_v27, 0.0  ;;  %v12963_v33 = vpop.eup %12962  ;;  %1791 = vadd.xlane.f32.xlu1 %v1790_v31 }
 0x518   :  { %1809 = vadd.xlane.f32.xlu0 %v1808_v32  ;;  %v1793_v34 = vsel %vm1162_vm4, %v12963_v33, 0.0  ;;  %v12965_v39 = vpop.eup %12964 }
 0x519   :  { %v1796_v40 = vsel %vm1162_vm4, %v12965_v39, 0.0  ;;  %v13578_v37 = vpop.eup %12966 }
 0x51a   :  { %v1799_v38 = vsel %vm1162_vm4, %v13578_v37, 0.0  ;;  %v13582_v41 = vpop.eup %12968 }
 0x51b   :  { %v1805_v42 = vsel %vm1162_vm4, %v13582_v41, 0.0 }
 0x51c   :  { %1794 = vadd.xlane.f32.xlu0 %v1793_v34 }
 0x520   :  { %1797 = vadd.xlane.f32.xlu0 %v1796_v40 }
 0x524   :  { %1800 = vadd.xlane.f32.xlu0 %v1799_v38 }
 0x528   :  { %1806 = vadd.xlane.f32.xlu0 %v1805_v42  ;;  %336 = vrot.lane.b32.xlu1 %v13359_v7, %s15268_s2  ;;  %s15305_s2 = smov 64  }
 0x52c   :  { %342 = vrot.lane.b32.xlu1 %v13359_v7, %s15266_s23  ;;  %s15315_s23 = smov 72  }
 0x53e   :  { %330 = vrot.lane.b32.xlu0 %v13359_v7, %s15272_s20 }
 0x58c   :  { %v1789_v43 = vpop.xlane.xlu0 %1788 }
 0x58d   :  { %12970 = vrcp.f32 %v1789_v43 }
 0x597   :  { %v12971_v45 = vpop.eup %12970 }
 0x598   :  { %v1819_v47 = vmul.f32 %v12971_v45, %v12955_v0 }
 0x59a   :  { %12323 = vmatmul.mubr.msk.f32.vlgmr.msra.gmra.mrb[12].mxu1 %vm1162_vm4, %v1819_v47 }
 0x59b   :  { %12331 = vmatpush3.msra.mxu1 %v956_v49  ;;  %12332 = vmatprep.mubr.msk.f32.mxu1 %vm13141_vm3, %v13140_v50 }
 0x59c   :  { %12340 = vmatprep.subr.mxu1 %v13140_v50 }
 0x5a0   :  { %v1804_v52 = vpop.xlane.xlu1 %1803 }
 0x5a4   :  { %v1792_v54 = vpop.xlane.xlu1 %1791 }
 0x5a5   :  { %v1810_v55 = vpop.xlane.xlu0 %1809  ;;  %12972 = vrcp.f32 %v1792_v54 }
 0x5a8   :  { %v337_v60 = vpop.permute.xlu1 %336 }
 0x5a9   :  { %v1795_v7 = vpop.xlane.xlu0 %1794  ;;  %v686_v0 = vcombine.low %v325_v48, %v337_v60  ;;  %v687_v1 = vcombine.high %v325_v48, %v337_v60 }
 0x5aa   :  { %12974 = vrcp.f32 %v1795_v7 }
 0x5ab   :  { %v701_v3 = vrot.slane %v687_v1, %v13399_v19 }
 0x5ac   :  { %v343_v28 = vpop.permute.xlu1 %342 }
 0x5ad   :  { %v1798_v56 = vpop.xlane.xlu0 %1797 }
 0x5ae   :  { %12976 = vrcp.f32 %v1798_v56 }
 0x5af   :  { %v12973_v57 = vpop.eup %12972  ;;  %12978 = vrcp.f32 %v1804_v52 }
 0x5b0   :  { %v1820_v59 = vmul.f32 %v12973_v57, %v12959_v29 }
 0x5b1   :  { %v1801_v58 = vpop.xlane.xlu0 %1800 }
 0x5b2   :  { %12328 = vmatmul.mubr.msk.f32.vlgmr.msra.gmra.mrb[10].mxu0 %vm1162_vm4, %v1820_v59  ;;  %12980 = vrcp.f32 %v1801_v58 }
 0x5b3   :  { %12336 = vmatpush3.msra.mxu0 %v957_v51  ;;  %12337 = vmatprep.mubr.msk.f32.mxu0 %vm13141_vm3, %v13140_v50  ;;  %v694_v51 = vrot.slane %v686_v0, %v13399_v19  ;;  %12982 = vrcp.f32 %v1810_v55 }
 0x5b4   :  { %v12975_v49 = vpop.eup %12974  ;;  %12345 = vmatprep.subr.mxu0 %v13140_v50 }
 0x5b5   :  { %v1807_v61 = vpop.xlane.xlu0 %1806  ;;  %v1821_v62 = vmul.f32 %v12975_v49, %v12963_v33 }
 0x5b6   :  { %12984 = vrcp.f32 %v1807_v61 }
 0x5b7   :  { %12333 = vmatmul.mubr.msk.f32.vlgmr.msra.gmra.mrb[14].mxu1 %vm1162_vm4, %v1821_v62 }
 0x5b8   :  { %v12977_v63 = vpop.eup %12976  ;;  %12342 = vmatprep.mubr.msk.f32.mxu1 %vm13141_vm3, %v13140_v50 }
 0x5b9   :  { %v331_v15 = vpop.permute.xlu0 %330  ;;  %v1822_v2 = vmul.f32 %v12977_v63, %v12965_v39  ;;  %v12979_v29 = vpop.eup %12978 }
 0x5ba   :  { %v702_v44 = vcombine.low %v331_v15, %v343_v28  ;;  %v703_v46 = vcombine.high %v331_v15, %v343_v28  ;;  %v1824_v54 = vmul.f32 %v12979_v29, %v13566_v22 }
 0x5bb   :  { %12338 = vmatmul.mubr.msk.f32.vlgmr.msra.gmra.mrb[12].mxu0 %vm1162_vm4, %v1822_v2 }
 0x5bc   :  { %v710_v4 = vrot.slane %v702_v44, %v13399_v19  ;;  %v717_v5 = vrot.slane %v703_v46, %v13399_v19  ;;  %12347 = vmatprep.mubr.msk.f32.mxu0 %vm13141_vm3, %v13140_v50  ;;  %v12981_v34 = vpop.eup %12980 }
 0x5bd   :  { %v12983_v38 = vpop.eup %12982  ;;  %v1823_v52 = vmul.f32 %v12981_v34, %v13578_v37 }
 0x5be   :  { %v718_v6 = vcombine.low %v694_v51, %v710_v4  ;;  %v719_v8 = vcombine.high %v694_v51, %v710_v4  ;;  %v734_v9 = vcombine.low %v701_v3, %v717_v5  ;;  %v735_v10 = vcombine.high %v701_v3, %v717_v5 }
 0x5bf   :  { %v1826_v37 = vmul.f32 %v12983_v38, %v13571_v27 }
 0x5c0   :  { %v726_v11 = vrot.slane %v718_v6, %v13402_v25  ;;  %v733_v12 = vrot.slane %v719_v8, %v13402_v25  ;;  %v742_v13 = vrot.slane %v734_v9, %v13402_v25  ;;  %v749_v14 = vrot.slane %v735_v10, %v13402_v25  ;;  %v12985_v48 = vpop.eup %12984 }
 0x5c1   :  { %v1825_v56 = vmul.f32 %v12985_v48, %v13582_v41 }
 0x5c2   :  { %v1094_v16 = vcombine.low %v726_v11, %v733_v12  ;;  %v11661_v17 = vcombine.high %v726_v11, %v733_v12  ;;  %v1110_v18 = vcombine.low %v742_v13, %v749_v14  ;;  %v11662_v20 = vcombine.high %v742_v13, %v749_v14 }
 0x5c4   :  { %v1101_v21 = vrot.slane %v1094_v16, %v13399_v19  ;;  %v1109_v23 = vrot.slane %v11661_v17, %v13399_v19  ;;  %v1117_v24 = vrot.slane %v1110_v18, %v13399_v19  ;;  %v1125_v26 = vrot.slane %v11662_v20, %v13399_v19 }
 0x5c6   :  { %v1126_v30 = vcombine.low %v1101_v21, %v1109_v23  ;;  %v1142_v31 = vcombine.low %v1117_v24, %v1125_v26  ;;  %v1127_v32 = vcombine.high %v1101_v21, %v1109_v23  ;;  %v1143_v33 = vcombine.high %v1117_v24, %v1125_v26 }
 0x5c8   :  { %v1134_v39 = vrot.slane %v1126_v30, %v13402_v25  ;;  %v1150_v40 = vrot.slane %v1142_v31, %v13402_v25  ;;  %v1141_v42 = vrot.slane %v1127_v32, %v13402_v25  ;;  %v1157_v43 = vrot.slane %v1143_v33, %v13402_v25 }
 0x5ca   :  { %v1158_v45 = vcombine.low %v1134_v39, %v1150_v40  ;;  %v1159_v47 = vcombine.high %v1134_v39, %v1150_v40  ;;  %v1160_v55 = vcombine.low %v1141_v42, %v1157_v43  ;;  %v1161_v7 = vcombine.high %v1141_v42, %v1157_v43 }
 0x5cc   :  { %12341 = vmatpush3.msra.mxu1 %v1158_v45  ;;  %12346 = vmatpush3.msra.mxu0 %v1159_v47 }
 0x5cd   :  { %12343 = vmatmul.mubr.msk.f32.vlgmr.msra.gmra.mrb[16].mxu1 %vm1162_vm4, %v1823_v52  ;;  %12348 = vmatmul.mubr.msk.f32.vlgmr.msra.gmra.mrb[14].mxu0 %vm1162_vm4, %v1824_v54 }
 0x5ce   :  { %12350 = vmatprep.subr.mxu1 %v13140_v50  ;;  %12355 = vmatprep.subr.mxu0 %v13140_v50 }
 0x5cf   :  { %12351 = vmatpush3.msra.mxu1 %v1160_v55  ;;  %12356 = vmatpush3.msra.mxu0 %v1161_v7 }
 0x5d0   :  { %12352 = vmatprep.mubr.msk.f32.mxu1 %vm13141_vm3, %v13140_v50  ;;  %12357 = vmatprep.mubr.msk.f32.mxu0 %vm13141_vm3, %v13140_v50 }
 0x5d1   :  { %12353 = vmatmul.mubr.msk.f32.vlgmr.msra.gmra.mrb[18].mxu1 %vm1162_vm4, %v1825_v56  ;;  %12358 = vmatmul.mubr.msk.f32.vlgmr.msra.gmra.mrb[16].mxu0 %vm1162_vm4, %v1826_v37 }
 0x5d2   :  { %12360 = vmatprep.subr.bf16.mxu1 %v13140_v50  ;;  %12364 = vmatprep.mubr.msk.bf16.mxu1 %vm13141_vm3, %v13140_v50 }
 0x5d3   :  { %12368 = vmatprep.subr.bf16.mxu0 %v13140_v50  ;;  %12372 = vmatprep.mubr.msk.bf16.mxu0 %vm13141_vm3, %v13140_v50 }
 0x66d   :  { %v1896_v22 = vpop.f32.mrb[12].mxu1 }
 0x66e   :  { %v12324_v27 = vpop.f32.mrb[13].mxu1 }
 0x685   :  { %v1969_v41 = vpop.f32.mrb[10].mxu0 }
 0x686   :  { %v12329_v57 = vpop.f32.mrb[11].mxu0 }
 0x68a   :  { %v2042_v58 = vpop.f32.mrb[14].mxu1 }
 0x68b   :  { %v2411_v59 = vcombine.low %v1896_v22, %v2042_v58  ;;  %v2412_v60 = vcombine.high %v1896_v22, %v2042_v58  ;;  %v12334_v49 = vpop.f32.mrb[15].mxu1 }
 0x68d   :  { %v2419_v1 = vrot.slane %v2411_v59, %v13399_v19  ;;  %v2426_v28 = vrot.slane %v2412_v60, %v13399_v19 }
 0x68e   :  { %v2115_v61 = vpop.f32.mrb[12].mxu0 }
 0x68f   :  { %v2427_v62 = vcombine.low %v1969_v41, %v2115_v61  ;;  %v2428_v63 = vcombine.high %v1969_v41, %v2115_v61  ;;  %v12339_v0 = vpop.f32.mrb[13].mxu0 }
 0x691   :  { %v2435_v15 = vrot.slane %v2427_v62, %v13399_v19  ;;  %v2442_v2 = vrot.slane %v2428_v63, %v13399_v19 }
 0x693   :  { %v2443_v44 = vcombine.low %v2419_v1, %v2435_v15  ;;  %v2444_v46 = vcombine.high %v2419_v1, %v2435_v15  ;;  %v2459_v51 = vcombine.low %v2426_v28, %v2442_v2  ;;  %v2460_v3 = vcombine.high %v2426_v28, %v2442_v2  ;;  %v12894_v15 = vld [vmem:[%s15242_s4] sm:$0xff]  }
 0x694   :  { %12361 = vmatpush3.bf16.msra.mxu1 %v12894_v15  ;;  %v12898_v15 = vld [vmem:[%s15250_s12] sm:$0xff]  }
 0x695   :  { %v2451_v4 = vrot.slane %v2443_v44, %v13402_v25  ;;  %v2458_v5 = vrot.slane %v2444_v46, %v13402_v25  ;;  %v2467_v6 = vrot.slane %v2459_v51, %v13402_v25  ;;  %v2474_v8 = vrot.slane %v2460_v3, %v13402_v25  ;;  %12362 = vmatprep.subr.bf16.mxu1 %v13140_v50 }
 0x697   :  { %v2547_v9 = vcombine.low %v2451_v4, %v2458_v5  ;;  %v11687_v10 = vcombine.high %v2451_v4, %v2458_v5  ;;  %v2563_v11 = vcombine.low %v2467_v6, %v2474_v8  ;;  %v11688_v12 = vcombine.high %v2467_v6, %v2474_v8  ;;  %v12895_v8 = vld [vmem:[%s15242_s4 + $0x8] sm:$0xff]  }
 0x698   :  { %12363 = vmatpush3.bf16.msra.mxu1 %v12895_v8 }
 0x699   :  { %v2554_v13 = vrot.slane %v2547_v9, %v13399_v19  ;;  %v2562_v14 = vrot.slane %v11687_v10, %v13399_v19  ;;  %v2570_v16 = vrot.slane %v2563_v11, %v13399_v19  ;;  %v2578_v17 = vrot.slane %v11688_v12, %v13399_v19  ;;  %12376 = vmatprep.subr.bf16.mxu1 %v13140_v50 }
 0x69b   :  { %v2580_v18 = vcombine.high %v2554_v13, %v2562_v14  ;;  %v2596_v20 = vcombine.high %v2570_v16, %v2578_v17  ;;  %v2579_v21 = vcombine.low %v2554_v13, %v2562_v14  ;;  %v2595_v23 = vcombine.low %v2570_v16, %v2578_v17 }
 0x69d   :  { %v2594_v24 = vrot.slane %v2580_v18, %v13402_v25  ;;  %v2610_v26 = vrot.slane %v2596_v20, %v13402_v25  ;;  %v13663_v29 = vrot.slane %v2579_v21, %v13402_v25  ;;  %v13666_v30 = vrot.slane %v2595_v23, %v13402_v25 }
 0x69f   :  { %v2613_v31 = vcombine.low %v2594_v24, %v2610_v26  ;;  %v2611_v32 = vcombine.low %v13663_v29, %v13666_v30  ;;  %v2612_v33 = vcombine.high %v13663_v29, %v13666_v30  ;;  %v2614_v34 = vcombine.high %v2594_v24, %v2610_v26  ;;  %v11694_v30 = vld [vmem:[%s15243_s5] ss:$0 sm:$0xff] }
 0x6a0   :  { %v2188_v39 = vpop.f32.mrb[16].mxu1  ;;  %v2261_v40 = vpop.f32.mrb[14].mxu0 }
 0x6a1   :  { %v12344_v38 = vpop.f32.mrb[17].mxu1  ;;  %v12349_v42 = vpop.f32.mrb[15].mxu0 }
 0x6a4   :  { %v2334_v43 = vpop.f32.mrb[18].mxu1  ;;  %v2407_v45 = vpop.f32.mrb[16].mxu0 }
 0x6a5   :  { %v2479_v47 = vcombine.low %v2188_v39, %v2334_v43  ;;  %v2480_v48 = vcombine.high %v2188_v39, %v2334_v43  ;;  %v2495_v52 = vcombine.low %v2261_v40, %v2407_v45  ;;  %v2496_v54 = vcombine.high %v2261_v40, %v2407_v45  ;;  %v12354_v55 = vpop.f32.mrb[19].mxu1  ;;  %v12359_v7 = vpop.f32.mrb[17].mxu0 }
 0x6a7   :  { %v2487_v56 = vrot.slane %v2479_v47, %v13399_v19  ;;  %v2494_v37 = vrot.slane %v2480_v48, %v13399_v19  ;;  %v2503_v22 = vrot.slane %v2495_v52, %v13399_v19  ;;  %v2510_v27 = vrot.slane %v2496_v54, %v13399_v19 }
 0x6a9   :  { %v2511_v41 = vcombine.low %v2487_v56, %v2503_v22  ;;  %v2512_v57 = vcombine.high %v2487_v56, %v2503_v22  ;;  %v2527_v58 = vcombine.low %v2494_v37, %v2510_v27  ;;  %v2528_v59 = vcombine.high %v2494_v37, %v2510_v27 }
 0x6ab   :  { %v2519_v60 = vrot.slane %v2511_v41, %v13402_v25  ;;  %v2526_v49 = vrot.slane %v2512_v57, %v13402_v25  ;;  %v2535_v61 = vrot.slane %v2527_v58, %v13402_v25  ;;  %v2542_v62 = vrot.slane %v2528_v59, %v13402_v25 }
 0x6ad   :  { %v2615_v63 = vcombine.low %v2519_v60, %v2526_v49  ;;  %v11689_v0 = vcombine.high %v2519_v60, %v2526_v49  ;;  %v2631_v1 = vcombine.low %v2535_v61, %v2542_v62  ;;  %v11690_v28 = vcombine.high %v2535_v61, %v2542_v62 }
 0x6af   :  { %v2622_v2 = vrot.slane %v2615_v63, %v13399_v19  ;;  %v2630_v44 = vrot.slane %v11689_v0, %v13399_v19  ;;  %v2638_v46 = vrot.slane %v2631_v1, %v13399_v19  ;;  %v2646_v51 = vrot.slane %v11690_v28, %v13399_v19  ;;  %v12896_v1 = vld [vmem:[%s15248_s10] sm:$0xff]   ;;  %v12897_v28 = vld [vmem:[%s15248_s10 + $0x8] sm:$0xff]  }
 0x6b0   :  { %12369 = vmatpush3.bf16.msra.mxu0 %v12896_v1 }
 0x6b1   :  { %v2648_v3 = vcombine.high %v2622_v2, %v2630_v44  ;;  %v2664_v4 = vcombine.high %v2638_v46, %v2646_v51  ;;  %v2647_v5 = vcombine.low %v2622_v2, %v2630_v44  ;;  %v2663_v6 = vcombine.low %v2638_v46, %v2646_v51  ;;  %12370 = vmatprep.subr.bf16.mxu0 %v13140_v50  ;;  %v12899_v2 = vld [vmem:[%s15250_s12 + $0x8] sm:$0xff]   ;;  %v12900_v44 = vld [vmem:[%s15250_s12 + $0x10] sm:$0xff]   ;;  %v12901_v46 = vld [vmem:[%s15250_s12 + $0x18] sm:$0xff]  }
 0x6b2   :  { %v12902_v51 = vld [vmem:[%s15250_s12 + $0x20] sm:$0xff]  }
 0x6b3   :  { %v2662_v9 = vrot.slane %v2648_v3, %v13402_v25  ;;  %v2678_v10 = vrot.slane %v2664_v4, %v13402_v25  ;;  %v2655_v11 = vrot.slane %v2647_v5, %v13402_v25  ;;  %v2671_v12 = vrot.slane %v2663_v6, %v13402_v25  ;;  %v12903_v3 = vld [vmem:[%s15250_s12 + $0x28] sm:$0xff]  }
 0x6b4   :  { %12371 = vmatpush3.bf16.msra.mxu0 %v12897_v28 }
 0x6b5   :  { %v2681_v13 = vcombine.low %v2662_v9, %v2678_v10  ;;  %v2680_v14 = vcombine.high %v2655_v11, %v2671_v12  ;;  %v2679_v16 = vcombine.low %v2655_v11, %v2671_v12  ;;  %v2682_v17 = vcombine.high %v2662_v9, %v2678_v10  ;;  %12396 = vmatprep.subr.bf16.mxu0 %v13140_v50  ;;  %v11695_v12 = vld [vmem:[%s15246_s8] ss:$0 sm:$0xff] }
 0x6b7   :  { %v12837_v18 = vpack.i.bf16 %v2681_v13, %v2613_v31  ;;  %v12832_v20 = vpack.i.bf16 %v2680_v14, %v2612_v33  ;;  %v12842_v21 = vpack.i.bf16 %v2682_v17, %v2614_v34 }
 0x6b9   :  { %12838 = vrot.lane.b32.xlu1 %v12837_v18, %s15264_s28  ;;  %12833 = vrot.lane.b32.xlu0 %v12832_v20, %s15262_s24  ;;  %v11696_v18 = vld [vmem:[%s15247_s9] ss:$0 sm:$0xff]  ;;  %s15304_s28 = sld [smem:[#allocation9_spill]]  ;;  %s15308_s24 = smov 16  }
 0x6bd   :  { %12843 = vrot.lane.b32.xlu0 %v12842_v21, %s15260_s25  ;;  %s15309_s25 = smov 8  }
 0x72b   :  { %v12839_v23 = vpop.permute.xlu1 %12838  ;;  %v12834_v24 = vpop.permute.xlu0 %12833 }
 0x72c   :  { %v12836_v26 = vunpack.i.h.bf16 %v12834_v24  ;;  %v12835_v39 = vunpack.i.l.bf16 %v12834_v24  ;;  %v12841_v40 = vunpack.i.h.bf16 %v12839_v23  ;;  %v12840_v38 = vunpack.i.l.bf16 %v12839_v23 }
 0x72e   :  { %v2707_v31 = vsel %vm1162_vm4, %v2611_v32, %v12835_v39  ;;  %v2708_v33 = vsel %vm1162_vm4, %v2679_v16, %v12836_v26  ;;  %v12904_v26 = vld [vmem:[%s15250_s12 + $0x30] sm:$0xff]   ;;  %v12905_v39 = vld [vmem:[%s15250_s12 + $0x38] sm:$0xff]  }
 0x72f   :  { %v12844_v34 = vpop.permute.xlu0 %12843  ;;  %v2710_v45 = vsel %vm2709_vm6, %v2707_v31, %v12840_v38  ;;  %v2711_v47 = vsel %vm2709_vm6, %v2708_v33, %v12841_v40  ;;  %v11697_v40 = vld [vmem:[%s15249_s11] ss:$0 sm:$0xff] }
 0x730   :  { %v12846_v42 = vunpack.i.h.bf16 %v12844_v34  ;;  %v12845_v43 = vunpack.i.l.bf16 %v12844_v34 }
 0x732   :  { %v2713_v48 = vsel %vm2712_vm7, %v2710_v45, %v12845_v43  ;;  %v2714_v52 = vsel %vm2712_vm7, %v2711_v47, %v12846_v42 }
 0x733   :  { %v2715_v54 = vpack.c.bf16 %v2714_v52, %v2713_v48 }
 0x735   :  { %12365 = vmatmul.mubr.msk.bf16.vlgmr.msra.gmra.mrb[20].mxu1 %vm177_vm2, %v2715_v54  ;;  %v11709_v54 = vld [vmem:[%s15304_s28] ss:$0 sm:$0xff] }
 0x736   :  { %12392 = vmatprep.mubr.msk.bf16.mxu1 %vm13141_vm3, %v13140_v50  ;;  %12377 = vmatpush3.bf16.msra.mxu1 %v12898_v15 }
 0x737   :  { %12378 = vmatprep.subr.bf16.mxu1 %v13140_v50 }
 0x73a   :  { %12379 = vmatpush3.bf16.msra.mxu1 %v12899_v2 }
 0x73b   :  { %12380 = vmatprep.subr.bf16.mxu1 %v13140_v50 }
 0x73e   :  { %12381 = vmatpush3.bf16.msra.mxu1 %v12900_v44 }
 0x73f   :  { %12382 = vmatprep.subr.bf16.mxu1 %v13140_v50 }
 0x742   :  { %12383 = vmatpush3.bf16.msra.mxu1 %v12901_v46 }
 0x743   :  { %12384 = vmatprep.subr.bf16.mxu1 %v13140_v50 }
 0x746   :  { %12385 = vmatpush3.bf16.msra.mxu1 %v12902_v51 }
 0x747   :  { %12386 = vmatprep.subr.bf16.mxu1 %v13140_v50 }
 0x74a   :  { %12387 = vmatpush3.bf16.msra.mxu1 %v12903_v3  ;;  %v11710_v3 = vld [vmem:[%s15244_s6 + $0x1] ss:$0 sm:$0xff] }
 0x74b   :  { %12388 = vmatprep.subr.bf16.mxu1 %v13140_v50 }
 0x74e   :  { %12389 = vmatpush3.bf16.msra.mxu1 %v12904_v26 }
 0x74f   :  { %12390 = vmatprep.subr.bf16.mxu1 %v13140_v50 }
 0x752   :  { %12391 = vmatpush3.bf16.msra.mxu1 %v12905_v39 }
 0x753   :  { %12434 = vmatprep.subr.mxu1 %v13140_v50 }
 0x808   :  { %v2769_v29 = vpop.f32.mrb[20].mxu1 }
 0x809   :  { %v2776_v32 = vadd.f32 %v2769_v29, %v13318_v35  ;;  %v12366_v55 = vpop.f32.mrb[21].mxu1 }
 0x80a   :  { %v2772_v7 = vpop.f32.mrb[22].mxu1 }
 0x80b   :  { %v13715_v56 = vadd.f32 %v11694_v30, %v2776_v32  ;;  %v2777_v37 = vadd.f32 %v2772_v7, %v13320_v36  ;;  %v12367_v22 = vpop.f32.mrb[23].mxu1 }
 0x80d   :  { %v13718_v27 = vadd.f32 %v11694_v30, %v2777_v37  ;;  %v2787_v41 = vsel %vm177_vm2, %v13715_v56, 0.0 }
 0x80e   :  { %2788 = vadd.xlane.f32.xlu1 %v2787_v41 }
 0x80f   :  { %v2790_v57 = vsel %vm177_vm2, %v13718_v27, 0.0 }
 0x810   :  { %2791 = vadd.xlane.f32.xlu0 %v2790_v57 }
 0x89b   :  { %v2789_v58 = vpop.xlane.xlu1 %2788 }
 0x89c   :  { %v2793_v59 = vmul.f32 0.03125, %v2789_v58 }
 0x89d   :  { %v2792_v35 = vpop.xlane.xlu0 %2791 }
 0x89e   :  { %v2795_v60 = vsub.f32 %v13715_v56, %v2793_v59  ;;  %v2794_v49 = vmul.f32 0.03125, %v2792_v35 }
 0x8a0   :  { %v2796_v61 = vsub.f32 %v13718_v27, %v2794_v49  ;;  %v2797_v36 = vmul.f32 %v2795_v60, %v2795_v60 }
 0x8a2   :  { %v2799_v62 = vsel %vm177_vm2, %v2797_v36, 0.0  ;;  %v2798_v63 = vmul.f32 %v2796_v61, %v2796_v61 }
 0x8a3   :  { %2800 = vadd.xlane.f32.xlu0 %v2799_v62 }
 0x8a4   :  { %v2802_v0 = vsel %vm177_vm2, %v2798_v63, 0.0  ;;  %v12906_v63 = vld [vmem:[%s15241_s3 + $0x10] sm:$0xff]  }
 0x8a5   :  { %2803 = vadd.xlane.f32.xlu1 %v2802_v0  ;;  %v12907_v0 = vld [vmem:[%s15241_s3 + $0x18] sm:$0xff]  }
 0x930   :  { %v2801_v4 = vpop.xlane.xlu0 %2800 }
 0x931   :  { %v2805_v5 = vmul.f32 0.03125, %v2801_v4 }
 0x932   :  { %v2804_v6 = vpop.xlane.xlu1 %2803 }
 0x933   :  { %v2807_v8 = vadd.f32 1e-05, %v2805_v5  ;;  %v2806_v9 = vmul.f32 0.03125, %v2804_v6 }
 0x935   :  { %12986 = vrsqrt.f32 %v2807_v8  ;;  %v2808_v10 = vadd.f32 1e-05, %v2806_v9  ;;  %v11711_v9 = vld [vmem:[%s15245_s7 + $0x1] ss:$0 sm:$0xff] }
 0x937   :  { %12988 = vrsqrt.f32 %v2808_v10 }
 0x93f   :  { %v12987_v11 = vpop.eup %12986 }
 0x940   :  { %v2811_v13 = vmul.f32 %v12987_v11, %v2795_v60 }
 0x941   :  { %v12989_v14 = vpop.eup %12988 }
 0x942   :  { %v2817_v16 = vmul.f32 %v11695_v12, %v2811_v13  ;;  %v2812_v17 = vmul.f32 %v12989_v14, %v2796_v61 }
 0x944   :  { %v2818_v20 = vmul.f32 %v11695_v12, %v2812_v17  ;;  %v2823_v21 = vadd.f32 %v11696_v18, %v2817_v16 }
 0x946   :  { %v2824_v23 = vadd.f32 %v11696_v18, %v2818_v20 }
 0x948   :  { %v2825_v24 = vpack.c.bf16 %v2824_v23, %v2823_v21 }
 0x94a   :  { %12373 = vmatmul.mubr.msk.bf16.vlgmr.msra.gmra.mrb[20].mxu0 %vm177_vm2, %v2825_v24 }
 0x94b   :  { %12400 = vmatprep.mubr.msk.bf16.mxu0 %vm13141_vm3, %v13140_v50  ;;  %12397 = vmatpush3.bf16.msra.mxu0 %v12906_v63 }
 0x94c   :  { %12398 = vmatprep.subr.bf16.mxu0 %v13140_v50 }
 0x94f   :  { %12399 = vmatpush3.bf16.msra.mxu0 %v12907_v0 }
 0x950   :  { %12404 = vmatprep.subr.mxu0 %v13140_v50 }
 0xa1d   :  { %v2884_v38 = vpop.f32.mrb[20].mxu0 }
 0xa1e   :  { %v2885_v31 = vadd.f32 %v11697_v40, %v2884_v38  ;;  %v12374_v33 = vpop.f32.mrb[21].mxu0 }
 0xa1f   :  { %v2887_v34 = vpop.f32.mrb[22].mxu0 }
 0xa20   :  { %v2888_v42 = vadd.f32 %v11697_v40, %v2887_v34  ;;  %v12375_v43 = vpop.f32.mrb[23].mxu0  ;;  %v2891_v45 = vmax.f32 %v2885_v31, 0.0 }
 0xa22   :  { %v2892_v47 = vmax.f32 %v2888_v42, 0.0 }
 0xa24   :  { %v2893_v48 = vpack.c.bf16 %v2892_v47, %v2891_v45 }
 0xa26   :  { %12393 = vmatmul.mubr.bf16.vlgmr.msra.gmra.mrb[24].mxu1 %v2893_v48 }
 0xa27   :  { %12436 = vmatprep.mubr.msk.f32.mxu1 %vm13141_vm3, %v13140_v50 }
 0xaf9   :  { %v2992_v52 = vpop.f32.mrb[24].mxu1 }
 0xafa   :  { %v2999_v29 = vadd.f32 %v2992_v52, %v13715_v56  ;;  %v12394_v30 = vpop.f32.mrb[25].mxu1 }
 0xafb   :  { %v2995_v32 = vpop.f32.mrb[26].mxu1 }
 0xafc   :  { %v13786_v55 = vadd.f32 %v11709_v54, %v2999_v29  ;;  %v3000_v7 = vadd.f32 %v2995_v32, %v13718_v27  ;;  %v12395_v37 = vpop.f32.mrb[27].mxu1 }
 0xafe   :  { %v13789_v22 = vadd.f32 %v11709_v54, %v3000_v7  ;;  %v3010_v41 = vsel %vm177_vm2, %v13786_v55, 0.0 }
 0xaff   :  { %3011 = vadd.xlane.f32.xlu0 %v3010_v41 }
 0xb00   :  { %v3013_v57 = vsel %vm177_vm2, %v13789_v22, 0.0 }
 0xb01   :  { %3014 = vadd.xlane.f32.xlu1 %v3013_v57 }
 0xb8c   :  { %v3012_v58 = vpop.xlane.xlu0 %3011 }
 0xb8d   :  { %v3016_v59 = vmul.f32 0.03125, %v3012_v58 }
 0xb8e   :  { %v3015_v56 = vpop.xlane.xlu1 %3014 }
 0xb8f   :  { %v3018_v35 = vsub.f32 %v13786_v55, %v3016_v59  ;;  %v3017_v60 = vmul.f32 0.03125, %v3015_v56 }
 0xb91   :  { %v3019_v49 = vsub.f32 %v13789_v22, %v3017_v60  ;;  %v3020_v27 = vmul.f32 %v3018_v35, %v3018_v35 }
 0xb93   :  { %v3022_v61 = vsel %vm177_vm2, %v3020_v27, 0.0  ;;  %v3021_v36 = vmul.f32 %v3019_v49, %v3019_v49 }
 0xb94   :  { %3023 = vadd.xlane.f32.xlu0 %v3022_v61 }
 0xb95   :  { %v3025_v62 = vsel %vm177_vm2, %v3021_v36, 0.0 }
 0xb96   :  { %3026 = vadd.xlane.f32.xlu1 %v3025_v62 }
 0xc21   :  { %v3024_v1 = vpop.xlane.xlu0 %3023 }
 0xc22   :  { %v3028_v28 = vmul.f32 0.03125, %v3024_v1 }
 0xc23   :  { %v3027_v15 = vpop.xlane.xlu1 %3026 }
 0xc24   :  { %v3030_v2 = vadd.f32 1e-05, %v3028_v28  ;;  %v3029_v44 = vmul.f32 0.03125, %v3027_v15 }
 0xc26   :  { %12990 = vrsqrt.f32 %v3030_v2  ;;  %v3031_v46 = vadd.f32 1e-05, %v3029_v44 }
 0xc28   :  { %12992 = vrsqrt.f32 %v3031_v46 }
 0xc30   :  { %v12991_v51 = vpop.eup %12990 }
 0xc31   :  { %v3034_v4 = vmul.f32 %v12991_v51, %v3018_v35 }
 0xc32   :  { %v12993_v5 = vpop.eup %12992 }
 0xc33   :  { %v3040_v6 = vmul.f32 %v11710_v3, %v3034_v4  ;;  %v3035_v8 = vmul.f32 %v12993_v5, %v3019_v49 }
 0xc35   :  { %v3041_v10 = vmul.f32 %v11710_v3, %v3035_v8  ;;  %v3046_v11 = vadd.f32 %v11711_v9, %v3040_v6 }
 0xc37   :  { %v3047_v12 = vadd.f32 %v11711_v9, %v3041_v10 }
 0xc39   :  { %v3048_v13 = vpack.c.bf16 %v3047_v12, %v3046_v11 }
 0xc3b   :  { %12401 = vmatmul.mubr.msk.bf16.vlgmr.msra.gmra.mrb[24].mxu0 %vm177_vm2, %v3048_v13 }
 0xc3c   :  { %12406 = vmatprep.mubr.msk.f32.mxu0 %vm13141_vm3, %v13140_v50 }
 0xd0e   :  { %v3103_v14 = vpop.f32.mrb[24].mxu0 }
 0xd0f   :  { %3136 = vrot.lane.b32.xlu1 %v3103_v14, %s15286_s19  ;;  %3130 = vrot.lane.b32.xlu0 %v3103_v14, %s15284_s0  ;;  %v12402_v16 = vpop.f32.mrb[25].mxu0 }
 0xd10   :  { %v13818_v17 = vpop.f32.mrb[26].mxu0 }
 0xd11   :  { %v12403_v18 = vpop.f32.mrb[27].mxu0 }
 0xd13   :  { %3142 = vrot.lane.b32.xlu1 %v3103_v14, %s15280_s29  ;;  %3148 = vrot.lane.b32.xlu0 %v3103_v14, %s15276_s1 }
 0xd17   :  { %3112 = vrot.lane.b32.xlu1 %v3103_v14, %s15282_s30  ;;  %3118 = vrot.lane.b32.xlu0 %v3103_v14, %s15274_s13 }
 0xd1b   :  { %3124 = vrot.lane.b32.xlu1 %v3103_v14, %s15278_s21  ;;  %3132 = vrot.lane.b32.xlu0 %v13818_v17, %s15284_s0  ;;  %s15313_s0 = smov 80  }
 0xd1f   :  { %3138 = vrot.lane.b32.xlu1 %v13818_v17, %s15286_s19  ;;  %3144 = vrot.lane.b32.xlu0 %v13818_v17, %s15280_s29  ;;  %s13159_s29 = smov [#allocation2]  }
 0xd23   :  { %3150 = vrot.lane.b32.xlu1 %v13818_v17, %s15276_s1  ;;  %3114 = vrot.lane.b32.xlu0 %v13818_v17, %s15282_s30  ;;  %s15312_s30 = smov 120   ;;  %s15316_s1 = smov 112  }
 0xd27   :  { %3120 = vrot.lane.b32.xlu1 %v13818_v17, %s15274_s13  ;;  %3126 = vrot.lane.b32.xlu0 %v13818_v17, %s15278_s21  ;;  %s15311_s21 = smov 96   ;;  %s15317_s13 = smov 56  }
 0xd2b   :  { %3160 = vrot.lane.b32.xlu1 %v3103_v14, %s15272_s20  ;;  %3154 = vrot.lane.b32.xlu0 %v3103_v14, %s15305_s2 }
 0xd2f   :  { %3166 = vrot.lane.b32.xlu1 %v3103_v14, %s15306_s27  ;;  %3172 = vrot.lane.b32.xlu0 %v3103_v14, %s15307_s26 }
 0xd33   :  { %3162 = vrot.lane.b32.xlu1 %v13818_v17, %s15272_s20  ;;  %3156 = vrot.lane.b32.xlu0 %v13818_v17, %s15305_s2  ;;  %s15310_s20 = smov 24  }
 0xd81   :  { %v3137_v20 = vpop.permute.xlu1 %3136  ;;  %v3131_v21 = vpop.permute.xlu0 %3130 }
 0xd85   :  { %v3143_v23 = vpop.permute.xlu1 %3142  ;;  %v3149_v24 = vpop.permute.xlu0 %3148 }
 0xd86   :  { %v3210_v26 = vcombine.low %v3131_v21, %v3143_v23  ;;  %v3211_v39 = vcombine.high %v3131_v21, %v3143_v23  ;;  %v3226_v40 = vcombine.low %v3137_v20, %v3149_v24  ;;  %v3227_v38 = vcombine.high %v3137_v20, %v3149_v24 }
 0xd88   :  { %v3218_v31 = vrot.slane %v3210_v26, %v13399_v19  ;;  %v3225_v33 = vrot.slane %v3211_v39, %v13399_v19  ;;  %v3234_v34 = vrot.slane %v3226_v40, %v13399_v19  ;;  %v3241_v42 = vrot.slane %v3227_v38, %v13399_v19 }
 0xd89   :  { %v3113_v43 = vpop.permute.xlu1 %3112  ;;  %v3119_v45 = vpop.permute.xlu0 %3118 }
 0xd8a   :  { %v3274_v47 = vcombine.low %v3218_v31, %v3234_v34  ;;  %v3275_v48 = vcombine.high %v3218_v31, %v3234_v34  ;;  %v3290_v52 = vcombine.low %v3225_v33, %v3241_v42  ;;  %v3291_v54 = vcombine.high %v3225_v33, %v3241_v42 }
 0xd8b   :  { %v3178_v37 = vcombine.low %v3103_v14, %v3119_v45  ;;  %v3179_v41 = vcombine.high %v3103_v14, %v3119_v45 }
 0xd8c   :  { %v3282_v29 = vrot.slane %v3274_v47, %v13402_v25  ;;  %v3289_v30 = vrot.slane %v3275_v48, %v13402_v25  ;;  %v3298_v32 = vrot.slane %v3290_v52, %v13402_v25  ;;  %v3305_v7 = vrot.slane %v3291_v54, %v13402_v25 }
 0xd8d   :  { %v3125_v57 = vpop.permute.xlu1 %3124  ;;  %v3133_v58 = vpop.permute.xlu0 %3132  ;;  %v3186_v0 = vrot.slane %v3178_v37, %v13399_v19  ;;  %v3193_v1 = vrot.slane %v3179_v41, %v13399_v19 }
 0xd8e   :  { %v11720_v59 = vcombine.low %v3282_v29, %v3289_v30  ;;  %v11722_v56 = vcombine.high %v3282_v29, %v3289_v30  ;;  %v11724_v35 = vcombine.low %v3298_v32, %v3305_v7  ;;  %v11726_v60 = vcombine.high %v3298_v32, %v3305_v7 }
 0xd8f   :  { %v3194_v49 = vcombine.low %v3113_v43, %v3125_v57  ;;  %v3195_v27 = vcombine.high %v3113_v43, %v3125_v57 }
 0xd90   :  { %v13856_v61 = vrot.slane %v11720_v59, %v13399_v19  ;;  %v13859_v36 = vrot.slane %v11722_v56, %v13399_v19  ;;  %v13862_v62 = vrot.slane %v11724_v35, %v13399_v19  ;;  %v13865_v63 = vrot.slane %v11726_v60, %v13399_v19 }
 0xd91   :  { %v3202_v28 = vrot.slane %v3194_v49, %v13399_v19  ;;  %v3209_v15 = vrot.slane %v3195_v27, %v13399_v19  ;;  %v3139_v2 = vpop.permute.xlu1 %3138  ;;  %v3145_v44 = vpop.permute.xlu0 %3144 }
 0xd92   :  { %v3666_v46 = vcombine.low %v13856_v61, %v13859_v36  ;;  %v3698_v51 = vcombine.low %v13862_v62, %v13865_v63  ;;  %v3414_v8 = vcombine.low %v3133_v58, %v3145_v44  ;;  %v3415_v9 = vcombine.high %v3133_v58, %v3145_v44 }
 0xd93   :  { %v3242_v3 = vcombine.low %v3186_v0, %v3202_v28  ;;  %v3243_v4 = vcombine.high %v3186_v0, %v3202_v28  ;;  %v3258_v5 = vcombine.low %v3193_v1, %v3209_v15  ;;  %v3259_v6 = vcombine.high %v3193_v1, %v3209_v15 }
 0xd94   :  { %v13876_v10 = vrot.slane %v3666_v46, %v13402_v25  ;;  %v13879_v11 = vrot.slane %v3698_v51, %v13402_v25  ;;  %v3422_v21 = vrot.slane %v3414_v8, %v13399_v19  ;;  %v3429_v31 = vrot.slane %v3415_v9, %v13399_v19 }
 0xd95   :  { %v3250_v12 = vrot.slane %v3242_v3, %v13402_v25  ;;  %v3257_v13 = vrot.slane %v3243_v4, %v13402_v25  ;;  %v3266_v14 = vrot.slane %v3258_v5, %v13402_v25  ;;  %v3273_v16 = vrot.slane %v3259_v6, %v13402_v25  ;;  %v3151_v18 = vpop.permute.xlu1 %3150  ;;  %v3115_v20 = vpop.permute.xlu0 %3114 }
 0xd96   :  { %v3430_v23 = vcombine.low %v3139_v2, %v3151_v18  ;;  %v3431_v24 = vcombine.high %v3139_v2, %v3151_v18  ;;  %v3718_v42 = vcombine.low %v13876_v10, %v13879_v11  ;;  %v3667_v43 = vcombine.high %v13856_v61, %v13859_v36 }
 0xd97   :  { %v11719_v26 = vcombine.low %v3250_v12, %v3257_v13  ;;  %v11721_v39 = vcombine.high %v3250_v12, %v3257_v13  ;;  %v11723_v40 = vcombine.low %v3266_v14, %v3273_v16  ;;  %v11725_v38 = vcombine.high %v3266_v14, %v3273_v16 }
 0xd98   :  { %v3438_v33 = vrot.slane %v3430_v23, %v13399_v19  ;;  %v3445_v34 = vrot.slane %v3431_v24, %v13399_v19  ;;  %v3699_v45 = vcombine.high %v13862_v62, %v13865_v63  ;;  %v3719_v52 = vcombine.high %v13876_v10, %v13879_v11  ;;  %12405 = vmatpush3.xpose.msk.msra.mxu0 %vm1162_vm4, %v3718_v42 }
 0xd99   :  { %v3121_v47 = vpop.permute.xlu1 %3120  ;;  %v3127_v48 = vpop.permute.xlu0 %3126  ;;  %v13899_v7 = vrot.slane %v11719_v26, %v13399_v19  ;;  %v13902_v37 = vrot.slane %v11721_v39, %v13399_v19  ;;  %v13905_v41 = vrot.slane %v11723_v40, %v13399_v19  ;;  %v13908_v57 = vrot.slane %v11725_v38, %v13399_v19  ;;  %12409 = vmatprep.subr.mxu0 %v13140_v50 }
 0xd9a   :  { %v3478_v54 = vcombine.low %v3422_v21, %v3438_v33  ;;  %v3479_v29 = vcombine.high %v3422_v21, %v3438_v33  ;;  %v3494_v30 = vcombine.low %v3429_v31, %v3445_v34  ;;  %v3495_v32 = vcombine.high %v3429_v31, %v3445_v34 }
 0xd9b   :  { %v3382_v60 = vcombine.low %v13818_v17, %v3121_v47  ;;  %v3383_v49 = vcombine.high %v13818_v17, %v3121_v47  ;;  %v3398_v27 = vcombine.low %v3115_v20, %v3127_v48  ;;  %v3399_v0 = vcombine.high %v3115_v20, %v3127_v48 }
 0xd9c   :  { %v3486_v58 = vrot.slane %v3478_v54, %v13402_v25  ;;  %v3493_v59 = vrot.slane %v3479_v29, %v13402_v25  ;;  %v3502_v56 = vrot.slane %v3494_v30, %v13402_v25  ;;  %v3509_v35 = vrot.slane %v3495_v32, %v13402_v25 }
 0xd9d   :  { %v3161_v1 = vpop.permute.xlu1 %3160  ;;  %v3155_v28 = vpop.permute.xlu0 %3154  ;;  %v3390_v51 = vrot.slane %v3382_v60, %v13399_v19  ;;  %v3397_v3 = vrot.slane %v3383_v49, %v13399_v19  ;;  %v3406_v4 = vrot.slane %v3398_v27, %v13399_v19  ;;  %v3413_v5 = vrot.slane %v3399_v0, %v13399_v19 }
 0xd9e   :  { %v11730_v15 = vcombine.low %v3486_v58, %v3493_v59  ;;  %v11732_v2 = vcombine.high %v3486_v58, %v3493_v59  ;;  %v11734_v44 = vcombine.low %v3502_v56, %v3509_v35  ;;  %v11736_v46 = vcombine.high %v3502_v56, %v3509_v35 }
 0xd9f   :  { %v3650_v6 = vcombine.low %v13899_v7, %v13902_v37  ;;  %v3651_v8 = vcombine.high %v13899_v7, %v13902_v37  ;;  %v3682_v9 = vcombine.low %v13905_v41, %v13908_v57  ;;  %v3683_v12 = vcombine.high %v13905_v41, %v13908_v57 }
 0xda0   :  { %v3446_v13 = vcombine.low %v3390_v51, %v3406_v4  ;;  %v3447_v14 = vcombine.high %v3390_v51, %v3406_v4  ;;  %v3462_v16 = vcombine.low %v3397_v3, %v3413_v5  ;;  %v3463_v18 = vcombine.high %v3397_v3, %v3413_v5 }
 0xda1   :  { %v3167_v20 = vpop.permute.xlu1 %3166  ;;  %v13930_v21 = vrot.slane %v11730_v15, %v13399_v19  ;;  %v13933_v23 = vrot.slane %v11732_v2, %v13399_v19  ;;  %v13936_v24 = vrot.slane %v11734_v44, %v13399_v19  ;;  %v13939_v26 = vrot.slane %v11736_v46, %v13399_v19  ;;  %v3173_v33 = vpop.permute.xlu0 %3172 }
 0xda2   :  { %v3454_v39 = vrot.slane %v3446_v13, %v13402_v25  ;;  %v3461_v40 = vrot.slane %v3447_v14, %v13402_v25  ;;  %v3470_v38 = vrot.slane %v3462_v16, %v13402_v25  ;;  %v3477_v31 = vrot.slane %v3463_v18, %v13402_v25 }
 0xda3   :  { %v3658_v34 = vrot.slane %v3650_v6, %v13402_v25  ;;  %v3690_v42 = vrot.slane %v3682_v9, %v13402_v25  ;;  %v3314_v47 = vcombine.low %v3155_v28, %v3167_v20  ;;  %v3315_v48 = vcombine.high %v3155_v28, %v3167_v20 }
 0xda4   :  { %v11729_v54 = vcombine.low %v3454_v39, %v3461_v40  ;;  %v11731_v29 = vcombine.high %v3454_v39, %v3461_v40  ;;  %v11733_v30 = vcombine.low %v3470_v38, %v3477_v31  ;;  %v11735_v32 = vcombine.high %v3470_v38, %v3477_v31 }
 0xda5   :  { %v3871_v7 = vcombine.high %v13930_v21, %v13933_v23  ;;  %v3714_v37 = vcombine.low %v3658_v34, %v3690_v42  ;;  %v3322_v41 = vrot.slane %v3314_v47, %v13399_v19  ;;  %v3330_v57 = vcombine.low %v3161_v1, %v3173_v33 }
 0xda6   :  { %v3798_v58 = vrot.slane %v11729_v54, %v13399_v19  ;;  %v3814_v59 = vrot.slane %v11731_v29, %v13399_v19  ;;  %v3830_v56 = vrot.slane %v11733_v30, %v13399_v19  ;;  %v3846_v35 = vrot.slane %v11735_v32, %v13399_v19 }
 0xda7   :  { %v3903_v60 = vcombine.high %v13936_v24, %v13939_v26  ;;  %12407 = vmatmul.mubr.msk.f32.vlgmr.msra.gmra.mrb[18].mxu0 %vm1162_vm4, %v3714_v37  ;;  %v3329_v49 = vrot.slane %v3315_v48, %v13399_v19  ;;  %v3331_v27 = vcombine.high %v3161_v1, %v3173_v33  ;;  %v3338_v0 = vrot.slane %v3330_v57, %v13399_v19 }
 0xda8   :  { %v3855_v28 = vcombine.high %v3798_v58, %v3814_v59  ;;  %v3887_v15 = vcombine.high %v3830_v56, %v3846_v35  ;;  %12410 = vmatpush3.xpose.msk.msra.mxu0 %vm1162_vm4, %v3719_v52  ;;  %v3715_v2 = vcombine.high %v3658_v34, %v3690_v42  ;;  %v3681_v44 = vrot.slane %v3667_v43, %v13402_v25 }
 0xda9   :  { %v3345_v46 = vrot.slane %v3331_v27, %v13399_v19  ;;  %v3346_v51 = vcombine.low %v3322_v41, %v3338_v0  ;;  %v3347_v3 = vcombine.high %v3322_v41, %v3338_v0  ;;  %12411 = vmatprep.mubr.msk.f32.mxu0 %vm13141_vm3, %v13140_v50  ;;  %12414 = vmatprep.subr.mxu0 %v13140_v50 }
 0xdaa   :  { %v3713_v10 = vrot.slane %v3699_v45, %v13402_v25  ;;  %v3665_v11 = vrot.slane %v3651_v8, %v13402_v25  ;;  %v3697_v52 = vrot.slane %v3683_v12, %v13402_v25  ;;  %v13978_v61 = vrot.slane %v3871_v7, %v13402_v25 }
 0xdab   :  { %v3354_v36 = vrot.slane %v3346_v51, %v13402_v25  ;;  %v3361_v43 = vrot.slane %v3347_v3, %v13402_v25  ;;  %v3362_v1 = vcombine.low %v3329_v49, %v3345_v46  ;;  %v3363_v4 = vcombine.high %v3329_v49, %v3345_v46  ;;  %12412 = vmatmul.mubr.msk.f32.vlgmr.msra.gmra.mrb[28].mxu0 %vm1162_vm4, %v3715_v2 }
 0xdac   :  { %v3870_v5 = vcombine.low %v13930_v21, %v13933_v23  ;;  %v3902_v62 = vcombine.low %v13936_v24, %v13939_v26  ;;  %v3720_v63 = vcombine.low %v3681_v44, %v3713_v10  ;;  %12416 = vmatprep.mubr.msk.f32.mxu0 %vm13141_vm3, %v13140_v50  ;;  %v3917_v45 = vrot.slane %v3903_v60, %v13402_v25 }
 0xdad   :  { %v3854_v6 = vcombine.low %v3798_v58, %v3814_v59  ;;  %v3370_v8 = vrot.slane %v3362_v1, %v13402_v25  ;;  %v3377_v9 = vrot.slane %v3363_v4, %v13402_v25  ;;  %v3722_v12 = vcombine.low %v3354_v36, %v3361_v43 }
 0xdae   :  { %v3886_v13 = vcombine.low %v3830_v56, %v3846_v35  ;;  %v11727_v14 = vcombine.high %v3354_v36, %v3361_v43  ;;  %12415 = vmatpush3.xpose.msk.msra.mxu0 %vm1162_vm4, %v3720_v63  ;;  %v3716_v16 = vcombine.low %v3665_v11, %v3697_v52  ;;  %v3924_v18 = vcombine.low %v13978_v61, %v3917_v45 }
 0xdaf   :  { %v3738_v20 = vcombine.low %v3370_v8, %v3377_v9  ;;  %v11728_v21 = vcombine.high %v3370_v8, %v3377_v9  ;;  %12419 = vmatprep.subr.mxu0 %v13140_v50  ;;  %v3869_v23 = vrot.slane %v3855_v28, %v13402_v25  ;;  %v3901_v24 = vrot.slane %v3887_v15, %v13402_v25 }
 0xdb0   :  { %v3721_v26 = vcombine.high %v3681_v44, %v3713_v10  ;;  %12435 = vmatpush3.xpose.msk.msra.mxu1 %vm1162_vm4, %v3924_v18  ;;  %v3878_v39 = vrot.slane %v3870_v5, %v13402_v25  ;;  %v3910_v40 = vrot.slane %v3902_v62, %v13402_v25  ;;  %v3729_v31 = vrot.slane %v3722_v12, %v13399_v19 }
 0xdb1   :  { %12417 = vmatmul.mubr.msk.f32.vlgmr.msra.gmra.mrb[30].mxu0 %vm1162_vm4, %v3716_v16  ;;  %v3920_v38 = vcombine.low %v3869_v23, %v3901_v24  ;;  %12444 = vmatprep.subr.mxu1 %v13140_v50  ;;  %v3717_v33 = vcombine.high %v3665_v11, %v3697_v52  ;;  %v3862_v34 = vrot.slane %v3854_v6, %v13402_v25 }
 0xdb2   :  { %12420 = vmatpush3.xpose.msk.msra.mxu0 %vm1162_vm4, %v3721_v26  ;;  %12421 = vmatprep.mubr.msk.f32.mxu0 %vm13141_vm3, %v13140_v50  ;;  %v3737_v42 = vrot.slane %v11727_v14, %v13399_v19  ;;  %v3894_v47 = vrot.slane %v3886_v13, %v13402_v25  ;;  %v3745_v48 = vrot.slane %v3738_v20, %v13399_v19 }
 0xdb3   :  { %12424 = vmatprep.subr.mxu0 %v13140_v50  ;;  %12437 = vmatmul.mubr.msk.f32.vlgmr.msra.gmra.mrb[28].mxu1 %vm1162_vm4, %v3920_v38  ;;  %v3753_v54 = vrot.slane %v11728_v21, %v13399_v19  ;;  %v3922_v29 = vcombine.low %v3878_v39, %v3910_v40  ;;  %v3923_v35 = vcombine.high %v3878_v39, %v3910_v40 }
 0xdb4   :  { %v3754_v30 = vcombine.low %v3729_v31, %v3737_v42  ;;  %12446 = vmatprep.mubr.msk.f32.mxu1 %vm13141_vm3, %v13140_v50  ;;  %v3755_v32 = vcombine.high %v3729_v31, %v3737_v42  ;;  %v3918_v58 = vcombine.low %v3862_v34, %v3894_v47  ;;  %v3919_v0 = vcombine.high %v3862_v34, %v3894_v47 }
 0xdb5   :  { %12422 = vmatmul.mubr.msk.f32.vlgmr.msra.gmra.mrb[32].mxu0 %vm1162_vm4, %v3717_v33  ;;  %v3770_v7 = vcombine.low %v3745_v48, %v3753_v54  ;;  %v3771_v37 = vcombine.high %v3745_v48, %v3753_v54  ;;  %v3925_v28 = vcombine.high %v13978_v61, %v3917_v45  ;;  %v3921_v15 = vcombine.high %v3869_v23, %v3901_v24 }
 0xdb6   :  { %12425 = vmatpush3.xpose.msk.msra.mxu0 %vm1162_vm4, %v3922_v29  ;;  %12426 = vmatprep.mubr.msk.f32.mxu0 %vm13141_vm3, %v13140_v50  ;;  %v3762_v41 = vrot.slane %v3754_v30, %v13402_v25  ;;  %v14021_v57 = vrot.slane %v3755_v32, %v13402_v25 }
 0xdb7   :  { %12429 = vmatprep.subr.mxu0 %v13140_v50  ;;  %v3778_v59 = vrot.slane %v3770_v7, %v13402_v25  ;;  %v14026_v56 = vrot.slane %v3771_v37, %v13402_v25 }
 0xdb9   :  { %12427 = vmatmul.mubr.msk.f32.vlgmr.msra.gmra.mrb[34].mxu0 %vm1162_vm4, %v3918_v58  ;;  %v3786_v60 = vcombine.low %v3762_v41, %v3778_v59  ;;  %v3788_v49 = vcombine.low %v14021_v57, %v14026_v56  ;;  %v3789_v27 = vcombine.high %v14021_v57, %v14026_v56  ;;  %v3787_v2 = vcombine.high %v3762_v41, %v3778_v59 }
 0xdba   :  { %12430 = vmatpush3.xpose.msk.msra.mxu0 %vm1162_vm4, %v3923_v35  ;;  %12431 = vmatprep.mubr.msk.f32.mxu0 %vm13141_vm3, %v13140_v50 }
 0xdbb   :  { %12439 = vmatprep.subr.mxu0 %v13140_v50  ;;  %12445 = vmatpush3.msra.mxu1 %v3786_v60  ;;  %v3163_v60 = vpop.permute.xlu1 %3162 }
 0xdbc   :  { %12454 = vmatprep.subr.mxu1 %v13140_v50 }
 0xdbd   :  { %12432 = vmatmul.mubr.msk.f32.vlgmr.msra.gmra.mrb[36].mxu0 %vm1162_vm4, %v3919_v0 }
 0xdbe   :  { %12440 = vmatpush3.xpose.msk.msra.mxu0 %vm1162_vm4, %v3925_v28  ;;  %12441 = vmatprep.mubr.msk.f32.mxu0 %vm13141_vm3, %v13140_v50  ;;  %v3157_v28 = vpop.permute.xlu0 %3156 }
 0xdbf   :  { %12449 = vmatprep.subr.mxu0 %v13140_v50 }
 0xdc1   :  { %12442 = vmatmul.mubr.msk.f32.vlgmr.msra.gmra.mrb[38].mxu0 %vm1162_vm4, %v3921_v15 }
 0xdc2   :  { %12450 = vmatpush3.msra.mxu0 %v3787_v2  ;;  %12451 = vmatprep.mubr.msk.f32.mxu0 %vm13141_vm3, %v13140_v50 }
 0xdc3   :  { %12459 = vmatprep.subr.mxu0 %v13140_v50 }
 0xe7a   :  { %v4066_v44 = vpop.f32.mrb[18].mxu0 }
 0xe7b   :  { %v4067_v46 = vadd.f32 %v4066_v44, %v13556_v53  ;;  %v12408_v51 = vpop.f32.mrb[19].mxu0 }
 0xe7d   :  { %v4602_v3 = vmul.f32 1.442695, %v4067_v46 }
 0xe7e   :  { %v4142_v10 = vpop.f32.mrb[28].mxu0 }
 0xe7f   :  { %12994 = vpow2.f32 %v4602_v3  ;;  %v12413_v11 = vpop.f32.mrb[29].mxu0  ;;  %v4143_v52 = vadd.f32 %v4142_v10, %v13556_v53 }
 0xe81   :  { %v4604_v5 = vmul.f32 1.442695, %v4143_v52 }
 0xe84   :  { %v4218_v61 = vpop.f32.mrb[30].mxu0 }
 0xe85   :  { %v12418_v36 = vpop.f32.mrb[31].mxu0  ;;  %v4219_v62 = vadd.f32 %v4218_v61, %v13556_v53 }
 0xe86   :  { %v4522_v43 = vpop.f32.mrb[28].mxu1 }
 0xe87   :  { %v4523_v1 = vadd.f32 %v4522_v43, %v13556_v53  ;;  %v12438_v4 = vpop.f32.mrb[29].mxu1  ;;  %v4606_v14 = vmul.f32 1.442695, %v4219_v62 }
 0xe88   :  { %v4294_v63 = vpop.f32.mrb[32].mxu0 }
 0xe89   :  { %v12995_v45 = vpop.eup %12994  ;;  %v4295_v6 = vadd.f32 %v4294_v63, %v13556_v53  ;;  %v4614_v8 = vmul.f32 1.442695, %v4523_v1  ;;  %v12423_v9 = vpop.f32.mrb[33].mxu0 }
 0xe8a   :  { %v4618_v12 = vsel %vm1162_vm4, %v12995_v45, 0.0 }
 0xe8b   :  { %v4608_v13 = vmul.f32 1.442695, %v4295_v6  ;;  %12996 = vpow2.f32 %v4614_v8  ;;  %4619 = vadd.xlane.f32.xlu1 %v4618_v12 }
 0xe8c   :  { %12998 = vpow2.f32 %v4604_v5  ;;  %v4370_v16 = vpop.f32.mrb[34].mxu0 }
 0xe8d   :  { %13000 = vpow2.f32 %v4608_v13  ;;  %v4371_v18 = vadd.f32 %v4370_v16, %v13556_v53  ;;  %v12428_v20 = vpop.f32.mrb[35].mxu0 }
 0xe8e   :  { %13002 = vpow2.f32 %v4606_v14 }
 0xe8f   :  { %v4610_v21 = vmul.f32 1.442695, %v4371_v18 }
 0xe90   :  { %v4446_v23 = vpop.f32.mrb[36].mxu0 }
 0xe91   :  { %13004 = vpow2.f32 %v4610_v21  ;;  %v4447_v24 = vadd.f32 %v4446_v23, %v13556_v53  ;;  %v12433_v26 = vpop.f32.mrb[37].mxu0 }
 0xe93   :  { %v4612_v39 = vmul.f32 1.442695, %v4447_v24 }
 0xe94   :  { %v4598_v40 = vpop.f32.mrb[38].mxu0 }
 0xe95   :  { %v14056_v38 = vpop.eup %12996  ;;  %13006 = vpow2.f32 %v4612_v39  ;;  %v4599_v31 = vadd.f32 %v4598_v40, %v13556_v53  ;;  %v12443_v33 = vpop.f32.mrb[39].mxu0 }
 0xe96   :  { %v12999_v34 = vpop.eup %12998  ;;  %v4636_v42 = vsel %vm1162_vm4, %v14056_v38, 0.0 }
 0xe97   :  { %v13001_v47 = vpop.eup %13000  ;;  %v4616_v48 = vmul.f32 1.442695, %v4599_v31  ;;  %4637 = vadd.xlane.f32.xlu0 %v4636_v42  ;;  %v4621_v30 = vsel %vm1162_vm4, %v12999_v34, 0.0 }
 0xe98   :  { %v4627_v54 = vsel %vm1162_vm4, %v13001_v47, 0.0  ;;  %v13003_v29 = vpop.eup %13002 }
 0xe99   :  { %13008 = vpow2.f32 %v4616_v48  ;;  %4628 = vadd.xlane.f32.xlu1 %v4627_v54  ;;  %v4624_v37 = vsel %vm1162_vm4, %v13003_v29, 0.0 }
 0xe9b   :  { %v14063_v32 = vpop.eup %13004  ;;  %4622 = vadd.xlane.f32.xlu0 %v4621_v30 }
 0xe9c   :  { %v4630_v7 = vsel %vm1162_vm4, %v14063_v32, 0.0 }
 0xe9d   :  { %4631 = vadd.xlane.f32.xlu1 %v4630_v7 }
 0xe9f   :  { %v14068_v41 = vpop.eup %13006  ;;  %4625 = vadd.xlane.f32.xlu0 %v4624_v37 }
 0xea0   :  { %v4633_v58 = vsel %vm1162_vm4, %v14068_v41, 0.0 }
 0xea3   :  { %v14072_v59 = vpop.eup %13008  ;;  %4634 = vadd.xlane.f32.xlu0 %v4633_v58 }
 0xea4   :  { %v4639_v35 = vsel %vm1162_vm4, %v14072_v59, 0.0 }
 0xea5   :  { %4640 = vadd.xlane.f32.xlu1 %v4639_v35 }
 0xeb6   :  { %3168 = vrot.lane.b32.xlu1 %v13818_v17, %s15306_s27 }
 0xeb9   :  { %3174 = vrot.lane.b32.xlu0 %v13818_v17, %s15307_s26 }
 0xf18   :  { %v4620_v0 = vpop.xlane.xlu1 %4619 }
 0xf19   :  { %13010 = vrcp.f32 %v4620_v0 }
 0xf23   :  { %v13011_v15 = vpop.eup %13010 }
 0xf24   :  { %v4638_v2 = vpop.xlane.xlu0 %4637  ;;  %v4650_v44 = vmul.f32 %v13011_v15, %v12995_v45 }
 0xf26   :  { %12447 = vmatmul.mubr.msk.f32.vlgmr.msra.gmra.mrb[30].mxu1 %vm1162_vm4, %v4650_v44  ;;  %v4629_v46 = vpop.xlane.xlu1 %4628 }
 0xf27   :  { %12455 = vmatpush3.msra.mxu1 %v3788_v49  ;;  %12456 = vmatprep.mubr.msk.f32.mxu1 %vm13141_vm3, %v13140_v50 }
 0xf28   :  { %v4623_v51 = vpop.xlane.xlu0 %4622  ;;  %12464 = vmatprep.subr.mxu1 %v13140_v50 }
 0xf29   :  { %13012 = vrcp.f32 %v4623_v51 }
 0xf2a   :  { %13014 = vrcp.f32 %v4629_v46  ;;  %v4632_v3 = vpop.xlane.xlu1 %4631 }
 0xf2c   :  { %v4626_v17 = vpop.xlane.xlu0 %4625 }
 0xf2d   :  { %13016 = vrcp.f32 %v4626_v17 }
 0xf2e   :  { %13018 = vrcp.f32 %v4632_v3 }
 0xf30   :  { %v4635_v10 = vpop.xlane.xlu0 %4634 }
 0xf31   :  { %13020 = vrcp.f32 %v4635_v10 }
 0xf32   :  { %v4641_v11 = vpop.xlane.xlu1 %4640  ;;  %13022 = vrcp.f32 %v4638_v2 }
 0xf33   :  { %v13013_v52 = vpop.eup %13012  ;;  %13024 = vrcp.f32 %v4641_v11 }
 0xf34   :  { %v3175_v61 = vpop.permute.xlu0 %3174  ;;  %v4651_v36 = vmul.f32 %v13013_v52, %v12999_v34  ;;  %v13015_v43 = vpop.eup %13014 }
 0xf35   :  { %v3534_v1 = vcombine.low %v3163_v60, %v3175_v61  ;;  %v3535_v49 = vcombine.high %v3163_v60, %v3175_v61  ;;  %v4653_v9 = vmul.f32 %v13015_v43, %v13001_v47 }
 0xf36   :  { %v3169_v4 = vpop.permute.xlu1 %3168  ;;  %12452 = vmatmul.mubr.msk.f32.vlgmr.msra.gmra.mrb[40].mxu0 %vm1162_vm4, %v4651_v36 }
 0xf37   :  { %v13017_v5 = vpop.eup %13016  ;;  %v3542_v62 = vrot.slane %v3534_v1, %v13399_v19  ;;  %v3549_v63 = vrot.slane %v3535_v49, %v13399_v19  ;;  %v3518_v45 = vcombine.low %v3157_v28, %v3169_v4  ;;  %v3519_v6 = vcombine.high %v3157_v28, %v3169_v4  ;;  %12460 = vmatpush3.msra.mxu0 %v3789_v27 }
 0xf38   :  { %12461 = vmatprep.mubr.msk.f32.mxu0 %vm13141_vm3, %v13140_v50  ;;  %v4652_v8 = vmul.f32 %v13017_v5, %v13003_v29  ;;  %12469 = vmatprep.subr.mxu0 %v13140_v50  ;;  %v13019_v42 = vpop.eup %13018 }
 0xf39   :  { %v3526_v12 = vrot.slane %v3518_v45, %v13399_v19  ;;  %v3533_v13 = vrot.slane %v3519_v6, %v13399_v19  ;;  %v4654_v2 = vmul.f32 %v13019_v42, %v14063_v32 }
 0xf3a   :  { %12457 = vmatmul.mubr.msk.f32.vlgmr.msra.gmra.mrb[32].mxu1 %vm1162_vm4, %v4652_v8  ;;  %12462 = vmatmul.mubr.msk.f32.vlgmr.msra.gmra.mrb[42].mxu0 %vm1162_vm4, %v4653_v9 }
 0xf3b   :  { %v3550_v14 = vcombine.low %v3526_v12, %v3542_v62  ;;  %v3551_v57 = vcombine.high %v3526_v12, %v3542_v62  ;;  %v3566_v56 = vcombine.low %v3533_v13, %v3549_v63  ;;  %v3567_v27 = vcombine.high %v3533_v13, %v3549_v63  ;;  %12466 = vmatprep.mubr.msk.f32.mxu1 %vm13141_vm3, %v13140_v50  ;;  %v13021_v30 = vpop.eup %13020 }
 0xf3c   :  { %12471 = vmatprep.mubr.msk.f32.mxu0 %vm13141_vm3, %v13140_v50  ;;  %v13023_v58 = vpop.eup %13022  ;;  %v4655_v44 = vmul.f32 %v13021_v30, %v14068_v41 }
 0xf3d   :  { %v3558_v16 = vrot.slane %v3550_v14, %v13402_v25  ;;  %v3565_v18 = vrot.slane %v3551_v57, %v13402_v25  ;;  %v3574_v20 = vrot.slane %v3566_v56, %v13402_v25  ;;  %v3581_v21 = vrot.slane %v3567_v27, %v13402_v25  ;;  %v13025_v15 = vpop.eup %13024 }
 0xf3e   :  { %v4657_v17 = vmul.f32 %v13025_v15, %v14072_v59  ;;  %v4656_v32 = vmul.f32 %v13023_v58, %v14056_v38 }
 0xf3f   :  { %v3926_v23 = vcombine.low %v3558_v16, %v3565_v18  ;;  %v11737_v24 = vcombine.high %v3558_v16, %v3565_v18  ;;  %v3942_v26 = vcombine.low %v3574_v20, %v3581_v21  ;;  %v11738_v39 = vcombine.high %v3574_v20, %v3581_v21 }
 0xf41   :  { %v3933_v40 = vrot.slane %v3926_v23, %v13399_v19  ;;  %v3941_v31 = vrot.slane %v11737_v24, %v13399_v19  ;;  %v3949_v33 = vrot.slane %v3942_v26, %v13399_v19  ;;  %v3957_v34 = vrot.slane %v11738_v39, %v13399_v19 }
 0xf43   :  { %v3958_v47 = vcombine.low %v3933_v40, %v3941_v31  ;;  %v3974_v48 = vcombine.low %v3949_v33, %v3957_v34  ;;  %v3959_v54 = vcombine.high %v3933_v40, %v3941_v31  ;;  %v3975_v29 = vcombine.high %v3949_v33, %v3957_v34 }
 0xf45   :  { %v3966_v7 = vrot.slane %v3958_v47, %v13402_v25  ;;  %v3982_v37 = vrot.slane %v3974_v48, %v13402_v25  ;;  %v3973_v35 = vrot.slane %v3959_v54, %v13402_v25  ;;  %v3989_v60 = vrot.slane %v3975_v29, %v13402_v25 }
 0xf47   :  { %v3990_v0 = vcombine.low %v3966_v7, %v3982_v37  ;;  %v3991_v28 = vcombine.high %v3966_v7, %v3982_v37  ;;  %v3992_v46 = vcombine.low %v3973_v35, %v3989_v60  ;;  %v3993_v51 = vcombine.high %v3973_v35, %v3989_v60 }
 0xf49   :  { %12465 = vmatpush3.msra.mxu1 %v3990_v0  ;;  %12470 = vmatpush3.msra.mxu0 %v3991_v28 }
 0xf4a   :  { %12467 = vmatmul.mubr.msk.f32.vlgmr.msra.gmra.mrb[34].mxu1 %vm1162_vm4, %v4654_v2  ;;  %12472 = vmatmul.mubr.msk.f32.vlgmr.msra.gmra.mrb[44].mxu0 %vm1162_vm4, %v4655_v44 }
 0xf4b   :  { %12474 = vmatprep.subr.mxu1 %v13140_v50  ;;  %12479 = vmatprep.subr.mxu0 %v13140_v50 }
 0xf4c   :  { %12475 = vmatpush3.msra.mxu1 %v3992_v46  ;;  %12480 = vmatpush3.msra.mxu0 %v3993_v51 }
 0xf4d   :  { %12476 = vmatprep.mubr.msk.f32.mxu1 %vm13141_vm3, %v13140_v50  ;;  %12481 = vmatprep.mubr.msk.f32.mxu0 %vm13141_vm3, %v13140_v50 }
 0xf4e   :  { %12477 = vmatmul.mubr.msk.f32.vlgmr.msra.gmra.mrb[36].mxu1 %vm1162_vm4, %v4656_v32  ;;  %12482 = vmatmul.mubr.msk.f32.vlgmr.msra.gmra.mrb[46].mxu0 %vm1162_vm4, %v4657_v17 }
 0xf4f   :  { %12484 = vmatprep.subr.bf16.mxu1 %v13140_v50  ;;  %12488 = vmatprep.mubr.msk.bf16.mxu1 %vm13141_vm3, %v13140_v50 }
 0xf50   :  { %12492 = vmatprep.subr.bf16.mxu0 %v13140_v50  ;;  %12496 = vmatprep.mubr.msk.bf16.mxu0 %vm13141_vm3, %v13140_v50 }
 0xff9   :  { %v4727_v38 = vpop.f32.mrb[30].mxu1 }
 0xffa   :  { %v12448_v41 = vpop.f32.mrb[31].mxu1 }
0x1009   :  { %v4800_v59 = vpop.f32.mrb[40].mxu0 }
0x100a   :  { %v12453_v3 = vpop.f32.mrb[41].mxu0 }
0x100d   :  { %v4873_v10 = vpop.f32.mrb[32].mxu1  ;;  %v4946_v11 = vpop.f32.mrb[42].mxu0 }
0x100e   :  { %v5242_v52 = vcombine.low %v4727_v38, %v4873_v10  ;;  %v5243_v61 = vcombine.high %v4727_v38, %v4873_v10  ;;  %v5258_v36 = vcombine.low %v4800_v59, %v4946_v11  ;;  %v5259_v43 = vcombine.high %v4800_v59, %v4946_v11  ;;  %v12458_v1 = vpop.f32.mrb[33].mxu1  ;;  %v12463_v49 = vpop.f32.mrb[43].mxu0 }
0x1010   :  { %v5250_v4 = vrot.slane %v5242_v52, %v13399_v19  ;;  %v5257_v5 = vrot.slane %v5243_v61, %v13399_v19  ;;  %v5266_v62 = vrot.slane %v5258_v36, %v13399_v19  ;;  %v5273_v63 = vrot.slane %v5259_v43, %v13399_v19 }
0x1012   :  { %v5274_v45 = vcombine.low %v5250_v4, %v5266_v62  ;;  %v5275_v6 = vcombine.high %v5250_v4, %v5266_v62  ;;  %v5290_v8 = vcombine.low %v5257_v5, %v5273_v63  ;;  %v5291_v9 = vcombine.high %v5257_v5, %v5273_v63  ;;  %v12908_v62 = vld [vmem:[%s15242_s4 + $0x10] sm:$0xff]  }
0x1013   :  { %12485 = vmatpush3.bf16.msra.mxu1 %v12908_v62  ;;  %v12912_v62 = vld [vmem:[%s15250_s12 + $0x40] sm:$0xff]  }
0x1014   :  { %v5282_v12 = vrot.slane %v5274_v45, %v13402_v25  ;;  %v5289_v13 = vrot.slane %v5275_v6, %v13402_v25  ;;  %v5298_v14 = vrot.slane %v5290_v8, %v13402_v25  ;;  %v5305_v57 = vrot.slane %v5291_v9, %v13402_v25  ;;  %12486 = vmatprep.subr.bf16.mxu1 %v13140_v50 }
0x1016   :  { %v5378_v56 = vcombine.low %v5282_v12, %v5289_v13  ;;  %v11763_v27 = vcombine.high %v5282_v12, %v5289_v13  ;;  %v5394_v16 = vcombine.low %v5298_v14, %v5305_v57  ;;  %v11764_v18 = vcombine.high %v5298_v14, %v5305_v57 }
0x1018   :  { %v5385_v20 = vrot.slane %v5378_v56, %v13399_v19  ;;  %v5393_v21 = vrot.slane %v11763_v27, %v13399_v19  ;;  %v5401_v23 = vrot.slane %v5394_v16, %v13399_v19  ;;  %v5409_v24 = vrot.slane %v11764_v18, %v13399_v19  ;;  %v12909_v18 = vld [vmem:[%s15242_s4 + $0x18] sm:$0xff]  }
0x1019   :  { %12487 = vmatpush3.bf16.msra.mxu1 %v12909_v18 }
0x101a   :  { %v5411_v26 = vcombine.high %v5385_v20, %v5393_v21  ;;  %v5427_v39 = vcombine.high %v5401_v23, %v5409_v24  ;;  %v5410_v40 = vcombine.low %v5385_v20, %v5393_v21  ;;  %v5426_v31 = vcombine.low %v5401_v23, %v5409_v24  ;;  %12500 = vmatprep.subr.bf16.mxu1 %v13140_v50 }
0x101c   :  { %v5425_v33 = vrot.slane %v5411_v26, %v13402_v25  ;;  %v5441_v34 = vrot.slane %v5427_v39, %v13402_v25  ;;  %v14151_v42 = vrot.slane %v5410_v40, %v13402_v25  ;;  %v14154_v47 = vrot.slane %v5426_v31, %v13402_v25 }
0x101d   :  { %v5019_v48 = vpop.f32.mrb[34].mxu1  ;;  %v5092_v54 = vpop.f32.mrb[44].mxu0 }
0x101e   :  { %v12468_v29 = vpop.f32.mrb[35].mxu1  ;;  %v12473_v30 = vpop.f32.mrb[45].mxu0  ;;  %v5444_v7 = vcombine.low %v5425_v33, %v5441_v34  ;;  %v5442_v37 = vcombine.low %v14151_v42, %v14154_v47  ;;  %v5443_v58 = vcombine.high %v14151_v42, %v14154_v47  ;;  %v5445_v35 = vcombine.high %v5425_v33, %v5441_v34 }
0x1021   :  { %v5165_v60 = vpop.f32.mrb[36].mxu1  ;;  %v5238_v0 = vpop.f32.mrb[46].mxu0 }
0x1022   :  { %v5310_v28 = vcombine.low %v5019_v48, %v5165_v60  ;;  %v5311_v15 = vcombine.high %v5019_v48, %v5165_v60  ;;  %v5326_v2 = vcombine.low %v5092_v54, %v5238_v0  ;;  %v5327_v44 = vcombine.high %v5092_v54, %v5238_v0  ;;  %v12478_v46 = vpop.f32.mrb[37].mxu1  ;;  %v12483_v51 = vpop.f32.mrb[47].mxu0 }
0x1024   :  { %v5318_v17 = vrot.slane %v5310_v28, %v13399_v19  ;;  %v5325_v32 = vrot.slane %v5311_v15, %v13399_v19  ;;  %v5334_v38 = vrot.slane %v5326_v2, %v13399_v19  ;;  %v5341_v41 = vrot.slane %v5327_v44, %v13399_v19  ;;  %v11774_v2 = vld [vmem:[%s15243_s5 + $0x1] ss:$0 sm:$0xff] }
0x1026   :  { %v5342_v59 = vcombine.low %v5318_v17, %v5334_v38  ;;  %v5343_v3 = vcombine.high %v5318_v17, %v5334_v38  ;;  %v5358_v10 = vcombine.low %v5325_v32, %v5341_v41  ;;  %v5359_v11 = vcombine.high %v5325_v32, %v5341_v41 }
0x1028   :  { %v5350_v52 = vrot.slane %v5342_v59, %v13402_v25  ;;  %v5357_v61 = vrot.slane %v5343_v3, %v13402_v25  ;;  %v5366_v36 = vrot.slane %v5358_v10, %v13402_v25  ;;  %v5373_v43 = vrot.slane %v5359_v11, %v13402_v25 }
0x102a   :  { %v5446_v1 = vcombine.low %v5350_v52, %v5357_v61  ;;  %v11765_v49 = vcombine.high %v5350_v52, %v5357_v61  ;;  %v5462_v4 = vcombine.low %v5366_v36, %v5373_v43  ;;  %v11766_v5 = vcombine.high %v5366_v36, %v5373_v43 }
0x102c   :  { %v5453_v63 = vrot.slane %v5446_v1, %v13399_v19  ;;  %v5461_v45 = vrot.slane %v11765_v49, %v13399_v19  ;;  %v5469_v6 = vrot.slane %v5462_v4, %v13399_v19  ;;  %v5477_v8 = vrot.slane %v11766_v5, %v13399_v19  ;;  %v12910_v4 = vld [vmem:[%s15248_s10 + $0x10] sm:$0xff]   ;;  %v12911_v5 = vld [vmem:[%s15248_s10 + $0x18] sm:$0xff]  }
0x102d   :  { %12493 = vmatpush3.bf16.msra.mxu0 %v12910_v4 }
0x102e   :  { %v5479_v9 = vcombine.high %v5453_v63, %v5461_v45  ;;  %v5495_v12 = vcombine.high %v5469_v6, %v5477_v8  ;;  %v5478_v13 = vcombine.low %v5453_v63, %v5461_v45  ;;  %v5494_v14 = vcombine.low %v5469_v6, %v5477_v8  ;;  %12494 = vmatprep.subr.bf16.mxu0 %v13140_v50  ;;  %v12913_v63 = vld [vmem:[%s15250_s12 + $0x48] sm:$0xff]   ;;  %v12914_v45 = vld [vmem:[%s15250_s12 + $0x50] sm:$0xff]   ;;  %v12915_v6 = vld [vmem:[%s15250_s12 + $0x58] sm:$0xff]  }
0x102f   :  { %v12916_v8 = vld [vmem:[%s15250_s12 + $0x60] sm:$0xff]  }
0x1030   :  { %v5493_v57 = vrot.slane %v5479_v9, %v13402_v25  ;;  %v5509_v56 = vrot.slane %v5495_v12, %v13402_v25  ;;  %v5486_v27 = vrot.slane %v5478_v13, %v13402_v25  ;;  %v5502_v16 = vrot.slane %v5494_v14, %v13402_v25  ;;  %v12917_v9 = vld [vmem:[%s15250_s12 + $0x68] sm:$0xff]  }
0x1031   :  { %12495 = vmatpush3.bf16.msra.mxu0 %v12911_v5 }
0x1032   :  { %v5512_v20 = vcombine.low %v5493_v57, %v5509_v56  ;;  %v5511_v21 = vcombine.high %v5486_v27, %v5502_v16  ;;  %v5510_v23 = vcombine.low %v5486_v27, %v5502_v16  ;;  %v5513_v24 = vcombine.high %v5493_v57, %v5509_v56  ;;  %12520 = vmatprep.subr.bf16.mxu0 %v13140_v50 }
0x1034   :  { %v12852_v26 = vpack.i.bf16 %v5512_v20, %v5444_v7  ;;  %v12847_v39 = vpack.i.bf16 %v5511_v21, %v5443_v58  ;;  %v12857_v40 = vpack.i.bf16 %v5513_v24, %v5445_v35  ;;  %v11775_v20 = vld [vmem:[%s15246_s8 + $0x1] ss:$0 sm:$0xff] }
0x1036   :  { %12853 = vrot.lane.b32.xlu0 %v12852_v26, %s15308_s24  ;;  %12848 = vrot.lane.b32.xlu1 %v12847_v39, %s15309_s25  ;;  %v11776_v26 = vld [vmem:[%s15247_s9 + $0x1] ss:$0 sm:$0xff] }
0x103a   :  { %12858 = vrot.lane.b32.xlu1 %v12857_v40, %s15310_s20 }
0x10a8   :  { %v12854_v31 = vpop.permute.xlu0 %12853  ;;  %v12849_v33 = vpop.permute.xlu1 %12848 }
0x10a9   :  { %v12851_v34 = vunpack.i.h.bf16 %v12849_v33  ;;  %v12850_v42 = vunpack.i.l.bf16 %v12849_v33  ;;  %v12856_v47 = vunpack.i.h.bf16 %v12854_v31  ;;  %v12855_v48 = vunpack.i.l.bf16 %v12854_v31 }
0x10ab   :  { %v5538_v54 = vsel %vm1162_vm4, %v5442_v37, %v12850_v42  ;;  %v5539_v29 = vsel %vm1162_vm4, %v5510_v23, %v12851_v34  ;;  %v12918_v34 = vld [vmem:[%s15250_s12 + $0x70] sm:$0xff]   ;;  %v12919_v42 = vld [vmem:[%s15250_s12 + $0x78] sm:$0xff]  }
0x10ac   :  { %v12859_v30 = vpop.permute.xlu1 %12858  ;;  %v5540_v35 = vsel %vm2709_vm6, %v5538_v54, %v12855_v48  ;;  %v5541_v60 = vsel %vm2709_vm6, %v5539_v29, %v12856_v47  ;;  %v11781_v47 = vld [vmem:[%s15249_s11 + $0x1] ss:$0 sm:$0xff] }
0x10ad   :  { %v12861_v7 = vunpack.i.h.bf16 %v12859_v30  ;;  %v12860_v58 = vunpack.i.l.bf16 %v12859_v30 }
0x10af   :  { %v5542_v0 = vsel %vm2712_vm7, %v5540_v35, %v12860_v58  ;;  %v5543_v28 = vsel %vm2712_vm7, %v5541_v60, %v12861_v7 }
0x10b0   :  { %v5544_v15 = vpack.c.bf16 %v5543_v28, %v5542_v0 }
0x10b2   :  { %12489 = vmatmul.mubr.msk.bf16.vlgmr.msra.gmra.mrb[40].mxu1 %vm177_vm2, %v5544_v15  ;;  %v11809_v15 = vld [vmem:[%s15304_s28 + $0x1] ss:$0 sm:$0xff] }
0x10b3   :  { %12516 = vmatprep.mubr.msk.bf16.mxu1 %vm13141_vm3, %v13140_v50  ;;  %12501 = vmatpush3.bf16.msra.mxu1 %v12912_v62 }
0x10b4   :  { %12502 = vmatprep.subr.bf16.mxu1 %v13140_v50 }
0x10b7   :  { %12503 = vmatpush3.bf16.msra.mxu1 %v12913_v63 }
0x10b8   :  { %12504 = vmatprep.subr.bf16.mxu1 %v13140_v50 }
0x10bb   :  { %12505 = vmatpush3.bf16.msra.mxu1 %v12914_v45 }
0x10bc   :  { %12506 = vmatprep.subr.bf16.mxu1 %v13140_v50 }
0x10bf   :  { %12507 = vmatpush3.bf16.msra.mxu1 %v12915_v6 }
0x10c0   :  { %12508 = vmatprep.subr.bf16.mxu1 %v13140_v50 }
0x10c3   :  { %12509 = vmatpush3.bf16.msra.mxu1 %v12916_v8 }
0x10c4   :  { %12510 = vmatprep.subr.bf16.mxu1 %v13140_v50 }
0x10c7   :  { %12511 = vmatpush3.bf16.msra.mxu1 %v12917_v9  ;;  %v11810_v9 = vld [vmem:[%s15244_s6 + $0x2] ss:$0 sm:$0xff] }
0x10c8   :  { %12512 = vmatprep.subr.bf16.mxu1 %v13140_v50 }
0x10cb   :  { %12513 = vmatpush3.bf16.msra.mxu1 %v12918_v34 }
0x10cc   :  { %12514 = vmatprep.subr.bf16.mxu1 %v13140_v50 }
0x10cf   :  { %12515 = vmatpush3.bf16.msra.mxu1 %v12919_v42 }
0x10d0   :  { %12558 = vmatprep.subr.mxu1 %v13140_v50 }
0x1185   :  { %v5599_v37 = vpop.f32.mrb[40].mxu1 }
0x1186   :  { %v5606_v44 = vadd.f32 %v5599_v37, %v13786_v55  ;;  %v12490_v46 = vpop.f32.mrb[41].mxu1 }
0x1187   :  { %v5602_v51 = vpop.f32.mrb[42].mxu1 }
0x1188   :  { %v14200_v17 = vadd.f32 %v11774_v2, %v5606_v44  ;;  %v5607_v32 = vadd.f32 %v5602_v51, %v13789_v22  ;;  %v12491_v38 = vpop.f32.mrb[43].mxu1 }
0x118a   :  { %v14203_v41 = vadd.f32 %v11774_v2, %v5607_v32  ;;  %v5617_v59 = vsel %vm177_vm2, %v14200_v17, 0.0 }
0x118b   :  { %5618 = vadd.xlane.f32.xlu0 %v5617_v59 }
0x118c   :  { %v5620_v3 = vsel %vm177_vm2, %v14203_v41, 0.0 }
0x118d   :  { %5621 = vadd.xlane.f32.xlu1 %v5620_v3 }
0x1218   :  { %v5619_v10 = vpop.xlane.xlu0 %5618 }
0x1219   :  { %v5623_v11 = vmul.f32 0.03125, %v5619_v10 }
0x121a   :  { %v5622_v55 = vpop.xlane.xlu1 %5621 }
0x121b   :  { %v5625_v52 = vsub.f32 %v14200_v17, %v5623_v11  ;;  %v5624_v61 = vmul.f32 0.03125, %v5622_v55 }
0x121d   :  { %v5626_v36 = vsub.f32 %v14203_v41, %v5624_v61  ;;  %v5627_v22 = vmul.f32 %v5625_v52, %v5625_v52 }
0x121f   :  { %v5629_v43 = vsel %vm177_vm2, %v5627_v22, 0.0  ;;  %v5628_v1 = vmul.f32 %v5626_v36, %v5626_v36 }
0x1220   :  { %5630 = vadd.xlane.f32.xlu0 %v5629_v43 }
0x1221   :  { %v5632_v49 = vsel %vm177_vm2, %v5628_v1, 0.0  ;;  %v12920_v1 = vld [vmem:[%s15241_s3 + $0x20] sm:$0xff]  }
0x1224   :  { %5633 = vadd.xlane.f32.xlu0 %v5632_v49  ;;  %v12921_v49 = vld [vmem:[%s15241_s3 + $0x28] sm:$0xff]  }
0x12ad   :  { %v5631_v12 = vpop.xlane.xlu0 %5630 }
0x12ae   :  { %v5635_v13 = vmul.f32 0.03125, %v5631_v12 }
0x12b0   :  { %v5637_v14 = vadd.f32 1e-05, %v5635_v13 }
0x12b1   :  { %v5634_v57 = vpop.xlane.xlu0 %5633 }
0x12b2   :  { %13026 = vrsqrt.f32 %v5637_v14  ;;  %v5636_v56 = vmul.f32 0.03125, %v5634_v57 }
0x12b4   :  { %v5638_v27 = vadd.f32 1e-05, %v5636_v56  ;;  %v11811_v56 = vld [vmem:[%s15245_s7 + $0x2] ss:$0 sm:$0xff] }
0x12b6   :  { %13028 = vrsqrt.f32 %v5638_v27 }
0x12bc   :  { %v13027_v16 = vpop.eup %13026 }
0x12bd   :  { %v5641_v18 = vmul.f32 %v13027_v16, %v5625_v52 }
0x12bf   :  { %v5647_v23 = vmul.f32 %v11775_v20, %v5641_v18 }
0x12c0   :  { %v13029_v21 = vpop.eup %13028 }
0x12c1   :  { %v5642_v24 = vmul.f32 %v13029_v21, %v5626_v36  ;;  %v5653_v40 = vadd.f32 %v11776_v26, %v5647_v23 }
0x12c3   :  { %v5648_v39 = vmul.f32 %v11775_v20, %v5642_v24 }
0x12c5   :  { %v5654_v31 = vadd.f32 %v11776_v26, %v5648_v39 }
0x12c7   :  { %v5655_v33 = vpack.c.bf16 %v5654_v31, %v5653_v40 }
0x12c9   :  { %12497 = vmatmul.mubr.msk.bf16.vlgmr.msra.gmra.mrb[48].mxu0 %vm177_vm2, %v5655_v33 }
0x12ca   :  { %12524 = vmatprep.mubr.msk.bf16.mxu0 %vm13141_vm3, %v13140_v50  ;;  %12521 = vmatpush3.bf16.msra.mxu0 %v12920_v1 }
0x12cb   :  { %12522 = vmatprep.subr.bf16.mxu0 %v13140_v50 }
0x12ce   :  { %12523 = vmatpush3.bf16.msra.mxu0 %v12921_v49 }
0x12cf   :  { %12528 = vmatprep.subr.mxu0 %v13140_v50 }
0x139c   :  { %v5715_v48 = vpop.f32.mrb[48].mxu0 }
0x139d   :  { %v5716_v54 = vadd.f32 %v11781_v47, %v5715_v48  ;;  %v12498_v29 = vpop.f32.mrb[49].mxu0 }
0x139e   :  { %v5718_v30 = vpop.f32.mrb[50].mxu0 }
0x139f   :  { %v5719_v7 = vadd.f32 %v11781_v47, %v5718_v30  ;;  %v12499_v58 = vpop.f32.mrb[51].mxu0  ;;  %v5722_v35 = vmax.f32 %v5716_v54, 0.0 }
0x13a1   :  { %v5723_v60 = vmax.f32 %v5719_v7, 0.0 }
0x13a3   :  { %v5724_v0 = vpack.c.bf16 %v5723_v60, %v5722_v35 }
0x13a5   :  { %12517 = vmatmul.mubr.bf16.vlgmr.msra.gmra.mrb[44].mxu1 %v5724_v0 }
0x13a6   :  { %12560 = vmatprep.mubr.msk.f32.mxu1 %vm13141_vm3, %v13140_v50 }
0x1478   :  { %v5824_v28 = vpop.f32.mrb[44].mxu1 }
0x1479   :  { %v5831_v37 = vadd.f32 %v5824_v28, %v14200_v17  ;;  %v12518_v2 = vpop.f32.mrb[45].mxu1 }
0x147a   :  { %v5827_v44 = vpop.f32.mrb[46].mxu1 }
0x147b   :  { %v14271_v46 = vadd.f32 %v11809_v15, %v5831_v37  ;;  %v5832_v51 = vadd.f32 %v5827_v44, %v14203_v41  ;;  %v12519_v32 = vpop.f32.mrb[47].mxu1 }
0x147d   :  { %v14274_v38 = vadd.f32 %v11809_v15, %v5832_v51  ;;  %v5842_v59 = vsel %vm177_vm2, %v14271_v46, 0.0 }
0x147e   :  { %5843 = vadd.xlane.f32.xlu1 %v5842_v59 }
0x147f   :  { %v5845_v3 = vsel %vm177_vm2, %v14274_v38, 0.0 }
0x1480   :  { %5846 = vadd.xlane.f32.xlu0 %v5845_v3 }
0x150b   :  { %v5844_v10 = vpop.xlane.xlu1 %5843 }
0x150c   :  { %v5848_v11 = vmul.f32 0.03125, %v5844_v10 }
0x150d   :  { %v5847_v17 = vpop.xlane.xlu0 %5846 }
0x150e   :  { %v5850_v55 = vsub.f32 %v14271_v46, %v5848_v11  ;;  %v5849_v52 = vmul.f32 0.03125, %v5847_v17 }
0x1510   :  { %v5851_v61 = vsub.f32 %v14274_v38, %v5849_v52  ;;  %v5852_v41 = vmul.f32 %v5850_v55, %v5850_v55 }
0x1512   :  { %v5854_v36 = vsel %vm177_vm2, %v5852_v41, 0.0  ;;  %v5853_v22 = vmul.f32 %v5851_v61, %v5851_v61 }
0x1513   :  { %5855 = vadd.xlane.f32.xlu1 %v5854_v36 }
0x1514   :  { %v5857_v43 = vsel %vm177_vm2, %v5853_v22, 0.0 }
0x1515   :  { %5858 = vadd.xlane.f32.xlu0 %v5857_v43 }
0x15a0   :  { %v5856_v4 = vpop.xlane.xlu1 %5855 }
0x15a1   :  { %v5860_v5 = vmul.f32 0.03125, %v5856_v4 }
0x15a2   :  { %v5859_v62 = vpop.xlane.xlu0 %5858 }
0x15a3   :  { %v5862_v63 = vadd.f32 1e-05, %v5860_v5  ;;  %v5861_v45 = vmul.f32 0.03125, %v5859_v62 }
0x15a5   :  { %13030 = vrsqrt.f32 %v5862_v63  ;;  %v5863_v6 = vadd.f32 1e-05, %v5861_v45 }
0x15a7   :  { %13032 = vrsqrt.f32 %v5863_v6 }
0x15af   :  { %v13031_v8 = vpop.eup %13030 }
0x15b0   :  { %v5866_v12 = vmul.f32 %v13031_v8, %v5850_v55 }
0x15b1   :  { %v13033_v13 = vpop.eup %13032 }
0x15b2   :  { %v5872_v14 = vmul.f32 %v11810_v9, %v5866_v12  ;;  %v5867_v57 = vmul.f32 %v13033_v13, %v5851_v61 }
0x15b4   :  { %v5873_v27 = vmul.f32 %v11810_v9, %v5867_v57  ;;  %v5878_v16 = vadd.f32 %v11811_v56, %v5872_v14 }
0x15b6   :  { %v5879_v18 = vadd.f32 %v11811_v56, %v5873_v27 }
0x15b8   :  { %v5880_v20 = vpack.c.bf16 %v5879_v18, %v5878_v16 }
0x15ba   :  { %12525 = vmatmul.mubr.msk.bf16.vlgmr.msra.gmra.mrb[52].mxu0 %vm177_vm2, %v5880_v20 }
0x15bb   :  { %12530 = vmatprep.mubr.msk.f32.mxu0 %vm13141_vm3, %v13140_v50 }
0x168d   :  { %v5935_v21 = vpop.f32.mrb[52].mxu0 }
0x168e   :  { %5968 = vrot.lane.b32.xlu0 %v5935_v21, %s15286_s19  ;;  %5962 = vrot.lane.b32.xlu1 %v5935_v21, %s15311_s21  ;;  %v12526_v23 = vpop.f32.mrb[53].mxu0 }
0x168f   :  { %v14303_v24 = vpop.f32.mrb[54].mxu0 }
0x1690   :  { %v12527_v26 = vpop.f32.mrb[55].mxu0 }
0x1692   :  { %5944 = vrot.lane.b32.xlu0 %v5935_v21, %s15312_s30  ;;  %5974 = vrot.lane.b32.xlu1 %v5935_v21, %s15313_s0 }
0x1696   :  { %5956 = vrot.lane.b32.xlu0 %v5935_v21, %s15314_s22  ;;  %5980 = vrot.lane.b32.xlu1 %v5935_v21, %s15315_s23 }
0x169a   :  { %5950 = vrot.lane.b32.xlu1 %v5935_v21, %s15316_s1  ;;  %5970 = vrot.lane.b32.xlu0 %v14303_v24, %s15286_s19  ;;  %s11623_s19 = sshll.u32 %s13159_s29, 4  ;;  %s11624_s19 = int_to_ptr.vmem [resolvable:$true] %s11623_s19 }
0x169b   :  { %s13114_s17 = scalar_lea.vmem %s11624_s19, 256  ;;  %p13119_p1 = scmp.lt.s32.totalorder %s11624_s19, %s11624_s19 }
0x169c   :  { %p13115_p0 = scmp.ne.s32.totalorder %s11624_s19, %s13114_s17  ;;  %p13120_p2 = scmp.lt.s32.totalorder %s13114_s17, %s13114_s17 }
0x169e   :  { %5982 = vrot.lane.b32.xlu0 %v14303_v24, %s15315_s23  ;;  %5964 = vrot.lane.b32.xlu1 %v14303_v24, %s15311_s21  ;;  %p13121_p3 = por %p13120_p2, %p13119_p1 }
0x16a0   :  { %p13122_p4 = pnand %p13121_p3, %p13115_p0 }
0x16a2   :  { %5952 = vrot.lane.b32.xlu0 %v14303_v24, %s15316_s1  ;;  %5976 = vrot.lane.b32.xlu1 %v14303_v24, %s15313_s0 }
0x16a6   :  { %5992 = vrot.lane.b32.xlu0 %v5935_v21, %s15317_s13  ;;  %5946 = vrot.lane.b32.xlu1 %v14303_v24, %s15312_s30 }
0x16aa   :  { %5958 = vrot.lane.b32.xlu1 %v14303_v24, %s15314_s22 }
0x16ae   :  { %5986 = vrot.lane.b32.xlu1 %v5935_v21, %s15305_s2 }
0x16b2   :  { %5998 = vrot.lane.b32.xlu1 %v5935_v21, %s15306_s27 }
0x16b6   :  { %6004 = vrot.lane.b32.xlu1 %v5935_v21, %s15307_s26 }
0x16ba   :  { %5988 = vrot.lane.b32.xlu1 %v14303_v24, %s15305_s2 }
0x1700   :  { %v5969_v39 = vpop.permute.xlu0 %5968  ;;  %v5963_v40 = vpop.permute.xlu1 %5962 }
0x1704   :  { %v5945_v31 = vpop.permute.xlu0 %5944  ;;  %v5975_v33 = vpop.permute.xlu1 %5974 }
0x1705   :  { %v6042_v34 = vcombine.low %v5963_v40, %v5975_v33  ;;  %v6043_v42 = vcombine.high %v5963_v40, %v5975_v33 }
0x1707   :  { %v6050_v30 = vrot.slane %v6042_v34, %v13399_v19  ;;  %v6057_v7 = vrot.slane %v6043_v42, %v13399_v19 }
0x1708   :  { %v5957_v47 = vpop.permute.xlu0 %5956  ;;  %v5981_v48 = vpop.permute.xlu1 %5980 }
0x1709   :  { %v6058_v54 = vcombine.low %v5969_v39, %v5981_v48  ;;  %v6059_v29 = vcombine.high %v5969_v39, %v5981_v48  ;;  %v6026_v60 = vcombine.low %v5945_v31, %v5957_v47  ;;  %v6027_v0 = vcombine.high %v5945_v31, %v5957_v47 }
0x170b   :  { %v6066_v58 = vrot.slane %v6058_v54, %v13399_v19  ;;  %v6073_v35 = vrot.slane %v6059_v29, %v13399_v19  ;;  %v6034_v55 = vrot.slane %v6026_v60, %v13399_v19  ;;  %v6041_v52 = vrot.slane %v6027_v0, %v13399_v19 }
0x170c   :  { %v5951_v28 = vpop.permute.xlu1 %5950  ;;  %v5971_v15 = vpop.permute.xlu0 %5970 }
0x170d   :  { %v6106_v37 = vcombine.low %v6050_v30, %v6066_v58  ;;  %v6107_v2 = vcombine.high %v6050_v30, %v6066_v58  ;;  %v6122_v44 = vcombine.low %v6057_v7, %v6073_v35  ;;  %v6123_v51 = vcombine.high %v6057_v7, %v6073_v35 }
0x170e   :  { %v6010_v32 = vcombine.low %v5935_v21, %v5951_v28  ;;  %v6011_v59 = vcombine.high %v5935_v21, %v5951_v28 }
0x170f   :  { %v6114_v3 = vrot.slane %v6106_v37, %v13402_v25  ;;  %v6121_v10 = vrot.slane %v6107_v2, %v13402_v25  ;;  %v6130_v11 = vrot.slane %v6122_v44, %v13402_v25  ;;  %v6137_v17 = vrot.slane %v6123_v51, %v13402_v25 }
0x1710   :  { %v6018_v61 = vrot.slane %v6010_v32, %v13399_v19  ;;  %v6025_v41 = vrot.slane %v6011_v59, %v13399_v19  ;;  %v5983_v36 = vpop.permute.xlu0 %5982  ;;  %v5965_v22 = vpop.permute.xlu1 %5964 }
0x1711   :  { %v11820_v43 = vcombine.low %v6114_v3, %v6121_v10  ;;  %v11822_v1 = vcombine.high %v6114_v3, %v6121_v10  ;;  %v11824_v49 = vcombine.low %v6130_v11, %v6137_v17  ;;  %v11826_v4 = vcombine.high %v6130_v11, %v6137_v17 }
0x1712   :  { %v6074_v5 = vcombine.low %v6018_v61, %v6034_v55  ;;  %v6075_v62 = vcombine.high %v6018_v61, %v6034_v55  ;;  %v6090_v63 = vcombine.low %v6025_v41, %v6041_v52  ;;  %v6091_v45 = vcombine.high %v6025_v41, %v6041_v52 }
0x1713   :  { %v6433_v6 = vrot.slane %v11820_v43, %v13399_v19  ;;  %v6449_v8 = vrot.slane %v11822_v1, %v13399_v19  ;;  %v6465_v9 = vrot.slane %v11824_v49, %v13399_v19  ;;  %v6481_v12 = vrot.slane %v11826_v4, %v13399_v19 }
0x1714   :  { %v6082_v13 = vrot.slane %v6074_v5, %v13402_v25  ;;  %v6089_v14 = vrot.slane %v6075_v62, %v13402_v25  ;;  %v6098_v57 = vrot.slane %v6090_v63, %v13402_v25  ;;  %v6105_v56 = vrot.slane %v6091_v45, %v13402_v25  ;;  %v5953_v27 = vpop.permute.xlu0 %5952  ;;  %v5977_v16 = vpop.permute.xlu1 %5976 }
0x1715   :  { %v6498_v18 = vcombine.low %v6433_v6, %v6449_v8  ;;  %v6499_v20 = vcombine.high %v6433_v6, %v6449_v8  ;;  %v6530_v21 = vcombine.low %v6465_v9, %v6481_v12  ;;  %v6531_v23 = vcombine.high %v6465_v9, %v6481_v12 }
0x1716   :  { %v11819_v26 = vcombine.low %v6082_v13, %v6089_v14  ;;  %v11821_v39 = vcombine.high %v6082_v13, %v6089_v14  ;;  %v11823_v40 = vcombine.low %v6098_v57, %v6105_v56  ;;  %v11825_v31 = vcombine.high %v6098_v57, %v6105_v56 }
0x1717   :  { %v6262_v33 = vcombine.low %v5971_v15, %v5983_v36  ;;  %v6263_v34 = vcombine.high %v5971_v15, %v5983_v36  ;;  %v6214_v42 = vcombine.low %v14303_v24, %v5953_v27  ;;  %v6215_v47 = vcombine.high %v14303_v24, %v5953_v27 }
0x1718   :  { %v14353_v48 = vrot.slane %v11819_v26, %v13399_v19  ;;  %v14356_v54 = vrot.slane %v11821_v39, %v13399_v19  ;;  %v14359_v29 = vrot.slane %v11823_v40, %v13399_v19  ;;  %v14362_v30 = vrot.slane %v11825_v31, %v13399_v19  ;;  %v5947_v7 = vpop.permute.xlu1 %5946 }
0x1719   :  { %v6270_v58 = vrot.slane %v6262_v33, %v13399_v19  ;;  %v6277_v35 = vrot.slane %v6263_v34, %v13399_v19  ;;  %v6222_v60 = vrot.slane %v6214_v42, %v13399_v19  ;;  %v6229_v37 = vrot.slane %v6215_v47, %v13399_v19 }
0x171a   :  { %v6482_v0 = vcombine.low %v14353_v48, %v14356_v54  ;;  %v6483_v28 = vcombine.high %v14353_v48, %v14356_v54  ;;  %v6514_v15 = vcombine.low %v14359_v29, %v14362_v30  ;;  %v6246_v2 = vcombine.low %v5965_v22, %v5977_v16 }
0x171b   :  { %v6247_v44 = vcombine.high %v5965_v22, %v5977_v16  ;;  %v6506_v51 = vrot.slane %v6498_v18, %v13402_v25  ;;  %v6538_v32 = vrot.slane %v6530_v21, %v13402_v25  ;;  %v14379_v11 = vrot.slane %v6499_v20, %v13402_v25 }
0x171c   :  { %v5959_v59 = vpop.permute.xlu1 %5958  ;;  %v6490_v3 = vrot.slane %v6482_v0, %v13402_v25  ;;  %v6522_v10 = vrot.slane %v6514_v15, %v13402_v25  ;;  %v14382_v17 = vrot.slane %v6531_v23, %v13402_v25  ;;  %v6254_v55 = vrot.slane %v6246_v2, %v13399_v19 }
0x171d   :  { %v6261_v52 = vrot.slane %v6247_v44, %v13399_v19  ;;  %v6550_v61 = vcombine.low %v6506_v51, %v6538_v32  ;;  %v6230_v41 = vcombine.low %v5947_v7, %v5959_v59  ;;  %v6515_v36 = vcombine.high %v14359_v29, %v14362_v30 }
0x171e   :  { %v6231_v22 = vcombine.high %v5947_v7, %v5959_v59  ;;  %v6546_v43 = vcombine.low %v6490_v3, %v6522_v10  ;;  %v6551_v1 = vcombine.high %v6506_v51, %v6538_v32  ;;  %v6310_v49 = vcombine.low %v6254_v55, %v6270_v58 }
0x171f   :  { %v6311_v4 = vcombine.high %v6254_v55, %v6270_v58  ;;  %v6326_v5 = vcombine.low %v6261_v52, %v6277_v35  ;;  %v6327_v62 = vcombine.high %v6261_v52, %v6277_v35  ;;  %12529 = vmatpush3.xpose.msk.msra.mxu0 %vm1162_vm4, %v6550_v61  ;;  %v6238_v63 = vrot.slane %v6230_v41, %v13399_v19 }
0x1720   :  { %v6245_v45 = vrot.slane %v6231_v22, %v13399_v19  ;;  %12533 = vmatprep.subr.mxu0 %v13140_v50  ;;  %v5987_v6 = vpop.permute.xlu1 %5986  ;;  %v6547_v8 = vcombine.high %v6490_v3, %v6522_v10  ;;  %v6552_v9 = vcombine.low %v14379_v11, %v14382_v17  ;;  %v6318_v12 = vrot.slane %v6310_v49, %v13402_v25  ;;  %v5993_v22 = vpop.permute.xlu0 %5992 }
0x1721   :  { %v6325_v13 = vrot.slane %v6311_v4, %v13402_v25  ;;  %v6334_v14 = vrot.slane %v6326_v5, %v13402_v25  ;;  %v6341_v57 = vrot.slane %v6327_v62, %v13402_v25  ;;  %v6278_v56 = vcombine.low %v6222_v60, %v6238_v63 }
0x1722   :  { %v6279_v27 = vcombine.high %v6222_v60, %v6238_v63  ;;  %v6294_v16 = vcombine.low %v6229_v37, %v6245_v45  ;;  %v6295_v18 = vcombine.high %v6229_v37, %v6245_v45  ;;  %12531 = vmatmul.mubr.msk.f32.vlgmr.msra.gmra.mrb[56].mxu0 %vm1162_vm4, %v6546_v43  ;;  %v6497_v2 = vrot.slane %v6483_v28, %v13402_v25 }
0x1723   :  { %v11830_v20 = vcombine.low %v6318_v12, %v6325_v13  ;;  %v11832_v21 = vcombine.high %v6318_v12, %v6325_v13  ;;  %v11834_v23 = vcombine.low %v6334_v14, %v6341_v57  ;;  %v11836_v26 = vcombine.high %v6334_v14, %v6341_v57  ;;  %12534 = vmatpush3.xpose.msk.msra.mxu0 %vm1162_vm4, %v6551_v1 }
0x1724   :  { %v6286_v39 = vrot.slane %v6278_v56, %v13402_v25  ;;  %v6293_v40 = vrot.slane %v6279_v27, %v13402_v25  ;;  %v6302_v31 = vrot.slane %v6294_v16, %v13402_v25  ;;  %v6309_v33 = vrot.slane %v6295_v18, %v13402_v25  ;;  %12535 = vmatprep.mubr.msk.f32.mxu0 %vm13141_vm3, %v13140_v50  ;;  %v5999_v34 = vpop.permute.xlu1 %5998 }
0x1725   :  { %v6637_v42 = vrot.slane %v11830_v20, %v13399_v19  ;;  %v6653_v47 = vrot.slane %v11832_v21, %v13399_v19  ;;  %v6669_v29 = vrot.slane %v11834_v23, %v13399_v19  ;;  %v6685_v30 = vrot.slane %v11836_v26, %v13399_v19  ;;  %12538 = vmatprep.subr.mxu0 %v13140_v50 }
0x1726   :  { %v11829_v7 = vcombine.low %v6286_v39, %v6293_v40  ;;  %v11831_v58 = vcombine.high %v6286_v39, %v6293_v40  ;;  %v11833_v35 = vcombine.low %v6302_v31, %v6309_v33  ;;  %v11835_v60 = vcombine.high %v6302_v31, %v6309_v33  ;;  %12536 = vmatmul.mubr.msk.f32.vlgmr.msra.gmra.mrb[58].mxu0 %vm1162_vm4, %v6547_v8 }
0x1727   :  { %v6702_v0 = vcombine.low %v6637_v42, %v6653_v47  ;;  %v6703_v15 = vcombine.high %v6637_v42, %v6653_v47  ;;  %v6735_v37 = vcombine.high %v6669_v29, %v6685_v30  ;;  %12539 = vmatpush3.xpose.msk.msra.mxu0 %vm1162_vm4, %v6552_v9  ;;  %12540 = vmatprep.mubr.msk.f32.mxu0 %vm13141_vm3, %v13140_v50 }
0x1728   :  { %v6630_v44 = vrot.slane %v11829_v7, %v13399_v19  ;;  %v6646_v51 = vrot.slane %v11831_v58, %v13399_v19  ;;  %v6662_v32 = vrot.slane %v11833_v35, %v13399_v19  ;;  %v6678_v59 = vrot.slane %v11835_v60, %v13399_v19  ;;  %12543 = vmatprep.subr.mxu0 %v13140_v50  ;;  %v6005_v48 = vpop.permute.xlu1 %6004 }
0x1729   :  { %v6734_v3 = vcombine.low %v6669_v29, %v6685_v30  ;;  %v6146_v10 = vcombine.low %v5987_v6, %v5999_v34  ;;  %v6147_v55 = vcombine.high %v5987_v6, %v5999_v34  ;;  %v6529_v52 = vrot.slane %v6515_v36, %v13402_v25 }
0x172a   :  { %v6686_v54 = vcombine.low %v6630_v44, %v6646_v51  ;;  %v6687_v28 = vcombine.high %v6630_v44, %v6646_v51  ;;  %v6718_v61 = vcombine.low %v6662_v32, %v6678_v59  ;;  %v6553_v41 = vcombine.high %v14379_v11, %v14382_v17 }
0x172b   :  { %v6719_v43 = vcombine.high %v6662_v32, %v6678_v59  ;;  %v6154_v1 = vrot.slane %v6146_v10, %v13399_v19  ;;  %v6548_v49 = vcombine.low %v6497_v2, %v6529_v52  ;;  %v6717_v4 = vrot.slane %v6703_v15, %v13402_v25 }
0x172c   :  { %v6161_v5 = vrot.slane %v6147_v55, %v13399_v19  ;;  %v6749_v62 = vrot.slane %v6735_v37, %v13402_v25  ;;  %v6162_v63 = vcombine.low %v5993_v22, %v6005_v48  ;;  %v6163_v36 = vcombine.high %v5993_v22, %v6005_v48 }
0x172d   :  { %12541 = vmatmul.mubr.msk.f32.vlgmr.msra.gmra.mrb[60].mxu0 %vm1162_vm4, %v6548_v49  ;;  %v6710_v45 = vrot.slane %v6702_v0, %v13402_v25  ;;  %v6742_v6 = vrot.slane %v6734_v3, %v13402_v25  ;;  %v6694_v11 = vrot.slane %v6686_v54, %v13402_v25  ;;  %v6726_v17 = vrot.slane %v6718_v61, %v13402_v25 }
0x172e   :  { %12544 = vmatpush3.xpose.msk.msra.mxu0 %vm1162_vm4, %v6553_v41  ;;  %v6756_v8 = vcombine.low %v6717_v4, %v6749_v62  ;;  %v6170_v9 = vrot.slane %v6162_v63, %v13399_v19  ;;  %v6177_v12 = vrot.slane %v6163_v36, %v13399_v19  ;;  %12545 = vmatprep.mubr.msk.f32.mxu0 %vm13141_vm3, %v13140_v50 }
0x172f   :  { %12548 = vmatprep.subr.mxu0 %v13140_v50  ;;  %v6549_v13 = vcombine.high %v6497_v2, %v6529_v52  ;;  %v6754_v14 = vcombine.low %v6710_v45, %v6742_v6  ;;  %v6701_v57 = vrot.slane %v6687_v28, %v13402_v25  ;;  %v6750_v20 = vcombine.low %v6694_v11, %v6726_v17 }
0x1730   :  { %12559 = vmatpush3.xpose.msk.msra.mxu1 %vm1162_vm4, %v6756_v8  ;;  %v6178_v56 = vcombine.low %v6154_v1, %v6170_v9  ;;  %v6179_v27 = vcombine.high %v6154_v1, %v6170_v9  ;;  %v6194_v16 = vcombine.low %v6161_v5, %v6177_v12  ;;  %v6195_v18 = vcombine.high %v6161_v5, %v6177_v12 }
0x1731   :  { %12546 = vmatmul.mubr.msk.f32.vlgmr.msra.gmra.mrb[62].mxu0 %vm1162_vm4, %v6549_v13  ;;  %v6733_v21 = vrot.slane %v6719_v43, %v13402_v25  ;;  %12568 = vmatprep.subr.mxu1 %v13140_v50  ;;  %v6755_v31 = vcombine.high %v6710_v45, %v6742_v6  ;;  %v6751_v60 = vcombine.high %v6694_v11, %v6726_v17 }
0x1732   :  { %v6186_v23 = vrot.slane %v6178_v56, %v13402_v25  ;;  %v6193_v26 = vrot.slane %v6179_v27, %v13402_v25  ;;  %v6202_v39 = vrot.slane %v6194_v16, %v13402_v25  ;;  %v6209_v40 = vrot.slane %v6195_v18, %v13402_v25  ;;  %12549 = vmatpush3.xpose.msk.msra.mxu0 %vm1162_vm4, %v6754_v14 }
0x1733   :  { %12550 = vmatprep.mubr.msk.f32.mxu0 %vm13141_vm3, %v13140_v50  ;;  %12553 = vmatprep.subr.mxu0 %v13140_v50  ;;  %v6752_v33 = vcombine.low %v6701_v57, %v6733_v21  ;;  %v6757_v0 = vcombine.high %v6717_v4, %v6749_v62  ;;  %v6753_v3 = vcombine.high %v6701_v57, %v6733_v21 }
0x1734   :  { %v6554_v34 = vcombine.low %v6186_v23, %v6193_v26  ;;  %v11827_v42 = vcombine.high %v6186_v23, %v6193_v26  ;;  %v6570_v47 = vcombine.low %v6202_v39, %v6209_v40  ;;  %v11828_v29 = vcombine.high %v6202_v39, %v6209_v40 }
0x1735   :  { %12551 = vmatmul.mubr.msk.f32.vlgmr.msra.gmra.mrb[64].mxu0 %vm1162_vm4, %v6750_v20  ;;  %12561 = vmatmul.mubr.msk.f32.vlgmr.msra.gmra.mrb[38].mxu1 %vm1162_vm4, %v6752_v33 }
0x1736   :  { %v6561_v30 = vrot.slane %v6554_v34, %v13399_v19  ;;  %v6569_v7 = vrot.slane %v11827_v42, %v13399_v19  ;;  %v6577_v58 = vrot.slane %v6570_v47, %v13399_v19  ;;  %v6585_v35 = vrot.slane %v11828_v29, %v13399_v19  ;;  %12554 = vmatpush3.xpose.msk.msra.mxu0 %vm1162_vm4, %v6755_v31 }
0x1737   :  { %12555 = vmatprep.mubr.msk.f32.mxu0 %vm13141_vm3, %v13140_v50  ;;  %12563 = vmatprep.subr.mxu0 %v13140_v50 }
0x1738   :  { %v6586_v15 = vcombine.low %v6561_v30, %v6569_v7  ;;  %v6602_v37 = vcombine.low %v6577_v58, %v6585_v35  ;;  %12570 = vmatprep.mubr.msk.f32.mxu1 %vm13141_vm3, %v13140_v50  ;;  %v6587_v2 = vcombine.high %v6561_v30, %v6569_v7  ;;  %v6603_v44 = vcombine.high %v6577_v58, %v6585_v35 }
0x1739   :  { %12556 = vmatmul.mubr.msk.f32.vlgmr.msra.gmra.mrb[66].mxu0 %vm1162_vm4, %v6751_v60 }
0x173a   :  { %12564 = vmatpush3.xpose.msk.msra.mxu0 %vm1162_vm4, %v6757_v0  ;;  %12565 = vmatprep.mubr.msk.f32.mxu0 %vm13141_vm3, %v13140_v50  ;;  %v6594_v51 = vrot.slane %v6586_v15, %v13402_v25  ;;  %v6610_v32 = vrot.slane %v6602_v37, %v13402_v25  ;;  %v14474_v59 = vrot.slane %v6587_v2, %v13402_v25 }
0x173b   :  { %12573 = vmatprep.subr.mxu0 %v13140_v50  ;;  %v14478_v10 = vrot.slane %v6603_v44, %v13402_v25 }
0x173c   :  { %v6618_v55 = vcombine.low %v6594_v51, %v6610_v32  ;;  %v6619_v52 = vcombine.high %v6594_v51, %v6610_v32  ;;  %v5989_v51 = vpop.permute.xlu1 %5988 }
0x173d   :  { %12566 = vmatmul.mubr.msk.f32.vlgmr.msra.gmra.mrb[68].mxu0 %vm1162_vm4, %v6753_v3  ;;  %v6620_v48 = vcombine.low %v14474_v59, %v14478_v10  ;;  %v6621_v54 = vcombine.high %v14474_v59, %v14478_v10 }
0x173e   :  { %12569 = vmatpush3.msra.mxu1 %v6618_v55  ;;  %12574 = vmatpush3.msra.mxu0 %v6619_v52 }
0x173f   :  { %12578 = vmatprep.subr.mxu1 %v13140_v50  ;;  %12575 = vmatprep.mubr.msk.f32.mxu0 %vm13141_vm3, %v13140_v50 }
0x1740   :  { %12583 = vmatprep.subr.mxu0 %v13140_v50 }
0x17f5   :  { %v6898_v28 = vpop.f32.mrb[56].mxu0 }
0x17f6   :  { %v6899_v61 = vadd.f32 %v6898_v28, %v13556_v53  ;;  %v12532_v41 = vpop.f32.mrb[57].mxu0 }
0x17f8   :  { %v7434_v22 = vmul.f32 1.442695, %v6899_v61 }
0x17f9   :  { %v6974_v43 = vpop.f32.mrb[58].mxu0 }
0x17fa   :  { %13034 = vpow2.f32 %v7434_v22  ;;  %v6975_v1 = vadd.f32 %v6974_v43, %v13556_v53  ;;  %v12537_v49 = vpop.f32.mrb[59].mxu0 }
0x17fc   :  { %v7436_v4 = vmul.f32 1.442695, %v6975_v1 }
0x17fe   :  { %13036 = vpow2.f32 %v7436_v4 }
0x1800   :  { %v7050_v5 = vpop.f32.mrb[60].mxu0 }
0x1801   :  { %v12542_v62 = vpop.f32.mrb[61].mxu0  ;;  %v7051_v17 = vadd.f32 %v7050_v5, %v13556_v53 }
0x1803   :  { %v7438_v27 = vmul.f32 1.442695, %v7051_v17 }
0x1804   :  { %v13035_v63 = vpop.eup %13034  ;;  %v7126_v36 = vpop.f32.mrb[62].mxu0 }
0x1805   :  { %v12547_v45 = vpop.f32.mrb[63].mxu0  ;;  %v7450_v6 = vsel %vm1162_vm4, %v13035_v63, 0.0  ;;  %v7127_v16 = vadd.f32 %v7126_v36, %v13556_v53 }
0x1806   :  { %7451 = vadd.xlane.f32.xlu0 %v7450_v6 }
0x1807   :  { %v7440_v26 = vmul.f32 1.442695, %v7127_v16 }
0x1808   :  { %v13037_v11 = vpop.eup %13036  ;;  %v7202_v8 = vpop.f32.mrb[64].mxu0 }
0x1809   :  { %v7354_v9 = vpop.f32.mrb[38].mxu1  ;;  %v12552_v14 = vpop.f32.mrb[65].mxu0  ;;  %v7453_v57 = vsel %vm1162_vm4, %v13037_v11, 0.0  ;;  %v7203_v39 = vadd.f32 %v7202_v8, %v13556_v53 }
0x180a   :  { %v7355_v12 = vadd.f32 %v7354_v9, %v13556_v53  ;;  %v12562_v13 = vpop.f32.mrb[39].mxu1  ;;  %7454 = vadd.xlane.f32.xlu1 %v7453_v57 }
0x180b   :  { %v7442_v33 = vmul.f32 1.442695, %v7203_v39 }
0x180c   :  { %v7446_v56 = vmul.f32 1.442695, %v7355_v12  ;;  %v7278_v18 = vpop.f32.mrb[66].mxu0 }
0x180d   :  { %v7279_v20 = vadd.f32 %v7278_v18, %v13556_v53  ;;  %v12557_v21 = vpop.f32.mrb[67].mxu0 }
0x180e   :  { %13038 = vpow2.f32 %v7446_v56 }
0x180f   :  { %v7444_v23 = vmul.f32 1.442695, %v7279_v20  ;;  %13040 = vpow2.f32 %v7438_v27 }
0x1810   :  { %v7430_v40 = vpop.f32.mrb[68].mxu0 }
0x1811   :  { %13042 = vpow2.f32 %v7444_v23  ;;  %v12567_v31 = vpop.f32.mrb[69].mxu0  ;;  %v7431_v34 = vadd.f32 %v7430_v40, %v13556_v53 }
0x1812   :  { %13044 = vpow2.f32 %v7440_v26 }
0x1813   :  { %13046 = vpow2.f32 %v7442_v33  ;;  %v7448_v47 = vmul.f32 1.442695, %v7431_v34 }
0x1815   :  { %13048 = vpow2.f32 %v7448_v47 }
0x1818   :  { %v14499_v42 = vpop.eup %13038 }
0x1819   :  { %v7468_v29 = vsel %vm1162_vm4, %v14499_v42, 0.0  ;;  %v13041_v30 = vpop.eup %13040 }
0x181a   :  { %7469 = vadd.xlane.f32.xlu0 %v7468_v29  ;;  %v7456_v35 = vsel %vm1162_vm4, %v13041_v30, 0.0 }
0x181b   :  { %v14503_v7 = vpop.eup %13042 }
0x181c   :  { %v7465_v58 = vsel %vm1162_vm4, %v14503_v7, 0.0  ;;  %v13045_v60 = vpop.eup %13044 }
0x181d   :  { %7466 = vadd.xlane.f32.xlu1 %v7465_v58  ;;  %v7459_v0 = vsel %vm1162_vm4, %v13045_v60, 0.0  ;;  %v14509_v15 = vpop.eup %13046 }
0x181e   :  { %7457 = vadd.xlane.f32.xlu0 %v7456_v35  ;;  %v7462_v37 = vsel %vm1162_vm4, %v14509_v15, 0.0 }
0x181f   :  { %v14513_v2 = vpop.eup %13048 }
0x1820   :  { %v7471_v44 = vsel %vm1162_vm4, %v14513_v2, 0.0 }
0x1822   :  { %7460 = vadd.xlane.f32.xlu0 %v7459_v0 }
0x1826   :  { %7463 = vadd.xlane.f32.xlu0 %v7462_v37 }
0x182a   :  { %7472 = vadd.xlane.f32.xlu0 %v7471_v44 }
0x182e   :  { %6000 = vrot.lane.b32.xlu1 %v14303_v24, %s15306_s27 }
0x1832   :  { %6006 = vrot.lane.b32.xlu1 %v14303_v24, %s15307_s26 }
0x1840   :  { %5994 = vrot.lane.b32.xlu0 %v14303_v24, %s15317_s13 }
0x1893   :  { %v7452_v32 = vpop.xlane.xlu0 %7451 }
0x1894   :  { %13050 = vrcp.f32 %v7452_v32 }
0x1897   :  { %v7455_v3 = vpop.xlane.xlu1 %7454 }
0x1898   :  { %13052 = vrcp.f32 %v7455_v3 }
0x189e   :  { %v13051_v55 = vpop.eup %13050 }
0x189f   :  { %v7482_v52 = vmul.f32 %v13051_v55, %v13035_v63 }
0x18a1   :  { %12571 = vmatmul.mubr.msk.f32.vlgmr.msra.gmra.mrb[48].mxu1 %vm1162_vm4, %v7482_v52 }
0x18a2   :  { %v13053_v28 = vpop.eup %13052  ;;  %12579 = vmatpush3.msra.mxu1 %v6620_v48  ;;  %12580 = vmatprep.mubr.msk.f32.mxu1 %vm13141_vm3, %v13140_v50 }
0x18a3   :  { %v7483_v61 = vmul.f32 %v13053_v28, %v13037_v11  ;;  %12588 = vmatprep.subr.mxu1 %v13140_v50 }
0x18a5   :  { %12576 = vmatmul.mubr.msk.f32.vlgmr.msra.gmra.mrb[70].mxu0 %vm1162_vm4, %v7483_v61 }
0x18a6   :  { %12584 = vmatpush3.msra.mxu0 %v6621_v54  ;;  %12585 = vmatprep.mubr.msk.f32.mxu0 %vm13141_vm3, %v13140_v50 }
0x18a7   :  { %v7470_v24 = vpop.xlane.xlu0 %7469  ;;  %12593 = vmatprep.subr.mxu0 %v13140_v50 }
0x18aa   :  { %v7467_v48 = vpop.xlane.xlu1 %7466 }
0x18ab   :  { %v7458_v41 = vpop.xlane.xlu0 %7457 }
0x18ac   :  { %13054 = vrcp.f32 %v7458_v41 }
0x18ae   :  { %v6001_v1 = vpop.permute.xlu1 %6000 }
0x18af   :  { %v7461_v22 = vpop.xlane.xlu0 %7460  ;;  %v6350_v10 = vcombine.low %v5989_v51, %v6001_v1  ;;  %v6351_v54 = vcombine.high %v5989_v51, %v6001_v1 }
0x18b0   :  { %13056 = vrcp.f32 %v7461_v22 }
0x18b1   :  { %13058 = vrcp.f32 %v7467_v48  ;;  %v6358_v11 = vrot.slane %v6350_v10, %v13399_v19  ;;  %v6365_v17 = vrot.slane %v6351_v54, %v13399_v19 }
0x18b2   :  { %v6007_v63 = vpop.permute.xlu1 %6006 }
0x18b3   :  { %v7464_v43 = vpop.xlane.xlu0 %7463 }
0x18b4   :  { %13060 = vrcp.f32 %v7464_v43 }
0x18b5   :  { %13062 = vrcp.f32 %v7470_v24 }
0x18b6   :  { %v13055_v49 = vpop.eup %13054 }
0x18b7   :  { %v7484_v4 = vmul.f32 %v13055_v49, %v13041_v30  ;;  %v7473_v5 = vpop.xlane.xlu0 %7472 }
0x18b8   :  { %13064 = vrcp.f32 %v7473_v5 }
0x18b9   :  { %12581 = vmatmul.mubr.msk.f32.vlgmr.msra.gmra.mrb[50].mxu1 %vm1162_vm4, %v7484_v4 }
0x18ba   :  { %v13057_v59 = vpop.eup %13056  ;;  %12590 = vmatprep.mubr.msk.f32.mxu1 %vm13141_vm3, %v13140_v50 }
0x18bb   :  { %v7485_v62 = vmul.f32 %v13057_v59, %v13045_v60  ;;  %v5995_v36 = vpop.permute.xlu0 %5994  ;;  %v13059_v34 = vpop.eup %13058 }
0x18bc   :  { %v6366_v45 = vcombine.low %v5995_v36, %v6007_v63  ;;  %v6367_v6 = vcombine.high %v5995_v36, %v6007_v63  ;;  %v7487_v52 = vmul.f32 %v13059_v34, %v14503_v7 }
0x18bd   :  { %12586 = vmatmul.mubr.msk.f32.vlgmr.msra.gmra.mrb[72].mxu0 %vm1162_vm4, %v7485_v62 }
0x18be   :  { %v6374_v8 = vrot.slane %v6366_v45, %v13399_v19  ;;  %v6381_v9 = vrot.slane %v6367_v6, %v13399_v19  ;;  %12595 = vmatprep.mubr.msk.f32.mxu0 %vm13141_vm3, %v13140_v50  ;;  %v13061_v35 = vpop.eup %13060 }
0x18bf   :  { %v13063_v37 = vpop.eup %13062  ;;  %v7486_v28 = vmul.f32 %v13061_v35, %v14509_v15 }
0x18c0   :  { %v6382_v12 = vcombine.low %v6358_v11, %v6374_v8  ;;  %v6383_v13 = vcombine.high %v6358_v11, %v6374_v8  ;;  %v6398_v14 = vcombine.low %v6365_v17, %v6381_v9  ;;  %v6399_v57 = vcombine.high %v6365_v17, %v6381_v9 }
0x18c1   :  { %v7488_v41 = vmul.f32 %v13063_v37, %v14499_v42 }
0x18c2   :  { %v6390_v56 = vrot.slane %v6382_v12, %v13402_v25  ;;  %v6397_v27 = vrot.slane %v6383_v13, %v13402_v25  ;;  %v6406_v16 = vrot.slane %v6398_v14, %v13402_v25  ;;  %v6413_v18 = vrot.slane %v6399_v57, %v13402_v25  ;;  %v13065_v55 = vpop.eup %13064 }
0x18c3   :  { %v7489_v48 = vmul.f32 %v13065_v55, %v14513_v2 }
0x18c4   :  { %v6758_v20 = vcombine.low %v6390_v56, %v6397_v27  ;;  %v11837_v21 = vcombine.high %v6390_v56, %v6397_v27  ;;  %v6774_v23 = vcombine.low %v6406_v16, %v6413_v18  ;;  %v11838_v26 = vcombine.high %v6406_v16, %v6413_v18 }
0x18c6   :  { %v6765_v39 = vrot.slane %v6758_v20, %v13399_v19  ;;  %v6773_v40 = vrot.slane %v11837_v21, %v13399_v19  ;;  %v6781_v31 = vrot.slane %v6774_v23, %v13399_v19  ;;  %v6789_v33 = vrot.slane %v11838_v26, %v13399_v19 }
0x18c8   :  { %v6790_v47 = vcombine.low %v6765_v39, %v6773_v40  ;;  %v6806_v29 = vcombine.low %v6781_v31, %v6789_v33  ;;  %v6791_v30 = vcombine.high %v6765_v39, %v6773_v40  ;;  %v6807_v58 = vcombine.high %v6781_v31, %v6789_v33 }
0x18ca   :  { %v6798_v60 = vrot.slane %v6790_v47, %v13402_v25  ;;  %v6814_v0 = vrot.slane %v6806_v29, %v13402_v25  ;;  %v6805_v44 = vrot.slane %v6791_v30, %v13402_v25  ;;  %v6821_v51 = vrot.slane %v6807_v58, %v13402_v25 }
0x18cc   :  { %v6822_v32 = vcombine.low %v6798_v60, %v6814_v0  ;;  %v6823_v3 = vcombine.high %v6798_v60, %v6814_v0  ;;  %v6824_v61 = vcombine.low %v6805_v44, %v6821_v51  ;;  %v6825_v24 = vcombine.high %v6805_v44, %v6821_v51 }
0x18ce   :  { %12589 = vmatpush3.msra.mxu1 %v6822_v32  ;;  %12594 = vmatpush3.msra.mxu0 %v6823_v3 }
0x18cf   :  { %12591 = vmatmul.mubr.msk.f32.vlgmr.msra.gmra.mrb[52].mxu1 %vm1162_vm4, %v7486_v28  ;;  %12596 = vmatmul.mubr.msk.f32.vlgmr.msra.gmra.mrb[74].mxu0 %vm1162_vm4, %v7487_v52 }
0x18d0   :  { %12598 = vmatprep.subr.mxu1 %v13140_v50  ;;  %12603 = vmatprep.subr.mxu0 %v13140_v50 }
0x18d1   :  { %12599 = vmatpush3.msra.mxu1 %v6824_v61  ;;  %12604 = vmatpush3.msra.mxu0 %v6825_v24 }
0x18d2   :  { %12600 = vmatprep.mubr.msk.f32.mxu1 %vm13141_vm3, %v13140_v50  ;;  %12605 = vmatprep.mubr.msk.f32.mxu0 %vm13141_vm3, %v13140_v50 }
0x18d3   :  { %12601 = vmatmul.mubr.msk.f32.vlgmr.msra.gmra.mrb[54].mxu1 %vm1162_vm4, %v7488_v41  ;;  %12606 = vmatmul.mubr.msk.f32.vlgmr.msra.gmra.mrb[76].mxu0 %vm1162_vm4, %v7489_v48 }
0x18d4   :  { %12608 = vmatprep.subr.bf16.mxu1 %v13140_v50  ;;  %12612 = vmatprep.mubr.msk.bf16.mxu1 %vm13141_vm3, %v13140_v50 }
0x18d5   :  { %12616 = vmatprep.subr.bf16.mxu0 %v13140_v50  ;;  %12620 = vmatprep.mubr.msk.bf16.mxu0 %vm13141_vm3, %v13140_v50 }
0x1974   :  { %v7559_v42 = vpop.f32.mrb[48].mxu1 }
0x1975   :  { %v12572_v7 = vpop.f32.mrb[49].mxu1 }
0x1978   :  { %v7632_v15 = vpop.f32.mrb[70].mxu0 }
0x1979   :  { %v12577_v2 = vpop.f32.mrb[71].mxu0 }
0x198c   :  { %v7705_v22 = vpop.f32.mrb[50].mxu1 }
0x198d   :  { %v8074_v43 = vcombine.low %v7559_v42, %v7705_v22  ;;  %v8075_v1 = vcombine.high %v7559_v42, %v7705_v22  ;;  %v12582_v49 = vpop.f32.mrb[51].mxu1 }
0x198f   :  { %v8082_v54 = vrot.slane %v8074_v43, %v13399_v19  ;;  %v8089_v62 = vrot.slane %v8075_v1, %v13399_v19 }
0x1990   :  { %v7778_v4 = vpop.f32.mrb[72].mxu0 }
0x1991   :  { %v8090_v5 = vcombine.low %v7632_v15, %v7778_v4  ;;  %v8091_v59 = vcombine.high %v7632_v15, %v7778_v4  ;;  %v12587_v10 = vpop.f32.mrb[73].mxu0 }
0x1993   :  { %v8098_v63 = vrot.slane %v8090_v5, %v13399_v19  ;;  %v8105_v36 = vrot.slane %v8091_v59, %v13399_v19 }
0x1995   :  { %v8106_v45 = vcombine.low %v8082_v54, %v8098_v63  ;;  %v8107_v6 = vcombine.high %v8082_v54, %v8098_v63  ;;  %v8122_v11 = vcombine.low %v8089_v62, %v8105_v36  ;;  %v8123_v17 = vcombine.high %v8089_v62, %v8105_v36  ;;  %v12922_v63 = vld [vmem:[%s15242_s4 + $0x20] sm:$0xff]  }
0x1996   :  { %12609 = vmatpush3.bf16.msra.mxu1 %v12922_v63  ;;  %v12926_v63 = vld [vmem:[%s15250_s12 + $0x80] sm:$0xff]  }
0x1997   :  { %v8114_v8 = vrot.slane %v8106_v45, %v13402_v25  ;;  %v8121_v9 = vrot.slane %v8107_v6, %v13402_v25  ;;  %v8130_v12 = vrot.slane %v8122_v11, %v13402_v25  ;;  %v8137_v13 = vrot.slane %v8123_v17, %v13402_v25  ;;  %12610 = vmatprep.subr.bf16.mxu1 %v13140_v50 }
0x1999   :  { %v8210_v14 = vcombine.low %v8114_v8, %v8121_v9  ;;  %v11863_v57 = vcombine.high %v8114_v8, %v8121_v9  ;;  %v8226_v56 = vcombine.low %v8130_v12, %v8137_v13  ;;  %v11864_v27 = vcombine.high %v8130_v12, %v8137_v13 }
0x199b   :  { %v8217_v16 = vrot.slane %v8210_v14, %v13399_v19  ;;  %v8225_v18 = vrot.slane %v11863_v57, %v13399_v19  ;;  %v8233_v20 = vrot.slane %v8226_v56, %v13399_v19  ;;  %v8241_v21 = vrot.slane %v11864_v27, %v13399_v19  ;;  %v12923_v27 = vld [vmem:[%s15242_s4 + $0x28] sm:$0xff]  }
0x199c   :  { %12611 = vmatpush3.bf16.msra.mxu1 %v12923_v27  ;;  %v11875_v27 = vld [vmem:[%s15246_s8 + $0x2] ss:$0 sm:$0xff] }
0x199d   :  { %v8243_v23 = vcombine.high %v8217_v16, %v8225_v18  ;;  %v8259_v26 = vcombine.high %v8233_v20, %v8241_v21  ;;  %v8242_v39 = vcombine.low %v8217_v16, %v8225_v18  ;;  %v8258_v40 = vcombine.low %v8233_v20, %v8241_v21  ;;  %12624 = vmatprep.subr.bf16.mxu1 %v13140_v50 }
0x199f   :  { %v8257_v31 = vrot.slane %v8243_v23, %v13402_v25  ;;  %v8273_v33 = vrot.slane %v8259_v26, %v13402_v25  ;;  %v14594_v34 = vrot.slane %v8242_v39, %v13402_v25  ;;  %v14597_v47 = vrot.slane %v8258_v40, %v13402_v25 }
0x19a1   :  { %v8276_v29 = vcombine.low %v8257_v31, %v8273_v33  ;;  %v8275_v30 = vcombine.high %v14594_v34, %v14597_v47  ;;  %v8277_v58 = vcombine.high %v8257_v31, %v8273_v33  ;;  %v8274_v35 = vcombine.low %v14594_v34, %v14597_v47  ;;  %v11874_v47 = vld [vmem:[%s15243_s5 + $0x2] ss:$0 sm:$0xff] }
0x19a2   :  { %v7851_v60 = vpop.f32.mrb[52].mxu1  ;;  %v7924_v0 = vpop.f32.mrb[74].mxu0 }
0x19a3   :  { %v12592_v37 = vpop.f32.mrb[53].mxu1  ;;  %v12597_v44 = vpop.f32.mrb[75].mxu0 }
0x19a6   :  { %v7997_v51 = vpop.f32.mrb[54].mxu1  ;;  %v8070_v32 = vpop.f32.mrb[76].mxu0 }
0x19a7   :  { %v8142_v3 = vcombine.low %v7851_v60, %v7997_v51  ;;  %v8143_v55 = vcombine.high %v7851_v60, %v7997_v51  ;;  %v8158_v52 = vcombine.low %v7924_v0, %v8070_v32  ;;  %v8159_v28 = vcombine.high %v7924_v0, %v8070_v32  ;;  %v12602_v61 = vpop.f32.mrb[55].mxu1  ;;  %v12607_v24 = vpop.f32.mrb[77].mxu0 }
0x19a9   :  { %v8150_v41 = vrot.slane %v8142_v3, %v13399_v19  ;;  %v8157_v48 = vrot.slane %v8143_v55, %v13399_v19  ;;  %v8166_v42 = vrot.slane %v8158_v52, %v13399_v19  ;;  %v8173_v7 = vrot.slane %v8159_v28, %v13399_v19 }
0x19ab   :  { %v8174_v15 = vcombine.low %v8150_v41, %v8166_v42  ;;  %v8175_v2 = vcombine.high %v8150_v41, %v8166_v42  ;;  %v8190_v22 = vcombine.low %v8157_v48, %v8173_v7  ;;  %v8191_v43 = vcombine.high %v8157_v48, %v8173_v7 }
0x19ad   :  { %v8182_v1 = vrot.slane %v8174_v15, %v13402_v25  ;;  %v8189_v49 = vrot.slane %v8175_v2, %v13402_v25  ;;  %v8198_v4 = vrot.slane %v8190_v22, %v13402_v25  ;;  %v8205_v5 = vrot.slane %v8191_v43, %v13402_v25 }
0x19af   :  { %v8278_v59 = vcombine.low %v8182_v1, %v8189_v49  ;;  %v11865_v10 = vcombine.high %v8182_v1, %v8189_v49  ;;  %v8294_v54 = vcombine.low %v8198_v4, %v8205_v5  ;;  %v11866_v62 = vcombine.high %v8198_v4, %v8205_v5 }
0x19b1   :  { %v8285_v36 = vrot.slane %v8278_v59, %v13399_v19  ;;  %v8293_v45 = vrot.slane %v11865_v10, %v13399_v19  ;;  %v8301_v6 = vrot.slane %v8294_v54, %v13399_v19  ;;  %v8309_v11 = vrot.slane %v11866_v62, %v13399_v19  ;;  %v12924_v54 = vld [vmem:[%s15248_s10 + $0x20] sm:$0xff]   ;;  %v12925_v62 = vld [vmem:[%s15248_s10 + $0x28] sm:$0xff]  }
0x19b2   :  { %12617 = vmatpush3.bf16.msra.mxu0 %v12924_v54 }
0x19b3   :  { %v8311_v17 = vcombine.high %v8285_v36, %v8293_v45  ;;  %v8327_v8 = vcombine.high %v8301_v6, %v8309_v11  ;;  %v8310_v9 = vcombine.low %v8285_v36, %v8293_v45  ;;  %v8326_v12 = vcombine.low %v8301_v6, %v8309_v11  ;;  %12618 = vmatprep.subr.bf16.mxu0 %v13140_v50  ;;  %v12927_v36 = vld [vmem:[%s15250_s12 + $0x88] sm:$0xff]   ;;  %v12928_v45 = vld [vmem:[%s15250_s12 + $0x90] sm:$0xff]   ;;  %v12929_v6 = vld [vmem:[%s15250_s12 + $0x98] sm:$0xff]  }
0x19b4   :  { %v12930_v11 = vld [vmem:[%s15250_s12 + $0xa0] sm:$0xff]  }
0x19b5   :  { %v8325_v13 = vrot.slane %v8311_v17, %v13402_v25  ;;  %v8341_v14 = vrot.slane %v8327_v8, %v13402_v25  ;;  %v8318_v57 = vrot.slane %v8310_v9, %v13402_v25  ;;  %v8334_v56 = vrot.slane %v8326_v12, %v13402_v25  ;;  %v12931_v17 = vld [vmem:[%s15250_s12 + $0xa8] sm:$0xff]  }
0x19b6   :  { %12619 = vmatpush3.bf16.msra.mxu0 %v12925_v62 }
0x19b7   :  { %v8344_v16 = vcombine.low %v8325_v13, %v8341_v14  ;;  %v8343_v18 = vcombine.high %v8318_v57, %v8334_v56  ;;  %v8345_v20 = vcombine.high %v8325_v13, %v8341_v14  ;;  %v8342_v21 = vcombine.low %v8318_v57, %v8334_v56  ;;  %12644 = vmatprep.subr.bf16.mxu0 %v13140_v50 }
0x19b9   :  { %v12867_v23 = vpack.i.bf16 %v8344_v16, %v8276_v29  ;;  %v12862_v26 = vpack.i.bf16 %v8343_v18, %v8275_v30  ;;  %v12872_v39 = vpack.i.bf16 %v8345_v20, %v8277_v58 }
0x19bb   :  { %12868 = vrot.lane.b32.xlu1 %v12867_v23, %s15308_s24  ;;  %12863 = vrot.lane.b32.xlu0 %v12862_v26, %s15309_s25  ;;  %v11876_v23 = vld [vmem:[%s15247_s9 + $0x2] ss:$0 sm:$0xff] }
0x19bf   :  { %12873 = vrot.lane.b32.xlu0 %v12872_v39, %s15310_s20 }
0x1a2d   :  { %v12869_v40 = vpop.permute.xlu1 %12868  ;;  %v12864_v31 = vpop.permute.xlu0 %12863 }
0x1a2e   :  { %v12866_v33 = vunpack.i.h.bf16 %v12864_v31  ;;  %v12865_v60 = vunpack.i.l.bf16 %v12864_v31  ;;  %v12871_v0 = vunpack.i.h.bf16 %v12869_v40  ;;  %v12870_v37 = vunpack.i.l.bf16 %v12869_v40 }
0x1a30   :  { %v8370_v44 = vsel %vm1162_vm4, %v8274_v35, %v12865_v60  ;;  %v8371_v29 = vsel %vm1162_vm4, %v8342_v21, %v12866_v33  ;;  %v12932_v33 = vld [vmem:[%s15250_s12 + $0xb0] sm:$0xff]   ;;  %v12933_v60 = vld [vmem:[%s15250_s12 + $0xb8] sm:$0xff]  }
0x1a31   :  { %v12874_v30 = vpop.permute.xlu0 %12873  ;;  %v8372_v32 = vsel %vm2709_vm6, %v8370_v44, %v12870_v37  ;;  %v8373_v3 = vsel %vm2709_vm6, %v8371_v29, %v12871_v0  ;;  %v11881_v0 = vld [vmem:[%s15249_s11 + $0x2] ss:$0 sm:$0xff] }
0x1a32   :  { %v12876_v58 = vunpack.i.h.bf16 %v12874_v30  ;;  %v12875_v51 = vunpack.i.l.bf16 %v12874_v30 }
0x1a34   :  { %v8374_v55 = vsel %vm2712_vm7, %v8372_v32, %v12875_v51  ;;  %v8375_v52 = vsel %vm2712_vm7, %v8373_v3, %v12876_v58 }
0x1a35   :  { %v8376_v28 = vpack.c.bf16 %v8375_v52, %v8374_v55 }
0x1a37   :  { %12613 = vmatmul.mubr.msk.bf16.vlgmr.msra.gmra.mrb[56].mxu1 %vm177_vm2, %v8376_v28  ;;  %v11909_v28 = vld [vmem:[%s15304_s28 + $0x2] ss:$0 sm:$0xff] }
0x1a38   :  { %12640 = vmatprep.mubr.msk.bf16.mxu1 %vm13141_vm3, %v13140_v50  ;;  %12625 = vmatpush3.bf16.msra.mxu1 %v12926_v63 }
0x1a39   :  { %12626 = vmatprep.subr.bf16.mxu1 %v13140_v50 }
0x1a3c   :  { %12627 = vmatpush3.bf16.msra.mxu1 %v12927_v36 }
0x1a3d   :  { %12628 = vmatprep.subr.bf16.mxu1 %v13140_v50 }
0x1a40   :  { %12629 = vmatpush3.bf16.msra.mxu1 %v12928_v45 }
0x1a41   :  { %12630 = vmatprep.subr.bf16.mxu1 %v13140_v50 }
0x1a44   :  { %12631 = vmatpush3.bf16.msra.mxu1 %v12929_v6 }
0x1a45   :  { %12632 = vmatprep.subr.bf16.mxu1 %v13140_v50 }
0x1a48   :  { %12633 = vmatpush3.bf16.msra.mxu1 %v12930_v11 }
0x1a49   :  { %12634 = vmatprep.subr.bf16.mxu1 %v13140_v50 }
0x1a4c   :  { %12635 = vmatpush3.bf16.msra.mxu1 %v12931_v17  ;;  %v11910_v17 = vld [vmem:[%s15244_s6 + $0x3] ss:$0 sm:$0xff] }
0x1a4d   :  { %12636 = vmatprep.subr.bf16.mxu1 %v13140_v50 }
0x1a50   :  { %12637 = vmatpush3.bf16.msra.mxu1 %v12932_v33 }
0x1a51   :  { %12638 = vmatprep.subr.bf16.mxu1 %v13140_v50 }
0x1a54   :  { %12639 = vmatpush3.bf16.msra.mxu1 %v12933_v60 }
0x1a55   :  { %12682 = vmatprep.subr.mxu1 %v13140_v50 }
0x1b0a   :  { %v8431_v34 = vpop.f32.mrb[56].mxu1 }
0x1b0b   :  { %v8438_v35 = vadd.f32 %v8431_v34, %v14271_v46  ;;  %v12614_v61 = vpop.f32.mrb[57].mxu1 }
0x1b0c   :  { %v8434_v24 = vpop.f32.mrb[58].mxu1 }
0x1b0d   :  { %v14646_v41 = vadd.f32 %v11874_v47, %v8438_v35  ;;  %v8439_v48 = vadd.f32 %v8434_v24, %v14274_v38  ;;  %v12615_v42 = vpop.f32.mrb[59].mxu1 }
0x1b0f   :  { %v14649_v7 = vadd.f32 %v11874_v47, %v8439_v48  ;;  %v8449_v15 = vsel %vm177_vm2, %v14646_v41, 0.0 }
0x1b10   :  { %8450 = vadd.xlane.f32.xlu1 %v8449_v15 }
0x1b11   :  { %v8452_v2 = vsel %vm177_vm2, %v14649_v7, 0.0 }
0x1b12   :  { %8453 = vadd.xlane.f32.xlu0 %v8452_v2 }
0x1b9d   :  { %v8451_v22 = vpop.xlane.xlu1 %8450 }
0x1b9e   :  { %v8455_v43 = vmul.f32 0.03125, %v8451_v22 }
0x1b9f   :  { %v8454_v46 = vpop.xlane.xlu0 %8453 }
0x1ba0   :  { %v8457_v1 = vsub.f32 %v14646_v41, %v8455_v43  ;;  %v8456_v49 = vmul.f32 0.03125, %v8454_v46 }
0x1ba2   :  { %v8458_v4 = vsub.f32 %v14649_v7, %v8456_v49  ;;  %v8459_v38 = vmul.f32 %v8457_v1, %v8457_v1 }
0x1ba4   :  { %v8461_v5 = vsel %vm177_vm2, %v8459_v38, 0.0  ;;  %v8460_v59 = vmul.f32 %v8458_v4, %v8458_v4 }
0x1ba5   :  { %8462 = vadd.xlane.f32.xlu0 %v8461_v5 }
0x1ba6   :  { %v8464_v10 = vsel %vm177_vm2, %v8460_v59, 0.0  ;;  %v12934_v59 = vld [vmem:[%s15241_s3 + $0x30] sm:$0xff]  }
0x1ba7   :  { %8465 = vadd.xlane.f32.xlu1 %v8464_v10  ;;  %v12935_v10 = vld [vmem:[%s15241_s3 + $0x38] sm:$0xff]  }
0x1c32   :  { %v8463_v8 = vpop.xlane.xlu0 %8462 }
0x1c33   :  { %v8467_v9 = vmul.f32 0.03125, %v8463_v8 }
0x1c34   :  { %v8466_v12 = vpop.xlane.xlu1 %8465 }
0x1c35   :  { %v8469_v13 = vadd.f32 1e-05, %v8467_v9  ;;  %v8468_v14 = vmul.f32 0.03125, %v8466_v12 }
0x1c37   :  { %13066 = vrsqrt.f32 %v8469_v13  ;;  %v8470_v57 = vadd.f32 1e-05, %v8468_v14  ;;  %v11911_v14 = vld [vmem:[%s15245_s7 + $0x3] ss:$0 sm:$0xff] }
0x1c39   :  { %13068 = vrsqrt.f32 %v8470_v57 }
0x1c41   :  { %v13067_v56 = vpop.eup %13066 }
0x1c42   :  { %v8473_v16 = vmul.f32 %v13067_v56, %v8457_v1 }
0x1c43   :  { %v13069_v18 = vpop.eup %13068 }
0x1c44   :  { %v8479_v20 = vmul.f32 %v11875_v27, %v8473_v16  ;;  %v8474_v21 = vmul.f32 %v13069_v18, %v8458_v4 }
0x1c46   :  { %v8480_v26 = vmul.f32 %v11875_v27, %v8474_v21  ;;  %v8485_v39 = vadd.f32 %v11876_v23, %v8479_v20 }
0x1c48   :  { %v8486_v40 = vadd.f32 %v11876_v23, %v8480_v26 }
0x1c4a   :  { %v8487_v31 = vpack.c.bf16 %v8486_v40, %v8485_v39 }
0x1c4c   :  { %12621 = vmatmul.mubr.msk.bf16.vlgmr.msra.gmra.mrb[80].mxu0 %vm177_vm2, %v8487_v31 }
0x1c4d   :  { %12648 = vmatprep.mubr.msk.bf16.mxu0 %vm13141_vm3, %v13140_v50  ;;  %12645 = vmatpush3.bf16.msra.mxu0 %v12934_v59 }
0x1c4e   :  { %12646 = vmatprep.subr.bf16.mxu0 %v13140_v50 }
0x1c51   :  { %12647 = vmatpush3.bf16.msra.mxu0 %v12935_v10 }
0x1c52   :  { %12652 = vmatprep.subr.mxu0 %v13140_v50 }
0x1d1f   :  { %v8547_v37 = vpop.f32.mrb[80].mxu0 }
0x1d20   :  { %v8548_v44 = vadd.f32 %v11881_v0, %v8547_v37  ;;  %v12622_v29 = vpop.f32.mrb[81].mxu0 }
0x1d21   :  { %v8550_v30 = vpop.f32.mrb[82].mxu0 }
0x1d22   :  { %v8551_v58 = vadd.f32 %v11881_v0, %v8550_v30  ;;  %v12623_v51 = vpop.f32.mrb[83].mxu0  ;;  %v8554_v32 = vmax.f32 %v8548_v44, 0.0 }
0x1d24   :  { %v8555_v3 = vmax.f32 %v8551_v58, 0.0 }
0x1d26   :  { %v8556_v55 = vpack.c.bf16 %v8555_v3, %v8554_v32 }
0x1d28   :  { %12641 = vmatmul.mubr.bf16.vlgmr.msra.gmra.mrb[60].mxu1 %v8556_v55 }
0x1d29   :  { %12684 = vmatprep.mubr.msk.f32.mxu1 %vm13141_vm3, %v13140_v50 }
0x1dfb   :  { %v8656_v52 = vpop.f32.mrb[60].mxu1 }
0x1dfc   :  { %v8663_v34 = vadd.f32 %v8656_v52, %v14646_v41  ;;  %v12642_v47 = vpop.f32.mrb[61].mxu1 }
0x1dfd   :  { %v8659_v35 = vpop.f32.mrb[62].mxu1 }
0x1dfe   :  { %v14717_v61 = vadd.f32 %v11909_v28, %v8663_v34  ;;  %v8664_v24 = vadd.f32 %v8659_v35, %v14649_v7  ;;  %v12643_v48 = vpop.f32.mrb[63].mxu1 }
0x1e00   :  { %v14720_v42 = vadd.f32 %v11909_v28, %v8664_v24  ;;  %v8674_v15 = vsel %vm177_vm2, %v14717_v61, 0.0 }
0x1e01   :  { %8675 = vadd.xlane.f32.xlu0 %v8674_v15 }
0x1e02   :  { %v8677_v2 = vsel %vm177_vm2, %v14720_v42, 0.0 }
0x1e03   :  { %8678 = vadd.xlane.f32.xlu1 %v8677_v2 }
0x1e8e   :  { %v8676_v22 = vpop.xlane.xlu0 %8675 }
0x1e8f   :  { %v8680_v43 = vmul.f32 0.03125, %v8676_v22 }
0x1e90   :  { %v8679_v41 = vpop.xlane.xlu1 %8678 }
0x1e91   :  { %v8682_v46 = vsub.f32 %v14717_v61, %v8680_v43  ;;  %v8681_v1 = vmul.f32 0.03125, %v8679_v41 }
0x1e93   :  { %v8683_v49 = vsub.f32 %v14720_v42, %v8681_v1  ;;  %v8684_v7 = vmul.f32 %v8682_v46, %v8682_v46 }
0x1e95   :  { %v8686_v4 = vsel %vm177_vm2, %v8684_v7, 0.0  ;;  %v8685_v38 = vmul.f32 %v8683_v49, %v8683_v49 }
0x1e96   :  { %8687 = vadd.xlane.f32.xlu0 %v8686_v4 }
0x1e97   :  { %v8689_v5 = vsel %vm177_vm2, %v8685_v38, 0.0 }
0x1e98   :  { %8690 = vadd.xlane.f32.xlu1 %v8689_v5 }
0x1f23   :  { %v8688_v54 = vpop.xlane.xlu0 %8687 }
0x1f24   :  { %v8692_v62 = vmul.f32 0.03125, %v8688_v54 }
0x1f25   :  { %v8691_v63 = vpop.xlane.xlu1 %8690 }
0x1f26   :  { %v8694_v36 = vadd.f32 1e-05, %v8692_v62  ;;  %v8693_v45 = vmul.f32 0.03125, %v8691_v63 }
0x1f28   :  { %13070 = vrsqrt.f32 %v8694_v36  ;;  %v8695_v6 = vadd.f32 1e-05, %v8693_v45 }
0x1f2a   :  { %13072 = vrsqrt.f32 %v8695_v6 }
0x1f32   :  { %v13071_v11 = vpop.eup %13070 }
0x1f33   :  { %v8698_v8 = vmul.f32 %v13071_v11, %v8682_v46 }
0x1f34   :  { %v13073_v9 = vpop.eup %13072 }
0x1f35   :  { %v8704_v12 = vmul.f32 %v11910_v17, %v8698_v8  ;;  %v8699_v13 = vmul.f32 %v13073_v9, %v8683_v49 }
0x1f37   :  { %v8705_v57 = vmul.f32 %v11910_v17, %v8699_v13  ;;  %v8710_v56 = vadd.f32 %v11911_v14, %v8704_v12 }
0x1f39   :  { %v8711_v27 = vadd.f32 %v11911_v14, %v8705_v57 }
0x1f3b   :  { %v8712_v16 = vpack.c.bf16 %v8711_v27, %v8710_v56 }
0x1f3d   :  { %12649 = vmatmul.mubr.msk.bf16.vlgmr.msra.gmra.mrb[84].mxu0 %vm177_vm2, %v8712_v16 }
0x1f3e   :  { %12654 = vmatprep.mubr.msk.f32.mxu0 %vm13141_vm3, %v13140_v50 }
0x2010   :  { %v8767_v18 = vpop.f32.mrb[84].mxu0 }
0x2011   :  { %8800 = vrot.lane.b32.xlu1 %v8767_v18, %s15318_s14  ;;  %8794 = vrot.lane.b32.xlu0 %v8767_v18, %s15311_s21  ;;  %v12650_v20 = vpop.f32.mrb[85].mxu0 }
0x2012   :  { %v14749_v21 = vpop.f32.mrb[86].mxu0 }
0x2013   :  { %v12651_v23 = vpop.f32.mrb[87].mxu0 }
0x2015   :  { %8806 = vrot.lane.b32.xlu1 %v8767_v18, %s15313_s0  ;;  %8812 = vrot.lane.b32.xlu0 %v8767_v18, %s15315_s23 }
0x2019   :  { %8776 = vrot.lane.b32.xlu1 %v8767_v18, %s15312_s30  ;;  %8782 = vrot.lane.b32.xlu0 %v8767_v18, %s15316_s1 }
0x201d   :  { %8788 = vrot.lane.b32.xlu1 %v8767_v18, %s15314_s22  ;;  %8796 = vrot.lane.b32.xlu0 %v14749_v21, %s15311_s21 }
0x2021   :  { %8802 = vrot.lane.b32.xlu1 %v14749_v21, %s15318_s14  ;;  %8808 = vrot.lane.b32.xlu0 %v14749_v21, %s15313_s0 }
0x2025   :  { %8814 = vrot.lane.b32.xlu1 %v14749_v21, %s15315_s23  ;;  %8778 = vrot.lane.b32.xlu0 %v14749_v21, %s15312_s30  ;;  %s15321_s23 = sld [smem:[#allocation10_spill]] }
0x2029   :  { %8784 = vrot.lane.b32.xlu1 %v14749_v21, %s15316_s1  ;;  %8790 = vrot.lane.b32.xlu0 %v14749_v21, %s15314_s22 }
0x202d   :  { %8824 = vrot.lane.b32.xlu1 %v8767_v18, %s15317_s13  ;;  %8818 = vrot.lane.b32.xlu0 %v8767_v18, %s15305_s2 }
0x2031   :  { %8830 = vrot.lane.b32.xlu1 %v8767_v18, %s15306_s27  ;;  %8836 = vrot.lane.b32.xlu0 %v8767_v18, %s15307_s26 }
0x2035   :  { %8826 = vrot.lane.b32.xlu1 %v14749_v21, %s15317_s13  ;;  %8820 = vrot.lane.b32.xlu0 %v14749_v21, %s15305_s2 }
0x2083   :  { %v8801_v26 = vpop.permute.xlu1 %8800  ;;  %v8795_v39 = vpop.permute.xlu0 %8794 }
0x2087   :  { %v8807_v40 = vpop.permute.xlu1 %8806  ;;  %v8813_v31 = vpop.permute.xlu0 %8812 }
0x2088   :  { %v8874_v33 = vcombine.low %v8795_v39, %v8807_v40  ;;  %v8875_v60 = vcombine.high %v8795_v39, %v8807_v40  ;;  %v8890_v0 = vcombine.low %v8801_v26, %v8813_v31  ;;  %v8891_v37 = vcombine.high %v8801_v26, %v8813_v31 }
0x208a   :  { %v8882_v44 = vrot.slane %v8874_v33, %v13399_v19  ;;  %v8889_v29 = vrot.slane %v8875_v60, %v13399_v19  ;;  %v8898_v30 = vrot.slane %v8890_v0, %v13399_v19  ;;  %v8905_v58 = vrot.slane %v8891_v37, %v13399_v19 }
0x208b   :  { %v8777_v51 = vpop.permute.xlu1 %8776  ;;  %v8783_v32 = vpop.permute.xlu0 %8782 }
0x208c   :  { %v8938_v3 = vcombine.low %v8882_v44, %v8898_v30  ;;  %v8939_v55 = vcombine.high %v8882_v44, %v8898_v30  ;;  %v8954_v52 = vcombine.low %v8889_v29, %v8905_v58  ;;  %v8955_v28 = vcombine.high %v8889_v29, %v8905_v58 }
0x208d   :  { %v8842_v48 = vcombine.low %v8767_v18, %v8783_v32  ;;  %v8843_v15 = vcombine.high %v8767_v18, %v8783_v32 }
0x208e   :  { %v8946_v34 = vrot.slane %v8938_v3, %v13402_v25  ;;  %v8953_v47 = vrot.slane %v8939_v55, %v13402_v25  ;;  %v8962_v35 = vrot.slane %v8954_v52, %v13402_v25  ;;  %v8969_v24 = vrot.slane %v8955_v28, %v13402_v25 }
0x208f   :  { %v8789_v2 = vpop.permute.xlu1 %8788  ;;  %v8797_v22 = vpop.permute.xlu0 %8796  ;;  %v8850_v10 = vrot.slane %v8842_v48, %v13399_v19  ;;  %v8857_v54 = vrot.slane %v8843_v15, %v13399_v19 }
0x2090   :  { %v11920_v43 = vcombine.low %v8946_v34, %v8953_v47  ;;  %v11922_v41 = vcombine.high %v8946_v34, %v8953_v47  ;;  %v11924_v46 = vcombine.low %v8962_v35, %v8969_v24  ;;  %v11926_v1 = vcombine.high %v8962_v35, %v8969_v24 }
0x2091   :  { %v8858_v49 = vcombine.low %v8777_v51, %v8789_v2  ;;  %v8859_v7 = vcombine.high %v8777_v51, %v8789_v2 }
0x2092   :  { %v14787_v4 = vrot.slane %v11920_v43, %v13399_v19  ;;  %v14790_v38 = vrot.slane %v11922_v41, %v13399_v19  ;;  %v14793_v5 = vrot.slane %v11924_v46, %v13399_v19  ;;  %v14796_v59 = vrot.slane %v11926_v1, %v13399_v19 }
0x2093   :  { %v8866_v62 = vrot.slane %v8858_v49, %v13399_v19  ;;  %v8873_v63 = vrot.slane %v8859_v7, %v13399_v19  ;;  %v8803_v36 = vpop.permute.xlu1 %8802  ;;  %v8809_v45 = vpop.permute.xlu0 %8808 }
0x2094   :  { %v9330_v6 = vcombine.low %v14787_v4, %v14790_v38  ;;  %v9362_v11 = vcombine.low %v14793_v5, %v14796_v59  ;;  %v9078_v13 = vcombine.low %v8797_v22, %v8809_v45  ;;  %v9079_v14 = vcombine.high %v8797_v22, %v8809_v45 }
0x2095   :  { %v8906_v17 = vcombine.low %v8850_v10, %v8866_v62  ;;  %v8907_v8 = vcombine.high %v8850_v10, %v8866_v62  ;;  %v8922_v9 = vcombine.low %v8857_v54, %v8873_v63  ;;  %v8923_v12 = vcombine.high %v8857_v54, %v8873_v63 }
0x2096   :  { %v14807_v57 = vrot.slane %v9330_v6, %v13402_v25  ;;  %v14810_v56 = vrot.slane %v9362_v11, %v13402_v25  ;;  %v9086_v39 = vrot.slane %v9078_v13, %v13399_v19  ;;  %v9093_v44 = vrot.slane %v9079_v14, %v13399_v19 }
0x2097   :  { %v8914_v27 = vrot.slane %v8906_v17, %v13402_v25  ;;  %v8921_v16 = vrot.slane %v8907_v8, %v13402_v25  ;;  %v8930_v18 = vrot.slane %v8922_v9, %v13402_v25  ;;  %v8937_v20 = vrot.slane %v8923_v12, %v13402_v25  ;;  %v8815_v23 = vpop.permute.xlu1 %8814  ;;  %v8779_v26 = vpop.permute.xlu0 %8778 }
0x2098   :  { %v9094_v40 = vcombine.low %v8803_v36, %v8815_v23  ;;  %v9095_v31 = vcombine.high %v8803_v36, %v8815_v23  ;;  %v9382_v58 = vcombine.low %v14807_v57, %v14810_v56  ;;  %v9331_v51 = vcombine.high %v14787_v4, %v14790_v38 }
0x2099   :  { %v11919_v33 = vcombine.low %v8914_v27, %v8921_v16  ;;  %v11921_v60 = vcombine.high %v8914_v27, %v8921_v16  ;;  %v11923_v0 = vcombine.low %v8930_v18, %v8937_v20  ;;  %v11925_v37 = vcombine.high %v8930_v18, %v8937_v20 }
0x209a   :  { %v9102_v29 = vrot.slane %v9094_v40, %v13399_v19  ;;  %v9109_v30 = vrot.slane %v9095_v31, %v13399_v19  ;;  %v9363_v32 = vcombine.high %v14793_v5, %v14796_v59  ;;  %12653 = vmatpush3.xpose.msk.msra.mxu0 %vm1162_vm4, %v9382_v58  ;;  %v9383_v22 = vcombine.high %v14807_v57, %v14810_v56 }
0x209b   :  { %v14827_v3 = vrot.slane %v11919_v33, %v13399_v19  ;;  %v14830_v55 = vrot.slane %v11921_v60, %v13399_v19  ;;  %v8785_v52 = vpop.permute.xlu1 %8784  ;;  %v8791_v28 = vpop.permute.xlu0 %8790  ;;  %v14834_v48 = vrot.slane %v11923_v0, %v13399_v19  ;;  %v14837_v15 = vrot.slane %v11925_v37, %v13399_v19  ;;  %12657 = vmatprep.subr.mxu0 %v13140_v50 }
0x209c   :  { %v9142_v34 = vcombine.low %v9086_v39, %v9102_v29  ;;  %v9143_v47 = vcombine.high %v9086_v39, %v9102_v29  ;;  %v9158_v35 = vcombine.low %v9093_v44, %v9109_v30  ;;  %v9159_v24 = vcombine.high %v9093_v44, %v9109_v30 }
0x209d   :  { %v9314_v2 = vcombine.low %v14827_v3, %v14830_v55  ;;  %v9046_v49 = vcombine.low %v14749_v21, %v8785_v52  ;;  %v9047_v7 = vcombine.high %v14749_v21, %v8785_v52  ;;  %v9062_v10 = vcombine.low %v8779_v26, %v8791_v28 }
0x209e   :  { %v9150_v43 = vrot.slane %v9142_v34, %v13402_v25  ;;  %v9157_v41 = vrot.slane %v9143_v47, %v13402_v25  ;;  %v9166_v46 = vrot.slane %v9158_v35, %v13402_v25  ;;  %v9173_v1 = vrot.slane %v9159_v24, %v13402_v25 }
0x209f   :  { %v9063_v54 = vcombine.high %v8779_v26, %v8791_v28  ;;  %v8825_v62 = vpop.permute.xlu1 %8824  ;;  %v8819_v63 = vpop.permute.xlu0 %8818  ;;  %v9054_v17 = vrot.slane %v9046_v49, %v13399_v19  ;;  %v9061_v8 = vrot.slane %v9047_v7, %v13399_v19  ;;  %v9070_v9 = vrot.slane %v9062_v10, %v13399_v19 }
0x20a0   :  { %v11930_v36 = vcombine.low %v9150_v43, %v9157_v41  ;;  %v11932_v45 = vcombine.high %v9150_v43, %v9157_v41  ;;  %v11934_v6 = vcombine.low %v9166_v46, %v9173_v1  ;;  %v11936_v11 = vcombine.high %v9166_v46, %v9173_v1 }
0x20a1   :  { %v9077_v12 = vrot.slane %v9063_v54, %v13399_v19  ;;  %v9315_v13 = vcombine.high %v14827_v3, %v14830_v55  ;;  %v9346_v14 = vcombine.low %v14834_v48, %v14837_v15  ;;  %v9110_v27 = vcombine.low %v9054_v17, %v9070_v9 }
0x20a2   :  { %v14859_v57 = vrot.slane %v11930_v36, %v13399_v19  ;;  %v14862_v56 = vrot.slane %v11932_v45, %v13399_v19  ;;  %v9111_v16 = vcombine.high %v9054_v17, %v9070_v9  ;;  %v9347_v26 = vcombine.high %v14834_v48, %v14837_v15 }
0x20a3   :  { %v9126_v18 = vcombine.low %v9061_v8, %v9077_v12  ;;  %v9127_v20 = vcombine.high %v9061_v8, %v9077_v12  ;;  %v8831_v23 = vpop.permute.xlu1 %8830  ;;  %v14867_v39 = vrot.slane %v11934_v6, %v13399_v19  ;;  %v14870_v40 = vrot.slane %v11936_v11, %v13399_v19  ;;  %v8837_v44 = vpop.permute.xlu0 %8836 }
0x20a4   :  { %v9534_v31 = vcombine.low %v14859_v57, %v14862_v56  ;;  %v9118_v33 = vrot.slane %v9110_v27, %v13402_v25  ;;  %v9125_v60 = vrot.slane %v9111_v16, %v13402_v25  ;;  %v9322_v29 = vrot.slane %v9314_v2, %v13402_v25 }
0x20a5   :  { %v9134_v0 = vrot.slane %v9126_v18, %v13402_v25  ;;  %v9141_v37 = vrot.slane %v9127_v20, %v13402_v25  ;;  %v9354_v30 = vrot.slane %v9346_v14, %v13402_v25  ;;  %v8978_v58 = vcombine.low %v8819_v63, %v8831_v23 }
0x20a6   :  { %v8979_v3 = vcombine.high %v8819_v63, %v8831_v23  ;;  %v11929_v55 = vcombine.low %v9118_v33, %v9125_v60  ;;  %v11931_v52 = vcombine.high %v9118_v33, %v9125_v60  ;;  %v9535_v47 = vcombine.high %v14859_v57, %v14862_v56 }
0x20a7   :  { %v11933_v28 = vcombine.low %v9134_v0, %v9141_v37  ;;  %v11935_v34 = vcombine.high %v9134_v0, %v9141_v37  ;;  %v9378_v35 = vcombine.low %v9322_v29, %v9354_v30  ;;  %v8986_v24 = vrot.slane %v8978_v58, %v13399_v19 }
0x20a8   :  { %v8994_v48 = vcombine.low %v8825_v62, %v8837_v44  ;;  %v9566_v15 = vcombine.low %v14867_v39, %v14870_v40  ;;  %v9567_v2 = vcombine.high %v14867_v39, %v14870_v40  ;;  %v9462_v43 = vrot.slane %v11929_v55, %v13399_v19 }
0x20a9   :  { %v9478_v41 = vrot.slane %v11931_v52, %v13399_v19  ;;  %v9494_v46 = vrot.slane %v11933_v28, %v13399_v19  ;;  %12655 = vmatmul.mubr.msk.f32.vlgmr.msra.gmra.mrb[78].mxu0 %vm1162_vm4, %v9378_v35  ;;  %v8993_v1 = vrot.slane %v8979_v3, %v13399_v19  ;;  %v8995_v49 = vcombine.high %v8825_v62, %v8837_v44 }
0x20aa   :  { %v9002_v7 = vrot.slane %v8994_v48, %v13399_v19  ;;  %v9510_v10 = vrot.slane %v11935_v34, %v13399_v19  ;;  %12658 = vmatpush3.xpose.msk.msra.mxu0 %vm1162_vm4, %v9383_v22  ;;  %v9379_v63 = vcombine.high %v9322_v29, %v9354_v30  ;;  %v9345_v36 = vrot.slane %v9331_v51, %v13402_v25 }
0x20ab   :  { %v9518_v54 = vcombine.low %v9462_v43, %v9478_v41  ;;  %v9009_v45 = vrot.slane %v8995_v49, %v13399_v19  ;;  %12659 = vmatprep.mubr.msk.f32.mxu0 %vm13141_vm3, %v13140_v50  ;;  %12662 = vmatprep.subr.mxu0 %v13140_v50  ;;  %v9377_v22 = vrot.slane %v9363_v32, %v13402_v25 }
0x20ac   :  { %v9010_v6 = vcombine.low %v8986_v24, %v9002_v7  ;;  %v9011_v11 = vcombine.high %v8986_v24, %v9002_v7  ;;  %v9329_v62 = vrot.slane %v9315_v13, %v13402_v25  ;;  %v9361_v17 = vrot.slane %v9347_v26, %v13402_v25 }
0x20ad   :  { %v14910_v4 = vrot.slane %v9535_v47, %v13402_v25  ;;  %v9026_v8 = vcombine.low %v8993_v1, %v9009_v45  ;;  %v9027_v9 = vcombine.high %v8993_v1, %v9009_v45  ;;  %12660 = vmatmul.mubr.msk.f32.vlgmr.msra.gmra.mrb[88].mxu0 %vm1162_vm4, %v9379_v63  ;;  %v9519_v12 = vcombine.high %v9462_v43, %v9478_v41 }
0x20ae   :  { %v9018_v38 = vrot.slane %v9010_v6, %v13402_v25  ;;  %v9025_v51 = vrot.slane %v9011_v11, %v13402_v25  ;;  %v9551_v14 = vcombine.high %v9494_v46, %v9510_v10  ;;  %v9384_v27 = vcombine.low %v9345_v36, %v9377_v22  ;;  %12664 = vmatprep.mubr.msk.f32.mxu0 %vm13141_vm3, %v13140_v50 }
0x20af   :  { %v9581_v5 = vrot.slane %v9567_v2, %v13402_v25  ;;  %v9034_v59 = vrot.slane %v9026_v8, %v13402_v25  ;;  %v9041_v32 = vrot.slane %v9027_v9, %v13402_v25  ;;  %v9550_v18 = vcombine.low %v9494_v46, %v9510_v10 }
0x20b0   :  { %v9386_v13 = vcombine.low %v9018_v38, %v9025_v51  ;;  %v11927_v16 = vcombine.high %v9018_v38, %v9025_v51  ;;  %12663 = vmatpush3.xpose.msk.msra.mxu0 %vm1162_vm4, %v9384_v27  ;;  %v9380_v20 = vcombine.low %v9329_v62, %v9361_v17  ;;  %v9385_v23 = vcombine.high %v9345_v36, %v9377_v22 }
0x20b1   :  { %v9588_v26 = vcombine.low %v14910_v4, %v9581_v5  ;;  %v9402_v33 = vcombine.low %v9034_v59, %v9041_v32  ;;  %v11928_v60 = vcombine.high %v9034_v59, %v9041_v32  ;;  %12667 = vmatprep.subr.mxu0 %v13140_v50  ;;  %v9542_v0 = vrot.slane %v9534_v31, %v13402_v25 }
0x20b2   :  { %v9393_v39 = vrot.slane %v9386_v13, %v13399_v19  ;;  %v9401_v40 = vrot.slane %v11927_v16, %v13399_v19  ;;  %v9574_v37 = vrot.slane %v9566_v15, %v13402_v25  ;;  %v9533_v44 = vrot.slane %v9519_v12, %v13402_v25 }
0x20b3   :  { %12683 = vmatpush3.xpose.msk.msra.mxu1 %vm1162_vm4, %v9588_v26  ;;  %v9565_v29 = vrot.slane %v9551_v14, %v13402_v25  ;;  %v9409_v30 = vrot.slane %v9402_v33, %v13399_v19  ;;  %v9417_v58 = vrot.slane %v11928_v60, %v13399_v19  ;;  %12665 = vmatmul.mubr.msk.f32.vlgmr.msra.gmra.mrb[90].mxu0 %vm1162_vm4, %v9380_v20 }
0x20b4   :  { %12668 = vmatpush3.xpose.msk.msra.mxu0 %vm1162_vm4, %v9385_v23  ;;  %12669 = vmatprep.mubr.msk.f32.mxu0 %vm13141_vm3, %v13140_v50  ;;  %v9381_v3 = vcombine.high %v9329_v62, %v9361_v17  ;;  %v9418_v56 = vcombine.low %v9393_v39, %v9401_v40  ;;  %v9526_v31 = vrot.slane %v9518_v54, %v13402_v25 }
0x20b5   :  { %v9584_v57 = vcombine.low %v9533_v44, %v9565_v29  ;;  %12672 = vmatprep.subr.mxu0 %v13140_v50  ;;  %v9558_v55 = vrot.slane %v9550_v18, %v13402_v25  ;;  %12692 = vmatprep.subr.mxu1 %v13140_v50  ;;  %v9434_v52 = vcombine.low %v9409_v30, %v9417_v58 }
0x20b6   :  { %v9586_v28 = vcombine.low %v9542_v0, %v9574_v37  ;;  %v9426_v34 = vrot.slane %v9418_v56, %v13402_v25  ;;  %v9419_v47 = vcombine.high %v9393_v39, %v9401_v40  ;;  %v9435_v35 = vcombine.high %v9409_v30, %v9417_v58 }
0x20b7   :  { %12685 = vmatmul.mubr.msk.f32.vlgmr.msra.gmra.mrb[64].mxu1 %vm1162_vm4, %v9584_v57  ;;  %12670 = vmatmul.mubr.msk.f32.vlgmr.msra.gmra.mrb[92].mxu0 %vm1162_vm4, %v9381_v3  ;;  %v9442_v24 = vrot.slane %v9434_v52, %v13402_v25  ;;  %v9582_v2 = vcombine.low %v9526_v31, %v9558_v55  ;;  %v9587_v41 = vcombine.high %v9542_v0, %v9574_v37 }
0x20b8   :  { %12694 = vmatprep.mubr.msk.f32.mxu1 %vm13141_vm3, %v13140_v50  ;;  %12673 = vmatpush3.xpose.msk.msra.mxu0 %vm1162_vm4, %v9586_v28  ;;  %v14953_v48 = vrot.slane %v9419_v47, %v13402_v25  ;;  %v14956_v15 = vrot.slane %v9435_v35, %v13402_v25  ;;  %v9583_v49 = vcombine.high %v9526_v31, %v9558_v55 }
0x20b9   :  { %12674 = vmatprep.mubr.msk.f32.mxu0 %vm13141_vm3, %v13140_v50  ;;  %12677 = vmatprep.subr.mxu0 %v13140_v50  ;;  %v9450_v43 = vcombine.low %v9426_v34, %v9442_v24  ;;  %v9589_v7 = vcombine.high %v14910_v4, %v9581_v5  ;;  %v9585_v10 = vcombine.high %v9533_v44, %v9565_v29 }
0x20ba   :  { %v9452_v46 = vcombine.low %v14953_v48, %v14956_v15  ;;  %v9453_v1 = vcombine.high %v14953_v48, %v14956_v15  ;;  %v9451_v54 = vcombine.high %v9426_v34, %v9442_v24 }
0x20bb   :  { %12675 = vmatmul.mubr.msk.f32.vlgmr.msra.gmra.mrb[94].mxu0 %vm1162_vm4, %v9582_v2  ;;  %12693 = vmatpush3.msra.mxu1 %v9450_v43  ;;  %v8827_v43 = vpop.permute.xlu1 %8826 }
0x20bc   :  { %12678 = vmatpush3.xpose.msk.msra.mxu0 %vm1162_vm4, %v9587_v41  ;;  %12679 = vmatprep.mubr.msk.f32.mxu0 %vm13141_vm3, %v13140_v50 }
0x20bd   :  { %12687 = vmatprep.subr.mxu0 %v13140_v50  ;;  %12702 = vmatprep.subr.mxu1 %v13140_v50 }
0x20bf   :  { %12680 = vmatmul.mubr.msk.f32.vlgmr.msra.gmra.mrb[96].mxu0 %vm1162_vm4, %v9583_v49  ;;  %v8821_v49 = vpop.permute.xlu0 %8820 }
0x20c0   :  { %12688 = vmatpush3.xpose.msk.msra.mxu0 %vm1162_vm4, %v9589_v7  ;;  %12689 = vmatprep.mubr.msk.f32.mxu0 %vm13141_vm3, %v13140_v50 }
0x20c1   :  { %12697 = vmatprep.subr.mxu0 %v13140_v50 }
0x20c3   :  { %12690 = vmatmul.mubr.msk.f32.vlgmr.msra.gmra.mrb[98].mxu0 %vm1162_vm4, %v9585_v10 }
0x20c4   :  { %12698 = vmatpush3.msra.mxu0 %v9451_v54  ;;  %12699 = vmatprep.mubr.msk.f32.mxu0 %vm13141_vm3, %v13140_v50 }
0x20c5   :  { %12707 = vmatprep.subr.mxu0 %v13140_v50 }
0x217c   :  { %v9730_v63 = vpop.f32.mrb[78].mxu0 }
0x217d   :  { %v9731_v36 = vadd.f32 %v9730_v63, %v13556_v53  ;;  %v12656_v45 = vpop.f32.mrb[79].mxu0 }
0x217f   :  { %v10266_v6 = vmul.f32 1.442695, %v9731_v36 }
0x2180   :  { %v9806_v11 = vpop.f32.mrb[88].mxu0 }
0x2181   :  { %13074 = vpow2.f32 %v10266_v6  ;;  %v12661_v22 = vpop.f32.mrb[89].mxu0  ;;  %v9807_v4 = vadd.f32 %v9806_v11, %v13556_v53 }
0x2183   :  { %v10268_v5 = vmul.f32 1.442695, %v9807_v4 }
0x2186   :  { %v9882_v62 = vpop.f32.mrb[90].mxu0 }
0x2187   :  { %v12666_v17 = vpop.f32.mrb[91].mxu0  ;;  %v9883_v59 = vadd.f32 %v9882_v62, %v13556_v53 }
0x2189   :  { %v10270_v26 = vmul.f32 1.442695, %v9883_v59 }
0x218a   :  { %v10186_v38 = vpop.f32.mrb[64].mxu1  ;;  %v9958_v51 = vpop.f32.mrb[92].mxu0 }
0x218b   :  { %v10187_v8 = vadd.f32 %v10186_v38, %v13556_v53  ;;  %v12686_v9 = vpop.f32.mrb[65].mxu1  ;;  %v13075_v12 = vpop.eup %13074  ;;  %v9959_v14 = vadd.f32 %v9958_v51, %v13556_v53 }
0x218c   :  { %v12671_v27 = vpop.f32.mrb[93].mxu0  ;;  %v10282_v13 = vsel %vm1162_vm4, %v13075_v12, 0.0 }
0x218d   :  { %v10278_v32 = vmul.f32 1.442695, %v10187_v8  ;;  %v10272_v16 = vmul.f32 1.442695, %v9959_v14  ;;  %10283 = vadd.xlane.f32.xlu1 %v10282_v13 }
0x218e   :  { %v10034_v18 = vpop.f32.mrb[94].mxu0 }
0x218f   :  { %13076 = vpow2.f32 %v10278_v32  ;;  %v10035_v20 = vadd.f32 %v10034_v18, %v13556_v53  ;;  %v12676_v23 = vpop.f32.mrb[95].mxu0 }
0x2190   :  { %13078 = vpow2.f32 %v10272_v16 }
0x2191   :  { %13080 = vpow2.f32 %v10268_v5  ;;  %v10274_v39 = vmul.f32 1.442695, %v10035_v20 }
0x2192   :  { %v10110_v40 = vpop.f32.mrb[96].mxu0 }
0x2193   :  { %13082 = vpow2.f32 %v10274_v39  ;;  %v10111_v33 = vadd.f32 %v10110_v40, %v13556_v53  ;;  %v12681_v60 = vpop.f32.mrb[97].mxu0 }
0x2194   :  { %13084 = vpow2.f32 %v10270_v26 }
0x2195   :  { %v10276_v0 = vmul.f32 1.442695, %v10111_v33 }
0x2196   :  { %v10262_v37 = vpop.f32.mrb[98].mxu0 }
0x2197   :  { %v10263_v44 = vadd.f32 %v10262_v37, %v13556_v53  ;;  %v12691_v29 = vpop.f32.mrb[99].mxu0  ;;  %13086 = vpow2.f32 %v10276_v0 }
0x2199   :  { %v14988_v30 = vpop.eup %13076  ;;  %v10280_v3 = vmul.f32 1.442695, %v10263_v44 }
0x219a   :  { %v14990_v58 = vpop.eup %13078  ;;  %v10300_v57 = vsel %vm1162_vm4, %v14988_v30, 0.0 }
0x219b   :  { %v13081_v56 = vpop.eup %13080  ;;  %10301 = vadd.xlane.f32.xlu0 %v10300_v57  ;;  %v10291_v31 = vsel %vm1162_vm4, %v14990_v58, 0.0  ;;  %13088 = vpow2.f32 %v10280_v3 }
0x219c   :  { %10292 = vadd.xlane.f32.xlu1 %v10291_v31  ;;  %v10285_v53 = vsel %vm1162_vm4, %v13081_v56, 0.0 }
0x219d   :  { %v14996_v55 = vpop.eup %13082 }
0x219e   :  { %v13085_v52 = vpop.eup %13084  ;;  %v10294_v28 = vsel %vm1162_vm4, %v14996_v55, 0.0 }
0x219f   :  { %10286 = vadd.xlane.f32.xlu0 %v10285_v53  ;;  %v10288_v34 = vsel %vm1162_vm4, %v13085_v52, 0.0 }
0x21a0   :  { %10295 = vadd.xlane.f32.xlu1 %v10294_v28 }
0x21a1   :  { %v15002_v47 = vpop.eup %13086 }
0x21a2   :  { %v10297_v24 = vsel %vm1162_vm4, %v15002_v47, 0.0 }
0x21a3   :  { %10289 = vadd.xlane.f32.xlu0 %v10288_v34 }
0x21a5   :  { %v15004_v35 = vpop.eup %13088 }
0x21a6   :  { %v10303_v2 = vsel %vm1162_vm4, %v15004_v35, 0.0 }
0x21a7   :  { %10298 = vadd.xlane.f32.xlu0 %v10297_v24  ;;  %10304 = vadd.xlane.f32.xlu1 %v10303_v2 }
0x21b8   :  { %8832 = vrot.lane.b32.xlu1 %v14749_v21, %s15306_s27 }
0x21bd   :  { %8838 = vrot.lane.b32.xlu0 %v14749_v21, %s15307_s26  ;;  %s15319_s26 = sld [smem:[#allocation8_spill]] }
0x221a   :  { %v10284_v41 = vpop.xlane.xlu1 %10283 }
0x221b   :  { %13090 = vrcp.f32 %v10284_v41 }
0x2225   :  { %v13091_v7 = vpop.eup %13090 }
0x2226   :  { %v10314_v10 = vmul.f32 %v13091_v7, %v13075_v12 }
0x2228   :  { %v10302_v54 = vpop.xlane.xlu0 %10301  ;;  %12695 = vmatmul.mubr.msk.f32.vlgmr.msra.gmra.mrb[66].mxu1 %vm1162_vm4, %v10314_v10 }
0x2229   :  { %12703 = vmatpush3.msra.mxu1 %v9452_v46  ;;  %12704 = vmatprep.mubr.msk.f32.mxu1 %vm13141_vm3, %v13140_v50  ;;  %v10293_v63 = vpop.xlane.xlu1 %10292 }
0x222a   :  { %12712 = vmatprep.subr.mxu1 %v13140_v50 }
0x222c   :  { %v10287_v21 = vpop.xlane.xlu0 %10286 }
0x222d   :  { %13092 = vrcp.f32 %v10287_v21  ;;  %v10296_v45 = vpop.xlane.xlu1 %10295 }
0x222e   :  { %13094 = vrcp.f32 %v10293_v63 }
0x2230   :  { %v10290_v36 = vpop.xlane.xlu0 %10289 }
0x2231   :  { %13096 = vrcp.f32 %v10290_v36 }
0x2232   :  { %13098 = vrcp.f32 %v10296_v45 }
0x2234   :  { %v10299_v6 = vpop.xlane.xlu0 %10298  ;;  %v10305_v11 = vpop.xlane.xlu1 %10304 }
0x2235   :  { %13100 = vrcp.f32 %v10299_v6 }
0x2236   :  { %13102 = vrcp.f32 %v10302_v54 }
0x2237   :  { %v13093_v22 = vpop.eup %13092  ;;  %13104 = vrcp.f32 %v10305_v11 }
0x2238   :  { %v10315_v62 = vmul.f32 %v13093_v22, %v13081_v56  ;;  %v8839_v17 = vpop.permute.xlu0 %8838  ;;  %v8833_v46 = vpop.permute.xlu1 %8832 }
0x2239   :  { %v9198_v4 = vcombine.low %v8827_v43, %v8839_v17  ;;  %v9199_v38 = vcombine.high %v8827_v43, %v8839_v17  ;;  %v13095_v51 = vpop.eup %13094  ;;  %v9182_v8 = vcombine.low %v8821_v49, %v8833_v46  ;;  %v9183_v9 = vcombine.high %v8821_v49, %v8833_v46 }
0x223a   :  { %12700 = vmatmul.mubr.msk.f32.vlgmr.msra.gmra.mrb[100].mxu0 %vm1162_vm4, %v10315_v62  ;;  %v10317_v13 = vmul.f32 %v13095_v51, %v14990_v58 }
0x223b   :  { %v13097_v12 = vpop.eup %13096  ;;  %v9206_v14 = vrot.slane %v9198_v4, %v13399_v19  ;;  %v9213_v27 = vrot.slane %v9199_v38, %v13399_v19  ;;  %12708 = vmatpush3.msra.mxu0 %v9453_v1  ;;  %12709 = vmatprep.mubr.msk.f32.mxu0 %vm13141_vm3, %v13140_v50  ;;  %v9190_v59 = vrot.slane %v9182_v8, %v13399_v19 }
0x223c   :  { %v10316_v5 = vmul.f32 %v13097_v12, %v13085_v52  ;;  %v9197_v32 = vrot.slane %v9183_v9, %v13399_v19  ;;  %12717 = vmatprep.subr.mxu0 %v13140_v50  ;;  %v13099_v57 = vpop.eup %13098 }
0x223d   :  { %v9214_v16 = vcombine.low %v9190_v59, %v9206_v14  ;;  %v9215_v18 = vcombine.high %v9190_v59, %v9206_v14  ;;  %v10318_v49 = vmul.f32 %v13099_v57, %v14996_v55 }
0x223e   :  { %v9230_v20 = vcombine.low %v9197_v32, %v9213_v27  ;;  %v9231_v23 = vcombine.high %v9197_v32, %v9213_v27  ;;  %12705 = vmatmul.mubr.msk.f32.vlgmr.msra.gmra.mrb[68].mxu1 %vm1162_vm4, %v10316_v5  ;;  %12710 = vmatmul.mubr.msk.f32.vlgmr.msra.gmra.mrb[102].mxu0 %vm1162_vm4, %v10317_v13 }
0x223f   :  { %12714 = vmatprep.mubr.msk.f32.mxu1 %vm13141_vm3, %v13140_v50  ;;  %v9222_v48 = vrot.slane %v9214_v16, %v13402_v25  ;;  %v9229_v15 = vrot.slane %v9215_v18, %v13402_v25  ;;  %12719 = vmatprep.mubr.msk.f32.mxu0 %vm13141_vm3, %v13140_v50  ;;  %v13101_v52 = vpop.eup %13100 }
0x2240   :  { %v9238_v1 = vrot.slane %v9230_v20, %v13402_v25  ;;  %v9245_v26 = vrot.slane %v9231_v23, %v13402_v25  ;;  %v13103_v41 = vpop.eup %13102  ;;  %v10319_v7 = vmul.f32 %v13101_v52, %v15002_v47 }
0x2241   :  { %v9590_v39 = vcombine.low %v9222_v48, %v9229_v15  ;;  %v11937_v40 = vcombine.high %v9222_v48, %v9229_v15  ;;  %v13105_v10 = vpop.eup %13104  ;;  %v10320_v21 = vmul.f32 %v13103_v41, %v14988_v30 }
0x2242   :  { %v9606_v33 = vcombine.low %v9238_v1, %v9245_v26  ;;  %v11938_v60 = vcombine.high %v9238_v1, %v9245_v26  ;;  %v10321_v36 = vmul.f32 %v13105_v10, %v15004_v35 }
0x2243   :  { %v9597_v0 = vrot.slane %v9590_v39, %v13399_v19  ;;  %v9605_v37 = vrot.slane %v11937_v40, %v13399_v19 }
0x2244   :  { %v9613_v44 = vrot.slane %v9606_v33, %v13399_v19  ;;  %v9621_v29 = vrot.slane %v11938_v60, %v13399_v19 }
0x2245   :  { %v9622_v58 = vcombine.low %v9597_v0, %v9605_v37  ;;  %v9623_v3 = vcombine.high %v9597_v0, %v9605_v37 }
0x2246   :  { %v9638_v56 = vcombine.low %v9613_v44, %v9621_v29  ;;  %v9639_v31 = vcombine.high %v9613_v44, %v9621_v29 }
0x2247   :  { %v9630_v53 = vrot.slane %v9622_v58, %v13402_v25  ;;  %v9637_v34 = vrot.slane %v9623_v3, %v13402_v25 }
0x2248   :  { %v9646_v28 = vrot.slane %v9638_v56, %v13402_v25  ;;  %v9653_v24 = vrot.slane %v9639_v31, %v13402_v25 }
0x224a   :  { %v9654_v2 = vcombine.low %v9630_v53, %v9646_v28  ;;  %v9655_v43 = vcombine.high %v9630_v53, %v9646_v28  ;;  %v9656_v54 = vcombine.low %v9637_v34, %v9653_v24  ;;  %v9657_v63 = vcombine.high %v9637_v34, %v9653_v24 }
0x224c   :  { %12713 = vmatpush3.msra.mxu1 %v9654_v2  ;;  %12718 = vmatpush3.msra.mxu0 %v9655_v43 }
0x224d   :  { %12715 = vmatmul.mubr.msk.f32.vlgmr.msra.gmra.mrb[70].mxu1 %vm1162_vm4, %v10318_v49  ;;  %12720 = vmatmul.mubr.msk.f32.vlgmr.msra.gmra.mrb[104].mxu0 %vm1162_vm4, %v10319_v7 }
0x224e   :  { %12722 = vmatprep.subr.mxu1 %v13140_v50  ;;  %12727 = vmatprep.subr.mxu0 %v13140_v50 }
0x224f   :  { %12723 = vmatpush3.msra.mxu1 %v9656_v54  ;;  %12728 = vmatpush3.msra.mxu0 %v9657_v63 }
0x2250   :  { %12724 = vmatprep.mubr.msk.f32.mxu1 %vm13141_vm3, %v13140_v50  ;;  %12729 = vmatprep.mubr.msk.f32.mxu0 %vm13141_vm3, %v13140_v50 }
0x2251   :  { %12725 = vmatmul.mubr.msk.f32.vlgmr.msra.gmra.mrb[72].mxu1 %vm1162_vm4, %v10320_v21  ;;  %12730 = vmatmul.mubr.msk.f32.vlgmr.msra.gmra.mrb[106].mxu0 %vm1162_vm4, %v10321_v36 }
0x2252   :  { %12732 = vmatprep.subr.bf16.mxu1 %v13140_v50  ;;  %12736 = vmatprep.mubr.msk.bf16.mxu1 %vm13141_vm3, %v13140_v50 }
0x2253   :  { %12740 = vmatprep.subr.bf16.mxu0 %v13140_v50  ;;  %12744 = vmatprep.mubr.msk.bf16.mxu0 %vm13141_vm3, %v13140_v50 }
0x22fb   :  { %v10391_v30 = vpop.f32.mrb[66].mxu1 }
0x22fc   :  { %v12696_v55 = vpop.f32.mrb[67].mxu1 }
0x230d   :  { %v10464_v47 = vpop.f32.mrb[100].mxu0 }
0x230e   :  { %v12701_v35 = vpop.f32.mrb[101].mxu0 }
0x2311   :  { %v10537_v45 = vpop.f32.mrb[68].mxu1  ;;  %v10610_v22 = vpop.f32.mrb[102].mxu0 }
0x2312   :  { %v10906_v6 = vcombine.low %v10391_v30, %v10537_v45  ;;  %v10907_v11 = vcombine.high %v10391_v30, %v10537_v45  ;;  %v12706_v62 = vpop.f32.mrb[69].mxu1  ;;  %v10922_v17 = vcombine.low %v10464_v47, %v10610_v22  ;;  %v10923_v4 = vcombine.high %v10464_v47, %v10610_v22  ;;  %v12711_v38 = vpop.f32.mrb[103].mxu0 }
0x2314   :  { %v10914_v46 = vrot.slane %v10906_v6, %v13399_v19  ;;  %v10921_v51 = vrot.slane %v10907_v11, %v13399_v19  ;;  %v10930_v8 = vrot.slane %v10922_v17, %v13399_v19  ;;  %v10937_v9 = vrot.slane %v10923_v4, %v13399_v19 }
0x2316   :  { %v10938_v12 = vcombine.low %v10914_v46, %v10930_v8  ;;  %v10939_v14 = vcombine.high %v10914_v46, %v10930_v8  ;;  %v10954_v27 = vcombine.low %v10921_v51, %v10937_v9  ;;  %v10955_v5 = vcombine.high %v10921_v51, %v10937_v9  ;;  %v12936_v51 = vld [vmem:[%s15242_s4 + $0x30] sm:$0xff]  }
0x2317   :  { %12733 = vmatpush3.bf16.msra.mxu1 %v12936_v51  ;;  %v12943_v51 = vld [vmem:[%s15250_s12 + $0xd8] sm:$0xff]  }
0x2318   :  { %v10946_v59 = vrot.slane %v10938_v12, %v13402_v25  ;;  %v10953_v32 = vrot.slane %v10939_v14, %v13402_v25  ;;  %v10962_v13 = vrot.slane %v10954_v27, %v13402_v25  ;;  %v10969_v16 = vrot.slane %v10955_v5, %v13402_v25  ;;  %12734 = vmatprep.subr.bf16.mxu1 %v13140_v50 }
0x231a   :  { %v11042_v18 = vcombine.low %v10946_v59, %v10953_v32  ;;  %v11963_v20 = vcombine.high %v10946_v59, %v10953_v32  ;;  %v11058_v23 = vcombine.low %v10962_v13, %v10969_v16  ;;  %v11964_v48 = vcombine.high %v10962_v13, %v10969_v16 }
0x231c   :  { %v11049_v15 = vrot.slane %v11042_v18, %v13399_v19  ;;  %v11057_v1 = vrot.slane %v11963_v20, %v13399_v19  ;;  %v11065_v26 = vrot.slane %v11058_v23, %v13399_v19  ;;  %v11073_v39 = vrot.slane %v11964_v48, %v13399_v19  ;;  %v12937_v23 = vld [vmem:[%s15242_s4 + $0x38] sm:$0xff]  }
0x231d   :  { %12735 = vmatpush3.bf16.msra.mxu1 %v12937_v23 }
0x231e   :  { %v11075_v40 = vcombine.high %v11049_v15, %v11057_v1  ;;  %v11091_v33 = vcombine.high %v11065_v26, %v11073_v39  ;;  %v11074_v60 = vcombine.low %v11049_v15, %v11057_v1  ;;  %v11090_v0 = vcombine.low %v11065_v26, %v11073_v39  ;;  %12748 = vmatprep.subr.bf16.mxu1 %v13140_v50 }
0x2320   :  { %v10683_v37 = vpop.f32.mrb[70].mxu1  ;;  %v10756_v44 = vpop.f32.mrb[104].mxu0  ;;  %v11089_v29 = vrot.slane %v11075_v40, %v13402_v25  ;;  %v11105_v58 = vrot.slane %v11091_v33, %v13402_v25  ;;  %v15086_v3 = vrot.slane %v11074_v60, %v13402_v25  ;;  %v15089_v57 = vrot.slane %v11090_v0, %v13402_v25 }
0x2321   :  { %v12716_v56 = vpop.f32.mrb[71].mxu1  ;;  %v12721_v31 = vpop.f32.mrb[105].mxu0 }
0x2322   :  { %v11108_v53 = vcombine.low %v11089_v29, %v11105_v58  ;;  %v11107_v52 = vcombine.high %v15086_v3, %v15089_v57  ;;  %v11109_v28 = vcombine.high %v11089_v29, %v11105_v58  ;;  %v11106_v34 = vcombine.low %v15086_v3, %v15089_v57 }
0x2324   :  { %v10829_v24 = vpop.f32.mrb[72].mxu1  ;;  %v10902_v2 = vpop.f32.mrb[106].mxu0 }
0x2325   :  { %v10974_v43 = vcombine.low %v10683_v37, %v10829_v24  ;;  %v10975_v41 = vcombine.high %v10683_v37, %v10829_v24  ;;  %v10990_v49 = vcombine.low %v10756_v44, %v10902_v2  ;;  %v10991_v7 = vcombine.high %v10756_v44, %v10902_v2  ;;  %v12726_v10 = vpop.f32.mrb[73].mxu1  ;;  %v12731_v54 = vpop.f32.mrb[107].mxu0  ;;  %v11974_v2 = vld [vmem:[%s15319_s26 + $0x3] ss:$0 sm:$0xff] }
0x2327   :  { %v10982_v63 = vrot.slane %v10974_v43, %v13399_v19  ;;  %v10989_v21 = vrot.slane %v10975_v41, %v13399_v19  ;;  %v10998_v36 = vrot.slane %v10990_v49, %v13399_v19  ;;  %v11005_v30 = vrot.slane %v10991_v7, %v13399_v19 }
0x2329   :  { %v11006_v55 = vcombine.low %v10982_v63, %v10998_v36  ;;  %v11007_v47 = vcombine.high %v10982_v63, %v10998_v36  ;;  %v11022_v35 = vcombine.low %v10989_v21, %v11005_v30  ;;  %v11023_v45 = vcombine.high %v10989_v21, %v11005_v30 }
0x232b   :  { %v11014_v6 = vrot.slane %v11006_v55, %v13402_v25  ;;  %v11021_v11 = vrot.slane %v11007_v47, %v13402_v25  ;;  %v11030_v22 = vrot.slane %v11022_v35, %v13402_v25  ;;  %v11037_v62 = vrot.slane %v11023_v45, %v13402_v25 }
0x232d   :  { %v11110_v17 = vcombine.low %v11014_v6, %v11021_v11  ;;  %v11965_v4 = vcombine.high %v11014_v6, %v11021_v11  ;;  %v11126_v38 = vcombine.low %v11030_v22, %v11037_v62  ;;  %v11966_v46 = vcombine.high %v11030_v22, %v11037_v62  ;;  %v12938_v62 = vld [vmem:[%s15248_s10 + $0x30] sm:$0xff]  }
0x232e   :  { %12741 = vmatpush3.bf16.msra.mxu0 %v12938_v62 }
0x232f   :  { %v11117_v8 = vrot.slane %v11110_v17, %v13399_v19  ;;  %v11125_v9 = vrot.slane %v11965_v4, %v13399_v19  ;;  %v11133_v12 = vrot.slane %v11126_v38, %v13399_v19  ;;  %v11141_v14 = vrot.slane %v11966_v46, %v13399_v19  ;;  %v12939_v17 = vld [vmem:[%s15248_s10 + $0x38] sm:$0xff]   ;;  %12742 = vmatprep.subr.bf16.mxu0 %v13140_v50  ;;  %v12940_v4 = vld [vmem:[%s15250_s12 + $0xc0] sm:$0xff]   ;;  %v12941_v38 = vld [vmem:[%s15250_s12 + $0xc8] sm:$0xff]  }
0x2330   :  { %v12942_v46 = vld [vmem:[%s15250_s12 + $0xd0] sm:$0xff]  }
0x2331   :  { %v11143_v27 = vcombine.high %v11117_v8, %v11125_v9  ;;  %v11159_v5 = vcombine.high %v11133_v12, %v11141_v14  ;;  %v11142_v59 = vcombine.low %v11117_v8, %v11125_v9  ;;  %v11158_v32 = vcombine.low %v11133_v12, %v11141_v14  ;;  %v12944_v8 = vld [vmem:[%s15250_s12 + $0xe0] sm:$0xff]   ;;  %v12945_v9 = vld [vmem:[%s15250_s12 + $0xe8] sm:$0xff]  }
0x2332   :  { %12743 = vmatpush3.bf16.msra.mxu0 %v12939_v17 }
0x2333   :  { %v11157_v13 = vrot.slane %v11143_v27, %v13402_v25  ;;  %v11173_v16 = vrot.slane %v11159_v5, %v13402_v25  ;;  %v11150_v18 = vrot.slane %v11142_v59, %v13402_v25  ;;  %v11166_v20 = vrot.slane %v11158_v32, %v13402_v25  ;;  %12768 = vmatprep.subr.bf16.mxu0 %v13140_v50 }
0x2335   :  { %v11176_v19 = vcombine.low %v11157_v13, %v11173_v16  ;;  %v11175_v48 = vcombine.high %v11150_v18, %v11166_v20  ;;  %v11177_v15 = vcombine.high %v11157_v13, %v11173_v16  ;;  %v11174_v1 = vcombine.low %v11150_v18, %v11166_v20  ;;  %v11975_v18 = vld [vmem:[%s15246_s8 + $0x3] ss:$0 sm:$0xff] }
0x2337   :  { %v12882_v26 = vpack.i.bf16 %v11176_v19, %v11108_v53  ;;  %v12877_v39 = vpack.i.bf16 %v11175_v48, %v11107_v52  ;;  %v12887_v40 = vpack.i.bf16 %v11177_v15, %v11109_v28  ;;  %v11976_v48 = vld [vmem:[%s15247_s9 + $0x3] ss:$0 sm:$0xff] }
0x2339   :  { %12883 = vrot.lane.b32.xlu0 %v12882_v26, %s15308_s24  ;;  %12878 = vrot.lane.b32.xlu1 %v12877_v39, %s15309_s25  ;;  %s15320_s24 = sld [smem:[#allocation12_spill]] }
0x233d   :  { %12888 = vrot.lane.b32.xlu1 %v12887_v40, %s15310_s20  ;;  %v12946_v40 = vld [vmem:[%s15250_s12 + $0xf0] sm:$0xff]  }
0x23ab   :  { %v12884_v25 = vpop.permute.xlu0 %12883  ;;  %v12879_v33 = vpop.permute.xlu1 %12878 }
0x23ac   :  { %v12881_v60 = vunpack.i.h.bf16 %v12879_v33  ;;  %v12880_v0 = vunpack.i.l.bf16 %v12879_v33  ;;  %v12886_v37 = vunpack.i.h.bf16 %v12884_v25  ;;  %v12885_v44 = vunpack.i.l.bf16 %v12884_v25  ;;  %v12947_v25 = vld [vmem:[%s15250_s12 + $0xf8] sm:$0xff]   ;;  %v11981_v33 = vld [vmem:[%s15249_s11 + $0x3] ss:$0 sm:$0xff] }
0x23ae   :  { %v11202_v29 = vsel %vm1162_vm4, %v11106_v34, %v12880_v0  ;;  %v11203_v58 = vsel %vm1162_vm4, %v11174_v1, %v12881_v60 }
0x23af   :  { %v12889_v3 = vpop.permute.xlu1 %12888  ;;  %v11204_v31 = vsel %vm2709_vm6, %v11202_v29, %v12885_v44  ;;  %v11205_v53 = vsel %vm2709_vm6, %v11203_v58, %v12886_v37 }
0x23b0   :  { %v12891_v57 = vunpack.i.h.bf16 %v12889_v3  ;;  %v12890_v56 = vunpack.i.l.bf16 %v12889_v3 }
0x23b2   :  { %v11206_v52 = vsel %vm2712_vm7, %v11204_v31, %v12890_v56  ;;  %v11207_v28 = vsel %vm2712_vm7, %v11205_v53, %v12891_v57  ;;  %v12009_v53 = vld [vmem:[%s15304_s28 + $0x3] ss:$0 sm:$0xff] }
0x23b3   :  { %v11208_v24 = vpack.c.bf16 %v11207_v28, %v11206_v52 }
0x23b5   :  { %12737 = vmatmul.mubr.msk.bf16.vlgmr.msra.gmra.mrb[76].mxu1 %vm177_vm2, %v11208_v24 }
0x23b6   :  { %12764 = vmatprep.mubr.msk.bf16.mxu1 %vm13141_vm3, %v13140_v50  ;;  %12749 = vmatpush3.bf16.msra.mxu1 %v12940_v4 }
0x23b7   :  { %12750 = vmatprep.subr.bf16.mxu1 %v13140_v50 }
0x23ba   :  { %12751 = vmatpush3.bf16.msra.mxu1 %v12941_v38 }
0x23bb   :  { %12752 = vmatprep.subr.bf16.mxu1 %v13140_v50 }
0x23be   :  { %12753 = vmatpush3.bf16.msra.mxu1 %v12942_v46  ;;  %v12010_v46 = vld [vmem:[%s15321_s23] ss:$0 sm:$0xff] }
0x23bf   :  { %12754 = vmatprep.subr.bf16.mxu1 %v13140_v50 }
0x23c2   :  { %12755 = vmatpush3.bf16.msra.mxu1 %v12943_v51 }
0x23c3   :  { %12756 = vmatprep.subr.bf16.mxu1 %v13140_v50 }
0x23c6   :  { %12757 = vmatpush3.bf16.msra.mxu1 %v12944_v8 }
0x23c7   :  { %12758 = vmatprep.subr.bf16.mxu1 %v13140_v50 }
0x23ca   :  { %12759 = vmatpush3.bf16.msra.mxu1 %v12945_v9 }
0x23cb   :  { %12760 = vmatprep.subr.bf16.mxu1 %v13140_v50 }
0x23ce   :  { %12761 = vmatpush3.bf16.msra.mxu1 %v12946_v40 }
0x23cf   :  { %12762 = vmatprep.subr.bf16.mxu1 %v13140_v50 }
0x23d2   :  { %12763 = vmatpush3.bf16.msra.mxu1 %v12947_v25 }
0x2488   :  { %v11263_v34 = vpop.f32.mrb[76].mxu1 }
0x2489   :  { %v11270_v43 = vadd.f32 %v11263_v34, %v14717_v61  ;;  %v12738_v41 = vpop.f32.mrb[77].mxu1 }
0x248a   :  { %v11266_v49 = vpop.f32.mrb[78].mxu1 }
0x248b   :  { %v15135_v7 = vadd.f32 %v11974_v2, %v11270_v43  ;;  %v11271_v10 = vadd.f32 %v11266_v49, %v14720_v42  ;;  %v12739_v54 = vpop.f32.mrb[79].mxu1 }
0x248d   :  { %v15138_v63 = vadd.f32 %v11974_v2, %v11271_v10  ;;  %v11281_v21 = vsel %vm177_vm2, %v15135_v7, 0.0 }
0x248e   :  { %11282 = vadd.xlane.f32.xlu0 %v11281_v21 }
0x248f   :  { %v11284_v36 = vsel %vm177_vm2, %v15138_v63, 0.0 }
0x2490   :  { %11285 = vadd.xlane.f32.xlu1 %v11284_v36 }
0x251b   :  { %v11283_v30 = vpop.xlane.xlu0 %11282 }
0x251c   :  { %v11287_v55 = vmul.f32 0.03125, %v11283_v30 }
0x251d   :  { %v11286_v61 = vpop.xlane.xlu1 %11285 }
0x251e   :  { %v11289_v47 = vsub.f32 %v15135_v7, %v11287_v55  ;;  %v11288_v35 = vmul.f32 0.03125, %v11286_v61 }
0x2520   :  { %v11290_v45 = vsub.f32 %v15138_v63, %v11288_v35  ;;  %v11291_v42 = vmul.f32 %v11289_v47, %v11289_v47 }
0x2522   :  { %v11293_v6 = vsel %vm177_vm2, %v11291_v42, 0.0  ;;  %v11292_v11 = vmul.f32 %v11290_v45, %v11290_v45  ;;  %v12949_v42 = vld [vmem:[%s15320_s24 + $0x8] sm:$0xff]  }
0x2523   :  { %11294 = vadd.xlane.f32.xlu0 %v11293_v6 }
0x2524   :  { %v11296_v22 = vsel %vm177_vm2, %v11292_v11, 0.0 }
0x2527   :  { %11297 = vadd.xlane.f32.xlu0 %v11296_v22 }
0x25b0   :  { %v11295_v12 = vpop.xlane.xlu0 %11294 }
0x25b1   :  { %v11299_v14 = vmul.f32 0.03125, %v11295_v12 }
0x25b3   :  { %v11301_v27 = vadd.f32 1e-05, %v11299_v14 }
0x25b4   :  { %v11298_v5 = vpop.xlane.xlu0 %11297 }
0x25b5   :  { %13106 = vrsqrt.f32 %v11301_v27  ;;  %v11300_v59 = vmul.f32 0.03125, %v11298_v5 }
0x25b7   :  { %v11302_v32 = vadd.f32 1e-05, %v11300_v59 }
0x25b9   :  { %13108 = vrsqrt.f32 %v11302_v32  ;;  %v12012_v32 = vld [vmem:[%s15323_s16] ss:$0 sm:$0xff] }
0x25bf   :  { %v13107_v13 = vpop.eup %13106 }
0x25c0   :  { %v11305_v16 = vmul.f32 %v13107_v13, %v11289_v47 }
0x25c2   :  { %v11311_v23 = vmul.f32 %v11975_v18, %v11305_v16 }
0x25c3   :  { %v13109_v20 = vpop.eup %13108 }
0x25c4   :  { %v11306_v19 = vmul.f32 %v13109_v20, %v11290_v45  ;;  %v11317_v1 = vadd.f32 %v11976_v48, %v11311_v23  ;;  %v12948_v45 = vld [vmem:[%s15320_s24] sm:$0xff]  }
0x25c6   :  { %v11312_v15 = vmul.f32 %v11975_v18, %v11306_v19 }
0x25c8   :  { %v11318_v26 = vadd.f32 %v11976_v48, %v11312_v15 }
0x25ca   :  { %v11319_v39 = vpack.c.bf16 %v11318_v26, %v11317_v1 }
0x25cc   :  { %12745 = vmatmul.mubr.msk.bf16.vlgmr.msra.gmra.mrb[108].mxu0 %vm177_vm2, %v11319_v39 }
0x25cd   :  { %12772 = vmatprep.mubr.msk.bf16.mxu0 %vm13141_vm3, %v13140_v50  ;;  %12769 = vmatpush3.bf16.msra.mxu0 %v12948_v45 }
0x25ce   :  { %12770 = vmatprep.subr.bf16.mxu0 %v13140_v50  ;;  %v12011_v50 = vld [vmem:[%s15322_s15] ss:$0 sm:$0xff] }
0x25d1   :  { %12771 = vmatpush3.bf16.msra.mxu0 %v12949_v42 }
0x269f   :  { %v11379_v60 = vpop.f32.mrb[108].mxu0 }
0x26a0   :  { %v11380_v0 = vadd.f32 %v11981_v33, %v11379_v60  ;;  %v12746_v37 = vpop.f32.mrb[109].mxu0 }
0x26a1   :  { %v11382_v44 = vpop.f32.mrb[110].mxu0 }
0x26a2   :  { %v11383_v29 = vadd.f32 %v11981_v33, %v11382_v44  ;;  %v12747_v58 = vpop.f32.mrb[111].mxu0  ;;  %v11386_v3 = vmax.f32 %v11380_v0, 0.0 }
0x26a4   :  { %v11387_v57 = vmax.f32 %v11383_v29, 0.0 }
0x26a6   :  { %v11388_v56 = vpack.c.bf16 %v11387_v57, %v11386_v3 }
0x26a8   :  { %12765 = vmatmul.mubr.bf16.vlgmr.msra.gmra.mrb[80].mxu1 %v11388_v56 }
0x277b   :  { %v11488_v31 = vpop.f32.mrb[80].mxu1 }
0x277c   :  { %v11495_v52 = vadd.f32 %v11488_v31, %v15135_v7  ;;  %v12766_v28 = vpop.f32.mrb[81].mxu1 }
0x277d   :  { %v11491_v24 = vpop.f32.mrb[82].mxu1 }
0x277e   :  { %v11502_v34 = vadd.f32 %v12009_v53, %v11495_v52  ;;  %v11496_v2 = vadd.f32 %v11491_v24, %v15138_v63  ;;  %v12767_v43 = vpop.f32.mrb[83].mxu1 }
0x2780   :  { %v11503_v41 = vadd.f32 %v12009_v53, %v11496_v2  ;;  %v11506_v49 = vsel %vm177_vm2, %v11502_v34, 0.0 }
0x2781   :  { %11507 = vadd.xlane.f32.xlu1 %v11506_v49 }
0x2782   :  { %v11509_v10 = vsel %vm177_vm2, %v11503_v41, 0.0 }
0x2783   :  { %11510 = vadd.xlane.f32.xlu0 %v11509_v10 }
0x280e   :  { %v11508_v54 = vpop.xlane.xlu1 %11507 }
0x280f   :  { %v11512_v21 = vmul.f32 0.03125, %v11508_v54 }
0x2810   :  { %v11511_v36 = vpop.xlane.xlu0 %11510 }
0x2811   :  { %v11514_v30 = vsub.f32 %v11502_v34, %v11512_v21  ;;  %v11513_v55 = vmul.f32 0.03125, %v11511_v36 }
0x2813   :  { %v11515_v61 = vsub.f32 %v11503_v41, %v11513_v55  ;;  %v11516_v7 = vmul.f32 %v11514_v30, %v11514_v30 }
0x2815   :  { %v11518_v47 = vsel %vm177_vm2, %v11516_v7, 0.0  ;;  %v11517_v35 = vmul.f32 %v11515_v61, %v11515_v61 }
0x2816   :  { %11519 = vadd.xlane.f32.xlu1 %v11518_v47 }
0x2817   :  { %v11521_v63 = vsel %vm177_vm2, %v11517_v35, 0.0 }
0x2818   :  { %11522 = vadd.xlane.f32.xlu0 %v11521_v63 }
0x28a3   :  { %v11520_v6 = vpop.xlane.xlu1 %11519 }
0x28a4   :  { %v11524_v11 = vmul.f32 0.03125, %v11520_v6 }
0x28a5   :  { %v11523_v22 = vpop.xlane.xlu0 %11522 }
0x28a6   :  { %v11526_v62 = vadd.f32 1e-05, %v11524_v11  ;;  %v11525_v17 = vmul.f32 0.03125, %v11523_v22 }
0x28a8   :  { %13110 = vrsqrt.f32 %v11526_v62  ;;  %v11527_v4 = vadd.f32 1e-05, %v11525_v17 }
0x28aa   :  { %13112 = vrsqrt.f32 %v11527_v4 }
0x28b2   :  { %v13111_v38 = vpop.eup %13110 }
0x28b3   :  { %v11530_v51 = vmul.f32 %v13111_v38, %v11514_v30 }
0x28b4   :  { %v13113_v8 = vpop.eup %13112 }
0x28b5   :  { %v11538_v9 = vmul.f32 %v12010_v46, %v11530_v51  ;;  %v11531_v12 = vmul.f32 %v13113_v8, %v11515_v61 }
0x28b7   :  { %v11539_v14 = vmul.f32 %v12010_v46, %v11531_v12  ;;  %v11546_v27 = vadd.f32 %v12011_v50, %v11538_v9 }
0x28b9   :  { %v11547_v5 = vadd.f32 %v12011_v50, %v11539_v14 }
0x28bb   :  { %v11548_v59 = vpack.c.bf16 %v11547_v5, %v11546_v27 }
0x28bd   :  { %12773 = vmatmul.mubr.msk.bf16.vlgmr.msra.gmra.mrb[112].mxu0 %vm177_vm2, %v11548_v59 }
0x2990   :  { %v11609_v13 = vpop.f32.mrb[112].mxu0 }
0x2991   :  { %v11610_v16 = vadd.f32 %v12012_v32, %v11609_v13  ;;  %v12774_v18 = vpop.f32.mrb[113].mxu0 }
0x2992   :  { %v11612_v20 = vpop.f32.mrb[114].mxu0 }
0x2993   :  { %11616 = vst [vmem:[#allocation2] sm:$0xff] %v11610_v16  ;;  %v11613_v23 = vadd.f32 %v12012_v32, %v11612_v20  ;;  %v12775_v19 = vpop.f32.mrb[115].mxu0 }
0x2995   :  { %11617 = vst [vmem:[#allocation2 + $0x8] sm:$0xff] %v11613_v23 }
0x2996   :  { %13125 = shalt.err (!%p13122_p4)
}
0x2997   :  { %s15324_s14 = sld [smem:[#allocation14_spill]] }
0x299d   :  { %s13126_s6 = scalar_lea.hbm %s15324_s14, 256 }
0x299e   :  { %p13127_p5 = scmp.ne.s32.totalorder %s15324_s14, %s13126_s6  ;;  %p13130_p6 = scmp.lt.u32.totalorder %s13126_s6, %s15324_s14 }
0x29a0   :  { %p13132_p7 = pnand %p13130_p6, %p13127_p5 }
0x29a2   :  { %13135 = shalt.err (!%p13132_p7)
}
0x29a3   :  { %s13160_s4 = smov 128  }
0x29a4   :  { %11629 = dma.vmem_to_hbm [thread:$0]  %s11624_s19, 256, %s15324_s14, [#allocation3], %s13160_s4, %s13160_s4, %s15309_s25  }
0x29a5   :  { %13136 = dma.done.wait [#allocation3], 256  }
0x29a6   :  { %13137 = vsyncadd [#allocation3], 4294967040 }
0x29a7   :  { %11633 = vsyncpa [#allocation3], 1 }

</bundles_post_ra>
